<compile_context>
chip_gen: v7x
topology: tpu7x:2x2x1
jax: 0.10.0
libtpu: 0.0.40
codegen_flags: <defaults>
</compile_context>

<pallas_src>
import math
from functools import partial

import jax
import jax.numpy as jnp
from jax.experimental import pallas as pl
from jax.experimental.pallas import tpu as pltpu


# ----------------------------- kernel ---------------------------------------


def _layer_norm(x, gamma, beta, eps):
    # PyTorch nn.LayerNorm over last dim (biased variance), f32 math.
    mu = jnp.mean(x, axis=-1, keepdims=True)
    var = jnp.mean((x - mu) ** 2, axis=-1, keepdims=True)
    return (x - mu) * jax.lax.rsqrt(var + eps) * gamma + beta


def bsarec_kernel(
    x_ref,        # (Bt, S, H)   input block (any float dtype)
    mask_ref,     # (1 or Bt, S, S) f32 additive attention mask
    u_ref,        # (S, r)       bf16 low-pass orthonormal basis
    a_low_ref,    # (1, H) f32   = 1 - sqrt_beta^2
    a_x_ref,      # (1, H) f32   = 1 + sqrt_beta^2
    fl_g_ref, fl_b_ref,          # FrequencyLayer LayerNorm gamma/beta (1, H) f32
    wqkv_ref,     # (H, 3*Hp) bf16  fused+head-padded Q|K|V weight (scale folded into Q)
    bqkv_ref,     # (1, 3*Hp) f32
    wd_ref,       # (Hp, H) bf16   output projection (zero rows at padded head dims)
    bd_ref,       # (1, H)  f32
    at_g_ref, at_b_ref,          # attention LayerNorm gamma/beta (1, H) f32
    out_ref,      # (Bt, S, H)   output block (same dtype as input)
    ctx_ref,      # VMEM scratch (Bt, S, Hp) f32 -- per-head context written in place
    *,
    n_heads, alpha, fl_eps, ln_eps, exp_in_bf16,
):
    f32 = jnp.float32
    bf16 = jnp.bfloat16
    Bt, S, H = x_ref.shape
    Hp = wd_ref.shape[0]
    hd_p = Hp // n_heads

    x3 = x_ref[...].astype(f32)          # elementwise math stays f32
    x2 = x3.reshape(Bt * S, H)
    x3_bf = x3.astype(bf16)              # MXU input dtype

    # ---------------- FrequencyLayer branch ("dsp") ----------------
    # rfft -> zero high freqs -> irfft (norm='ortho') == orthogonal projection U U^T,
    # computed as two skinny bf16 matmuls with f32 accumulation: low = U @ (U^T @ x).
    u_b = u_ref[...]                                            # (S, r) bf16
    # NOTE(perf): broadcast kept (bf16) because Mosaic dot_general needs matching batch
    # dims; the (S, Bt*H)-slab alternative costs two (Bt,S,H) relayouts per grid step.
    ub = jnp.broadcast_to(u_b[None], (Bt,) + u_b.shape)         # (Bt, S, r) bf16
    coef = jnp.einsum("bsr,bsh->brh", ub, x3_bf,
                      preferred_element_type=f32)               # (Bt, r, H) f32
    low3 = jnp.einsum("bsr,brh->bsh", ub, coef.astype(bf16),
                      preferred_element_type=f32)               # (Bt, S, H) f32
    low2 = low3.reshape(Bt * S, H)
    # seq_emb + x == (1 - sb^2)*low + (1 + sb^2)*x  (scales precomputed in the wrapper)
    fl_in = a_low_ref[...] * low2 + a_x_ref[...] * x2
    dsp = _layer_norm(fl_in, fl_g_ref[...], fl_b_ref[...], fl_eps)

    # ---------------- MultiHeadAttention branch ("gsp") ----------------
    qkv = jnp.dot(x2.astype(bf16), wqkv_ref[...],
                  preferred_element_type=f32) + bqkv_ref[...]   # (Bt*S, 3*Hp) f32
    qkv = qkv.reshape(Bt, S, 3 * Hp)
    mask = mask_ref[...].astype(f32)     # (1 or Bt, S, S); broadcasts over Bt

    # Static head loop; lane-aligned (multiple-of-128) slices; each head's context is
    # stored straight into the VMEM scratch (no concatenate, temporaries die per head).
    for h in range(n_heads):
        qh = qkv[:, :, h * hd_p:(h + 1) * hd_p].astype(bf16)
        kh = qkv[:, :, Hp + h * hd_p:Hp + (h + 1) * hd_p].astype(bf16)
        vh = qkv[:, :, 2 * Hp + h * hd_p:2 * Hp + (h + 1) * hd_p].astype(bf16)

        # 1/sqrt(hd) already folded into Wq/bq.
        scores = jnp.einsum("bqd,bkd->bqk", qh, kh,
                            preferred_element_type=f32) + mask      # (Bt,S,S) f32
        m = jnp.max(scores, axis=-1, keepdims=True)
        z = scores - m
        if exp_in_bf16:   # v6e/v7x only (bf16 EUP); keep stats in f32
            e = jnp.exp(z.astype(bf16)).astype(f32)
        else:
            e = jnp.exp(z)
        denom = jnp.sum(e, axis=-1, keepdims=True)
        probs = e * pl.reciprocal(denom, approx=True)
        ctx_ref[:, :, h * hd_p:(h + 1) * hd_p] = jnp.einsum(
            "bqk,bkd->bqd", probs.astype(bf16), vh, preferred_element_type=f32)

    ctx = ctx_ref[...].reshape(Bt * S, Hp).astype(bf16)
    attn_out = jnp.dot(ctx, wd_ref[...], preferred_element_type=f32) + bd_ref[...]
    gsp = _layer_norm(attn_out + x2, at_g_ref[...], at_b_ref[...], ln_eps)

    out_ref[...] = (alpha * dsp + (1.0 - alpha) * gsp).reshape(Bt, S, H).astype(out_ref.dtype)


# ----------------------------- parameter prep --------------------------------


def build_lowpass_basis(seq_len, c_kept, pad_to=8):
    """Orthonormal basis U (S, r_pad) of the kept-frequency subspace so that
    rfft -> zero bins >= c_kept -> irfft (norm='ortho')  ==  U @ U^T  (exactly)."""
    t = jnp.arange(seq_len, dtype=jnp.float32)
    cols = [jnp.full((seq_len,), 1.0 / math.sqrt(seq_len), jnp.float32)]   # DC
    for k in range(1, c_kept):
        if 2 * k == seq_len:          # Nyquist bin (real only)
            cols.append(jnp.cos(math.pi * t) / math.sqrt(seq_len))
        elif 2 * k < seq_len:
            ang = (2.0 * math.pi * k / seq_len) * t
            cols.append(jnp.cos(ang) * math.sqrt(2.0 / seq_len))
            cols.append(jnp.sin(ang) * math.sqrt(2.0 / seq_len))
    u = jnp.stack(cols, axis=1)                                            # (S, r)
    r = u.shape[1]
    r_pad = max(pad_to, ((r + pad_to - 1) // pad_to) * pad_to)
    if r_pad > r:  # zero columns don't change the projection U U^T
        u = jnp.concatenate([u, jnp.zeros((seq_len, r_pad - r), jnp.float32)], axis=1)
    return u


def prepare_bsarec_params(raw, *, n_heads, seq_len, c, lane=128):
    """One-time parameter transform (hoisted out of the per-call wrapper):
       - fuse Q|K|V weights, fold 1/sqrt(hd) into Q, zero-pad each head to a 128-lane
         multiple (exact math: padded Q/K/V columns and Wd rows are zero),
       - bf16 weights for the MXU, f32 biases / LayerNorm params,
       - precompute the low-pass orthonormal basis and the FrequencyLayer blend scales."""
    f32, bf16 = jnp.float32, jnp.bfloat16
    H = raw["wq"].shape[0]
    assert H % n_heads == 0
    hd = H // n_heads
    hd_pad = hd if hd % lane == 0 else ((hd + lane - 1) // lane) * lane
    Hp = n_heads * hd_pad
    scale = 1.0 / math.sqrt(hd)

    def pad_cols(w, b, s=1.0):
        w = (w.astype(f32) * s).reshape(H, n_heads, hd)
        b = (b.astype(f32) * s).reshape(1, n_heads, hd)
        wp = jnp.zeros((H, n_heads, hd_pad), f32).at[:, :, :hd].set(w)
        bp = jnp.zeros((1, n_heads, hd_pad), f32).at[:, :, :hd].set(b)
        return wp.reshape(H, Hp), bp.reshape(1, Hp)

    wq, bq = pad_cols(raw["wq"], raw["bq"], scale)     # fold 1/sqrt(hd) into Q
    wk, bk = pad_cols(raw["wk"], raw["bk"])
    wv, bv = pad_cols(raw["wv"], raw["bv"])
    wqkv = jnp.concatenate([wq, wk, wv], axis=1).astype(bf16)          # (H, 3*Hp)
    bqkv = jnp.concatenate([bq, bk, bv], axis=1).astype(f32)           # (1, 3*Hp)
    wd = jnp.zeros((n_heads, hd_pad, H), f32).at[:, :hd, :].set(
        raw["wd"].astype(f32).reshape(n_heads, hd, H)).reshape(Hp, H).astype(bf16)

    sb = raw["sqrt_beta"].reshape(1, H).astype(f32)
    c_kept = c // 2 + 1
    return {
        "u": build_lowpass_basis(seq_len, c_kept).astype(bf16),
        "a_low": 1.0 - sb * sb,
        "a_x": 1.0 + sb * sb,
        "fl_gamma": raw["fl_gamma"].reshape(1, H).astype(f32),
        "fl_beta": raw["fl_beta"].reshape(1, H).astype(f32),
        "wqkv": wqkv, "bqkv": bqkv,
        "wd": wd, "bd": raw["bd"].reshape(1, H).astype(f32),
        "at_gamma": raw["at_gamma"].reshape(1, H).astype(f32),
        "at_beta": raw["at_beta"].reshape(1, H).astype(f32),
        "n_heads": n_heads,
    }


# ----------------------------- wrapper ---------------------------------------


def _default_vmem_limit_bytes():
    # Per-generation guidance: ~96-100 MiB on v5e/v6e (128 MiB physical), ~48 MiB on v7x
    # (64 MiB physical). Query the chip when possible; fall back to a universally-safe value.
    try:
        cap = pltpu.get_tpu_info().vmem_capacity_bytes
        return min(100 * 1024 * 1024, (int(cap) * 3) // 4)
    except Exception:
        return 48 * 1024 * 1024


def _block_vmem_bytes(Bt, S, H, Hp, r, in_bytes, out_bytes):
    """Rough per-block VMEM footprint (streamed blocks double-buffered, constants single)."""
    stream = 2 * Bt * S * H * (in_bytes + out_bytes)                 # x / out double-buffer
    resident = ((H * 3 * Hp + Hp * H) * 2                            # bf16 weights
                + (3 * Hp + 7 * H) * 4 + S * r * 2 + S * S * 4)      # biases/LN/basis/mask
    temps = (Bt * S * r * 2 + Bt * r * H * 4                         # U broadcast + coef
             + 4 * Bt * S * H * 4                                    # low / fl_in / dsp / gsp
             + Bt * S * 3 * Hp * 4                                   # qkv (f32)
             + Bt * S * Hp * 4                                       # ctx scratch
             + 3 * Bt * S * S * 4                                    # scores/e/probs (1 head)
             + 3 * Bt * S * Hp * 2)                                  # q/k/v head tiles (bf16)
    return stream + resident + temps


def _pick_block_b(B, S, H, Hp, r, *, vmem_budget, in_bytes=4, out_bytes=4, min_grid_steps=1):
    # On 1-TensorCore chips (v5e/v6e) prefer the largest block that fits (min_grid_steps=1);
    # pass min_grid_steps=2 only when sharding the grid across v7x's two TensorCores.
    divisors = sorted((d for d in range(1, B + 1) if B % d == 0), reverse=True)
    cands = [d for d in divisors if B // d >= min_grid_steps] or divisors
    for d in cands:
        if _block_vmem_bytes(d, S, H, Hp, r, in_bytes, out_bytes) <= vmem_budget:
            return d
    return min(cands)


def bsarec_layer(x, attn_mask, prep, *, alpha, ln_eps, fl_eps=1e-12,
                 block_b=None, vmem_limit_bytes=None, min_grid_steps=1,
                 exp_in_bf16=False):
    B, S, H = x.shape
    n_heads = prep["n_heads"]
    Hp = prep["wd"].shape[0]
    u = prep["u"]
    r = u.shape[1]
    assert u.shape[0] == S, "low-pass basis was built for a different seq_len"

    vmem_limit = _default_vmem_limit_bytes() if vmem_limit_bytes is None else int(vmem_limit_bytes)
    itemsize = jnp.dtype(x.dtype).itemsize
    if block_b is None:
        Bt = _pick_block_b(B, S, H, Hp, r, vmem_budget=int(vmem_limit * 0.8),
                           in_bytes=itemsize, out_bytes=itemsize,
                           min_grid_steps=min_grid_steps)
    else:
        Bt = block_b
    assert B % Bt == 0
    grid = (B // Bt,)

    # ----- attention mask: additive, broadcast over heads; shared (batch==1) masks are
    # loaded once as a single grid-invariant block (no per-batch DMA). -----
    mask = jnp.asarray(attn_mask)
    if mask.ndim == 2:
        mask = mask[None]
    elif mask.ndim == 4:
        assert mask.shape[1] == 1, "per-head attention masks are not supported"
        mask = mask[:, 0]
    mask = mask.astype(jnp.float32)
    shared_mask = (mask.shape[0] == 1)
    if not shared_mask:
        assert mask.shape[0] == B
    # TODO(synk): generate standard causal/padding masks in-kernel with broadcasted_iota
    # instead of DMAing them; DMA path kept to support arbitrary masks (module semantics).

    kernel = partial(bsarec_kernel, n_heads=n_heads, alpha=float(alpha),
                     fl_eps=float(fl_eps), ln_eps=float(ln_eps),
                     exp_in_bf16=bool(exp_in_bf16))

    hd_p = Hp // n_heads
    cost = pl.CostEstimate(
        flops=int(2 * B * S * H * 3 * Hp + 2 * B * S * Hp * H
                  + 4 * B * n_heads * S * S * hd_p + 4 * B * S * r * H),
        transcendentals=int(B * n_heads * S * S),
        bytes_accessed=int(2 * B * S * H * itemsize + mask.size * 4
                           + prep["wqkv"].size * 2 + prep["wd"].size * 2 + S * r * 2),
    )

    def build_and_run(single_buffer_consts):
        def const_spec(shape):
            nd = len(shape)
            idx = lambda g, nd=nd: (0,) * nd
            if single_buffer_consts:
                # Grid-invariant blocks never re-DMA; single-buffer them to reclaim VMEM.
                return pl.BlockSpec(shape, idx, pipeline_mode=pl.Buffered(1))
            return pl.BlockSpec(shape, idx)

        if shared_mask:
            mask_spec = const_spec((1, S, S))
        else:
            mask_spec = pl.BlockSpec((Bt, S, S), lambda g: (g, 0, 0))

        in_specs = [
            pl.BlockSpec((Bt, S, H), lambda g: (g, 0, 0)),       # x
            mask_spec,                                           # additive mask
            const_spec(u.shape),                                 # low-pass basis U
            const_spec((1, H)), const_spec((1, H)),              # a_low, a_x
            const_spec((1, H)), const_spec((1, H)),              # filter LN gamma/beta
            const_spec((H, 3 * Hp)), const_spec((1, 3 * Hp)),    # Wqkv, bqkv
            const_spec((Hp, H)), const_spec((1, H)),             # Wd, bd
            const_spec((1, H)), const_spec((1, H)),              # attn LN gamma/beta
        ]
        return pl.pallas_call(
            kernel,
            out_shape=jax.ShapeDtypeStruct((B, S, H), x.dtype),
            grid=grid,
            in_specs=in_specs,
            out_specs=pl.BlockSpec((Bt, S, H), lambda g: (g, 0, 0)),
            scratch_shapes=[pltpu.VMEM((Bt, S, Hp), jnp.float32)],
            compiler_params=pltpu.CompilerParams(
                dimension_semantics=("parallel",),
                vmem_limit_bytes=int(vmem_limit)),
            cost_estimate=cost,
        )(
            x, mask, u,
            prep["a_low"], prep["a_x"], prep["fl_gamma"], prep["fl_beta"],
            prep["wqkv"], prep["bqkv"], prep["wd"], prep["bd"],
            prep["at_gamma"], prep["at_beta"],
        )

    try:
        return build_and_run(True)
    except Exception:
        # Defensive fallback if this jax build rejects pipeline_mode=pl.Buffered(1).
        return build_and_run(False)


# ----------------------------- pure-JAX reference -----------------------------


def bsarec_reference(x, attn_mask, raw, *, n_heads, alpha, ln_eps, c_kept):
    B, S, H = x.shape

    def ln(t, g, b, eps):
        mu = jnp.mean(t, axis=-1, keepdims=True)
        var = jnp.mean((t - mu) ** 2, axis=-1, keepdims=True)
        return (t - mu) / jnp.sqrt(var + eps) * g + b

    # FrequencyLayer (FFT-based, exactly as the PyTorch module)
    xf = jnp.fft.rfft(x, axis=1, norm="ortho")
    xf = xf.at[:, c_kept:, :].set(0)
    low = jnp.fft.irfft(xf, n=S, axis=1, norm="ortho").astype(jnp.float32)
    high = x - low
    seq_emb = low + raw["sqrt_beta"][None] ** 2 * high
    dsp = ln(seq_emb + x, raw["fl_gamma"][0], raw["fl_beta"][0], 1e-12)

    # MultiHeadAttention
    q = x @ raw["wq"] + raw["bq"]
    k = x @ raw["wk"] + raw["bk"]
    v = x @ raw["wv"] + raw["bv"]
    hd = H // n_heads
    q = q.reshape(B, S, n_heads, hd).transpose(0, 2, 1, 3)
    k = k.reshape(B, S, n_heads, hd).transpose(0, 2, 1, 3)
    v = v.reshape(B, S, n_heads, hd).transpose(0, 2, 1, 3)
    scores = jnp.einsum("bnqd,bnkd->bnqk", q, k) / math.sqrt(hd) + attn_mask
    probs = jax.nn.softmax(scores, axis=-1)
    ctx = jnp.einsum("bnqk,bnkd->bnqd", probs, v).transpose(0, 2, 1, 3).reshape(B, S, H)
    attn_out = ctx @ raw["wd"] + raw["bd"]
    gsp = ln(attn_out + x, raw["at_gamma"][0], raw["at_beta"][0], ln_eps)

    return alpha * dsp + (1.0 - alpha) * gsp


# ----------------------------- main ---------------------------------------


if __name__ == "__main__":
    B, S, H = 8, 8, 32
    N_HEADS = 2
    C = 5                    # FrequencyLayer c -> keeps c//2 + 1 = 3 frequency bins
    ALPHA = 0.7
    LN_EPS = 1e-12

    key = jax.random.PRNGKey(0)
    keys = jax.random.split(key, 16)

    def lin_w(k):  # (in, out), pre-transposed vs. torch's (out, in)
        return jax.random.normal(k, (H, H), jnp.float32) * 0.05

    def lin_b(k):
        return jax.random.normal(k, (1, H), jnp.float32) * 0.05

    raw_params = {
        "sqrt_beta": jax.random.normal(keys[0], (1, H), jnp.float32),
        "fl_gamma": jnp.ones((1, H), jnp.float32),
        "fl_beta": jnp.zeros((1, H), jnp.float32),
        "wq": lin_w(keys[1]), "bq": lin_b(keys[2]),
        "wk": lin_w(keys[3]), "bk": lin_b(keys[4]),
        "wv": lin_w(keys[5]), "bv": lin_b(keys[6]),
        "wd": lin_w(keys[7]), "bd": lin_b(keys[8]),
        "at_gamma": jnp.ones((1, H), jnp.float32),
        "at_beta": jnp.zeros((1, H), jnp.float32),
    }

    # One-time parameter transform (hoisted weight fusion / padding / casting).
    prep = prepare_bsarec_params(raw_params, n_heads=N_HEADS, seq_len=S, c=C)

    x = jax.random.normal(keys[9], (B, S, H), jnp.float32)
    # shared causal additive attention mask, shape (1, 1, S, S) (broadcast over batch/heads)
    causal = jnp.tril(jnp.ones((S, S), jnp.float32))
    attn_mask = ((1.0 - causal) * -10000.0)[None, None]

    out = bsarec_layer(x, attn_mask, prep, alpha=ALPHA, ln_eps=LN_EPS)
    out = jax.block_until_ready(out)

    ref = bsarec_reference(x, attn_mask, raw_params,
                           n_heads=N_HEADS, alpha=ALPHA, ln_eps=LN_EPS,
                           c_kept=C // 2 + 1)
    assert out.shape == (B, S, H)
    # bf16 MXU inputs (f32 accumulation) in BOTH branches => looser tolerance than pure-f32
    err = float(jnp.max(jnp.abs(out - ref)))
    assert jnp.allclose(out, ref, atol=3e-2, rtol=3e-2), err

    print("KERNEL_OK")
</pallas_src>

<mosaic_0001>
module attributes {stable_mosaic.version = 11 : i64} {
  func.func @bsarec_kernel(%arg0: i32, %arg1: memref<8x8x32xf32, #tpu.memory_space<vmem>>, %arg2: memref<1x8x8xf32, #tpu.memory_space<vmem>>, %arg3: memref<8x8xbf16, #tpu.memory_space<vmem>>, %arg4: memref<1x32xf32, #tpu.memory_space<vmem>>, %arg5: memref<1x32xf32, #tpu.memory_space<vmem>>, %arg6: memref<1x32xf32, #tpu.memory_space<vmem>>, %arg7: memref<1x32xf32, #tpu.memory_space<vmem>>, %arg8: memref<32x768xbf16, #tpu.memory_space<vmem>>, %arg9: memref<1x768xf32, #tpu.memory_space<vmem>>, %arg10: memref<256x32xbf16, #tpu.memory_space<vmem>>, %arg11: memref<1x32xf32, #tpu.memory_space<vmem>>, %arg12: memref<1x32xf32, #tpu.memory_space<vmem>>, %arg13: memref<1x32xf32, #tpu.memory_space<vmem>>, %arg14: memref<8x8x32xf32, #tpu.memory_space<vmem>>, %arg15: memref<8x8x256xf32, #tpu.memory_space<vmem>>) attributes {dimension_semantics = [#tpu.dimension_semantics<parallel>], iteration_bounds = array<i64: 1>, scalar_prefetch = 0 : i64, scratch_operands = 1 : i64, tpu.core_type = #tpu.core_type<tc>, window_params = [{transform_indices = @transform_0, window_bounds = array<i64: 8, 8, 32>}, {pipeline_mode = #tpu.pipeline_mode<synchronous>, transform_indices = @transform_1, window_bounds = array<i64: 1, 8, 8>}, {pipeline_mode = #tpu.pipeline_mode<synchronous>, transform_indices = @transform_2, window_bounds = array<i64: 8, 8>}, {pipeline_mode = #tpu.pipeline_mode<synchronous>, transform_indices = @transform_3, window_bounds = array<i64: 1, 32>}, {pipeline_mode = #tpu.pipeline_mode<synchronous>, transform_indices = @transform_4, window_bounds = array<i64: 1, 32>}, {pipeline_mode = #tpu.pipeline_mode<synchronous>, transform_indices = @transform_5, window_bounds = array<i64: 1, 32>}, {pipeline_mode = #tpu.pipeline_mode<synchronous>, transform_indices = @transform_6, window_bounds = array<i64: 1, 32>}, {pipeline_mode = #tpu.pipeline_mode<synchronous>, transform_indices = @transform_7, window_bounds = array<i64: 32, 768>}, {pipeline_mode = #tpu.pipeline_mode<synchronous>, transform_indices = @transform_8, window_bounds = array<i64: 1, 768>}, {pipeline_mode = #tpu.pipeline_mode<synchronous>, transform_indices = @transform_9, window_bounds = array<i64: 256, 32>}, {pipeline_mode = #tpu.pipeline_mode<synchronous>, transform_indices = @transform_10, window_bounds = array<i64: 1, 32>}, {pipeline_mode = #tpu.pipeline_mode<synchronous>, transform_indices = @transform_11, window_bounds = array<i64: 1, 32>}, {pipeline_mode = #tpu.pipeline_mode<synchronous>, transform_indices = @transform_12, window_bounds = array<i64: 1, 32>}, {transform_indices = @transform_13, window_bounds = array<i64: 8, 8, 32>}]} {
    %c0 = arith.constant 0 : index
    %c0_0 = arith.constant 0 : index
    %c0_1 = arith.constant 0 : index
    %0 = vector.load %arg1[%c0, %c0_0, %c0_1] : memref<8x8x32xf32, #tpu.memory_space<vmem>>, vector<8x8x32xf32>
    %1 = vector.shape_cast %0 : vector<8x8x32xf32> to vector<64x32xf32>
    %2 = arith.truncf %0 : vector<8x8x32xf32> to vector<8x8x32xbf16>
    %c0_2 = arith.constant 0 : index
    %c0_3 = arith.constant 0 : index
    %3 = vector.load %arg3[%c0_2, %c0_3] : memref<8x8xbf16, #tpu.memory_space<vmem>>, vector<8x8xbf16>
    %4 = vector.shape_cast %3 : vector<8x8xbf16> to vector<1x8x8xbf16>
    %5 = vector.shape_cast %4 : vector<1x8x8xbf16> to vector<1x8x8xbf16>
    %6 = vector.broadcast %5 : vector<1x8x8xbf16> to vector<8x8x8xbf16>
    "tpu.trace_start"() <{level = 10 : i32, message = "bsr,bsh->brh"}> : () -> ()
    %cst = arith.constant dense<0.000000e+00> : vector<8x8x32xf32>
    %7 = tpu.matmul %6, %2, %cst {dimension_numbers = #tpu.dot_dimension_numbers<[1], [1], [2], [2], [0, 0, 0, 2, 1, 2], [0], [0]>} : vector<8x8x8xbf16>, vector<8x8x32xbf16>, vector<8x8x32xf32> -> vector<8x8x32xf32>
    "tpu.trace_stop"() : () -> ()
    %8 = arith.truncf %7 : vector<8x8x32xf32> to vector<8x8x32xbf16>
    "tpu.trace_start"() <{level = 10 : i32, message = "bsr,brh->bsh"}> : () -> ()
    %cst_4 = arith.constant dense<0.000000e+00> : vector<8x8x32xf32>
    %9 = tpu.matmul %6, %8, %cst_4 {dimension_numbers = #tpu.dot_dimension_numbers<[2], [1], [1], [2], [0, 0, 0, 1, 1, 2], [0], [0]>} : vector<8x8x8xbf16>, vector<8x8x32xbf16>, vector<8x8x32xf32> -> vector<8x8x32xf32>
    "tpu.trace_stop"() : () -> ()
    %10 = vector.shape_cast %9 : vector<8x8x32xf32> to vector<64x32xf32>
    %c0_5 = arith.constant 0 : index
    %c0_6 = arith.constant 0 : index
    %11 = vector.load %arg4[%c0_5, %c0_6] : memref<1x32xf32, #tpu.memory_space<vmem>>, vector<1x32xf32>
    %12 = vector.broadcast %11 : vector<1x32xf32> to vector<64x32xf32>
    %13 = arith.mulf %12, %10 : vector<64x32xf32>
    %c0_7 = arith.constant 0 : index
    %c0_8 = arith.constant 0 : index
    %14 = vector.load %arg5[%c0_7, %c0_8] : memref<1x32xf32, #tpu.memory_space<vmem>>, vector<1x32xf32>
    %15 = vector.broadcast %14 : vector<1x32xf32> to vector<64x32xf32>
    %16 = arith.mulf %15, %1 : vector<64x32xf32>
    %17 = arith.addf %13, %16 : vector<64x32xf32>
    %c0_9 = arith.constant 0 : index
    %c0_10 = arith.constant 0 : index
    %18 = vector.load %arg6[%c0_9, %c0_10] : memref<1x32xf32, #tpu.memory_space<vmem>>, vector<1x32xf32>
    %c0_11 = arith.constant 0 : index
    %c0_12 = arith.constant 0 : index
    %19 = vector.load %arg7[%c0_11, %c0_12] : memref<1x32xf32, #tpu.memory_space<vmem>>, vector<1x32xf32>
    %cst_13 = arith.constant dense<0.000000e+00> : vector<64xf32>
    %20 = vector.multi_reduction <add>, %17, %cst_13 [1] : vector<64x32xf32> to vector<64xf32>
    %21 = vector.shape_cast %20 : vector<64xf32> to vector<64x1xf32>
    %cst_14 = arith.constant 3.200000e+01 : f32
    %22 = vector.broadcast %cst_14 : f32 to vector<64x1xf32>
    %23 = arith.divf %21, %22 : vector<64x1xf32>
    %24 = vector.broadcast %23 : vector<64x1xf32> to vector<64x32xf32>
    %25 = arith.subf %17, %24 : vector<64x32xf32>
    %26 = arith.mulf %25, %25 : vector<64x32xf32>
    %cst_15 = arith.constant dense<0.000000e+00> : vector<64xf32>
    %27 = vector.multi_reduction <add>, %26, %cst_15 [1] : vector<64x32xf32> to vector<64xf32>
    %28 = vector.shape_cast %27 : vector<64xf32> to vector<64x1xf32>
    %cst_16 = arith.constant 3.200000e+01 : f32
    %29 = vector.broadcast %cst_16 : f32 to vector<64x1xf32>
    %30 = arith.divf %28, %29 : vector<64x1xf32>
    %31 = vector.broadcast %23 : vector<64x1xf32> to vector<64x32xf32>
    %32 = arith.subf %17, %31 : vector<64x32xf32>
    %cst_17 = arith.constant 9.99999996E-13 : f32
    %33 = vector.broadcast %cst_17 : f32 to vector<64x1xf32>
    %34 = arith.addf %30, %33 : vector<64x1xf32>
    %35 = math.rsqrt %34 : vector<64x1xf32>
    %36 = vector.broadcast %35 : vector<64x1xf32> to vector<64x32xf32>
    %37 = arith.mulf %32, %36 : vector<64x32xf32>
    %38 = vector.broadcast %18 : vector<1x32xf32> to vector<64x32xf32>
    %39 = arith.mulf %37, %38 : vector<64x32xf32>
    %40 = vector.broadcast %19 : vector<1x32xf32> to vector<64x32xf32>
    %41 = arith.addf %39, %40 : vector<64x32xf32>
    %42 = arith.truncf %1 : vector<64x32xf32> to vector<64x32xbf16>
    %c0_18 = arith.constant 0 : index
    %c0_19 = arith.constant 0 : index
    %43 = vector.load %arg8[%c0_18, %c0_19] : memref<32x768xbf16, #tpu.memory_space<vmem>>, vector<32x768xbf16>
    %cst_20 = arith.constant dense<0.000000e+00> : vector<64x768xf32>
    %44 = tpu.matmul %42, %43, %cst_20 {dimension_numbers = #tpu.dot_dimension_numbers<[1], [0], [0], [1], [0, 0, 1, 1], [], []>} : vector<64x32xbf16>, vector<32x768xbf16>, vector<64x768xf32> -> vector<64x768xf32>
    %c0_21 = arith.constant 0 : index
    %c0_22 = arith.constant 0 : index
    %45 = vector.load %arg9[%c0_21, %c0_22] : memref<1x768xf32, #tpu.memory_space<vmem>>, vector<1x768xf32>
    %46 = vector.broadcast %45 : vector<1x768xf32> to vector<64x768xf32>
    %47 = arith.addf %44, %46 : vector<64x768xf32>
    %48 = vector.shape_cast %47 : vector<64x768xf32> to vector<8x8x768xf32>
    %c0_23 = arith.constant 0 : index
    %c0_24 = arith.constant 0 : index
    %c0_25 = arith.constant 0 : index
    %49 = vector.load %arg2[%c0_23, %c0_24, %c0_25] : memref<1x8x8xf32, #tpu.memory_space<vmem>>, vector<1x8x8xf32>
    %50 = vector.extract_strided_slice %48 {offsets = [0, 0, 0], sizes = [8, 8, 128], strides = [1, 1, 1]} : vector<8x8x768xf32> to vector<8x8x128xf32>
    %51 = arith.truncf %50 : vector<8x8x128xf32> to vector<8x8x128xbf16>
    %52 = vector.extract_strided_slice %48 {offsets = [0, 0, 256], sizes = [8, 8, 128], strides = [1, 1, 1]} : vector<8x8x768xf32> to vector<8x8x128xf32>
    %53 = arith.truncf %52 : vector<8x8x128xf32> to vector<8x8x128xbf16>
    %54 = vector.extract_strided_slice %48 {offsets = [0, 0, 512], sizes = [8, 8, 128], strides = [1, 1, 1]} : vector<8x8x768xf32> to vector<8x8x128xf32>
    %55 = arith.truncf %54 : vector<8x8x128xf32> to vector<8x8x128xbf16>
    "tpu.trace_start"() <{level = 10 : i32, message = "bqd,bkd->bqk"}> : () -> ()
    %cst_26 = arith.constant dense<0.000000e+00> : vector<8x8x8xf32>
    %56 = tpu.matmul %51, %53, %cst_26 {dimension_numbers = #tpu.dot_dimension_numbers<[2], [2], [1], [1], [0, 0, 0, 1, 1, 1], [0], [0]>} : vector<8x8x128xbf16>, vector<8x8x128xbf16>, vector<8x8x8xf32> -> vector<8x8x8xf32>
    "tpu.trace_stop"() : () -> ()
    %57 = vector.broadcast %49 : vector<1x8x8xf32> to vector<8x8x8xf32>
    %58 = arith.addf %56, %57 : vector<8x8x8xf32>
    %cst_27 = arith.constant dense<0xFF800000> : vector<8x8xf32>
    %59 = vector.multi_reduction <maximumf>, %58, %cst_27 [2] : vector<8x8x8xf32> to vector<8x8xf32>
    %60 = vector.shape_cast %59 : vector<8x8xf32> to vector<8x8x1xf32>
    %61 = vector.broadcast %60 : vector<8x8x1xf32> to vector<8x8x8xf32>
    %62 = arith.subf %58, %61 : vector<8x8x8xf32>
    %63 = math.exp %62 : vector<8x8x8xf32>
    %cst_28 = arith.constant dense<0.000000e+00> : vector<8x8xf32>
    %64 = vector.multi_reduction <add>, %63, %cst_28 [2] : vector<8x8x8xf32> to vector<8x8xf32>
    %65 = vector.shape_cast %64 : vector<8x8xf32> to vector<8x8x1xf32>
    %66 = tpu.reciprocal %65 {approx = true} : vector<8x8x1xf32> -> vector<8x8x1xf32>
    %67 = vector.broadcast %66 : vector<8x8x1xf32> to vector<8x8x8xf32>
    %68 = arith.mulf %63, %67 : vector<8x8x8xf32>
    %69 = arith.truncf %68 : vector<8x8x8xf32> to vector<8x8x8xbf16>
    "tpu.trace_start"() <{level = 10 : i32, message = "bqk,bkd->bqd"}> : () -> ()
    %cst_29 = arith.constant dense<0.000000e+00> : vector<8x8x128xf32>
    %70 = tpu.matmul %69, %55, %cst_29 {dimension_numbers = #tpu.dot_dimension_numbers<[2], [1], [1], [2], [0, 0, 0, 1, 1, 2], [0], [0]>} : vector<8x8x8xbf16>, vector<8x8x128xbf16>, vector<8x8x128xf32> -> vector<8x8x128xf32>
    "tpu.trace_stop"() : () -> ()
    %c0_30 = arith.constant 0 : index
    %c0_31 = arith.constant 0 : index
    %c0_32 = arith.constant 0 : index
    %71 = vector.load %arg15[%c0_30, %c0_31, %c0_32] : memref<8x8x256xf32, #tpu.memory_space<vmem>>, vector<8x8x128xf32>
    tpu.vector_store %arg15[%c0_30, %c0_31, %c0_32], %70 {strides = array<i32>} : memref<8x8x256xf32, #tpu.memory_space<vmem>>, vector<8x8x128xf32>,
    %72 = vector.extract_strided_slice %48 {offsets = [0, 0, 128], sizes = [8, 8, 128], strides = [1, 1, 1]} : vector<8x8x768xf32> to vector<8x8x128xf32>
    %73 = arith.truncf %72 : vector<8x8x128xf32> to vector<8x8x128xbf16>
    %74 = vector.extract_strided_slice %48 {offsets = [0, 0, 384], sizes = [8, 8, 128], strides = [1, 1, 1]} : vector<8x8x768xf32> to vector<8x8x128xf32>
    %75 = arith.truncf %74 : vector<8x8x128xf32> to vector<8x8x128xbf16>
    %76 = vector.extract_strided_slice %48 {offsets = [0, 0, 640], sizes = [8, 8, 128], strides = [1, 1, 1]} : vector<8x8x768xf32> to vector<8x8x128xf32>
    %77 = arith.truncf %76 : vector<8x8x128xf32> to vector<8x8x128xbf16>
    "tpu.trace_start"() <{level = 10 : i32, message = "bqd,bkd->bqk"}> : () -> ()
    %cst_33 = arith.constant dense<0.000000e+00> : vector<8x8x8xf32>
    %78 = tpu.matmul %73, %75, %cst_33 {dimension_numbers = #tpu.dot_dimension_numbers<[2], [2], [1], [1], [0, 0, 0, 1, 1, 1], [0], [0]>} : vector<8x8x128xbf16>, vector<8x8x128xbf16>, vector<8x8x8xf32> -> vector<8x8x8xf32>
    "tpu.trace_stop"() : () -> ()
    %79 = vector.broadcast %49 : vector<1x8x8xf32> to vector<8x8x8xf32>
    %80 = arith.addf %78, %79 : vector<8x8x8xf32>
    %cst_34 = arith.constant dense<0xFF800000> : vector<8x8xf32>
    %81 = vector.multi_reduction <maximumf>, %80, %cst_34 [2] : vector<8x8x8xf32> to vector<8x8xf32>
    %82 = vector.shape_cast %81 : vector<8x8xf32> to vector<8x8x1xf32>
    %83 = vector.broadcast %82 : vector<8x8x1xf32> to vector<8x8x8xf32>
    %84 = arith.subf %80, %83 : vector<8x8x8xf32>
    %85 = math.exp %84 : vector<8x8x8xf32>
    %cst_35 = arith.constant dense<0.000000e+00> : vector<8x8xf32>
    %86 = vector.multi_reduction <add>, %85, %cst_35 [2] : vector<8x8x8xf32> to vector<8x8xf32>
    %87 = vector.shape_cast %86 : vector<8x8xf32> to vector<8x8x1xf32>
    %88 = tpu.reciprocal %87 {approx = true} : vector<8x8x1xf32> -> vector<8x8x1xf32>
    %89 = vector.broadcast %88 : vector<8x8x1xf32> to vector<8x8x8xf32>
    %90 = arith.mulf %85, %89 : vector<8x8x8xf32>
    %91 = arith.truncf %90 : vector<8x8x8xf32> to vector<8x8x8xbf16>
    "tpu.trace_start"() <{level = 10 : i32, message = "bqk,bkd->bqd"}> : () -> ()
    %cst_36 = arith.constant dense<0.000000e+00> : vector<8x8x128xf32>
    %92 = tpu.matmul %91, %77, %cst_36 {dimension_numbers = #tpu.dot_dimension_numbers<[2], [1], [1], [2], [0, 0, 0, 1, 1, 2], [0], [0]>} : vector<8x8x8xbf16>, vector<8x8x128xbf16>, vector<8x8x128xf32> -> vector<8x8x128xf32>
    "tpu.trace_stop"() : () -> ()
    %c0_37 = arith.constant 0 : index
    %c0_38 = arith.constant 0 : index
    %c128 = arith.constant 128 : index
    %93 = vector.load %arg15[%c0_37, %c0_38, %c128] : memref<8x8x256xf32, #tpu.memory_space<vmem>>, vector<8x8x128xf32>
    tpu.vector_store %arg15[%c0_37, %c0_38, %c128], %92 {strides = array<i32>} : memref<8x8x256xf32, #tpu.memory_space<vmem>>, vector<8x8x128xf32>,
    %c0_39 = arith.constant 0 : index
    %c0_40 = arith.constant 0 : index
    %c0_41 = arith.constant 0 : index
    %94 = vector.load %arg15[%c0_39, %c0_40, %c0_41] : memref<8x8x256xf32, #tpu.memory_space<vmem>>, vector<8x8x256xf32>
    %95 = vector.shape_cast %94 : vector<8x8x256xf32> to vector<64x256xf32>
    %96 = arith.truncf %95 : vector<64x256xf32> to vector<64x256xbf16>
    %c0_42 = arith.constant 0 : index
    %c0_43 = arith.constant 0 : index
    %97 = vector.load %arg10[%c0_42, %c0_43] : memref<256x32xbf16, #tpu.memory_space<vmem>>, vector<256x32xbf16>
    %cst_44 = arith.constant dense<0.000000e+00> : vector<64x32xf32>
    %98 = tpu.matmul %96, %97, %cst_44 {dimension_numbers = #tpu.dot_dimension_numbers<[1], [0], [0], [1], [0, 0, 1, 1], [], []>} : vector<64x256xbf16>, vector<256x32xbf16>, vector<64x32xf32> -> vector<64x32xf32>
    %c0_45 = arith.constant 0 : index
    %c0_46 = arith.constant 0 : index
    %99 = vector.load %arg11[%c0_45, %c0_46] : memref<1x32xf32, #tpu.memory_space<vmem>>, vector<1x32xf32>
    %100 = vector.broadcast %99 : vector<1x32xf32> to vector<64x32xf32>
    %101 = arith.addf %98, %100 : vector<64x32xf32>
    %102 = arith.addf %101, %1 : vector<64x32xf32>
    %c0_47 = arith.constant 0 : index
    %c0_48 = arith.constant 0 : index
    %103 = vector.load %arg12[%c0_47, %c0_48] : memref<1x32xf32, #tpu.memory_space<vmem>>, vector<1x32xf32>
    %c0_49 = arith.constant 0 : index
    %c0_50 = arith.constant 0 : index
    %104 = vector.load %arg13[%c0_49, %c0_50] : memref<1x32xf32, #tpu.memory_space<vmem>>, vector<1x32xf32>
    %cst_51 = arith.constant dense<0.000000e+00> : vector<64xf32>
    %105 = vector.multi_reduction <add>, %102, %cst_51 [1] : vector<64x32xf32> to vector<64xf32>
    %106 = vector.shape_cast %105 : vector<64xf32> to vector<64x1xf32>
    %cst_52 = arith.constant 3.200000e+01 : f32
    %107 = vector.broadcast %cst_52 : f32 to vector<64x1xf32>
    %108 = arith.divf %106, %107 : vector<64x1xf32>
    %109 = vector.broadcast %108 : vector<64x1xf32> to vector<64x32xf32>
    %110 = arith.subf %102, %109 : vector<64x32xf32>
    %111 = arith.mulf %110, %110 : vector<64x32xf32>
    %cst_53 = arith.constant dense<0.000000e+00> : vector<64xf32>
    %112 = vector.multi_reduction <add>, %111, %cst_53 [1] : vector<64x32xf32> to vector<64xf32>
    %113 = vector.shape_cast %112 : vector<64xf32> to vector<64x1xf32>
    %cst_54 = arith.constant 3.200000e+01 : f32
    %114 = vector.broadcast %cst_54 : f32 to vector<64x1xf32>
    %115 = arith.divf %113, %114 : vector<64x1xf32>
    %116 = vector.broadcast %108 : vector<64x1xf32> to vector<64x32xf32>
    %117 = arith.subf %102, %116 : vector<64x32xf32>
    %cst_55 = arith.constant 9.99999996E-13 : f32
    %118 = vector.broadcast %cst_55 : f32 to vector<64x1xf32>
    %119 = arith.addf %115, %118 : vector<64x1xf32>
    %120 = math.rsqrt %119 : vector<64x1xf32>
    %121 = vector.broadcast %120 : vector<64x1xf32> to vector<64x32xf32>
    %122 = arith.mulf %117, %121 : vector<64x32xf32>
    %123 = vector.broadcast %103 : vector<1x32xf32> to vector<64x32xf32>
    %124 = arith.mulf %122, %123 : vector<64x32xf32>
    %125 = vector.broadcast %104 : vector<1x32xf32> to vector<64x32xf32>
    %126 = arith.addf %124, %125 : vector<64x32xf32>
    %cst_56 = arith.constant 0.699999988 : f32
    %127 = vector.broadcast %cst_56 : f32 to vector<64x32xf32>
    %128 = arith.mulf %127, %41 : vector<64x32xf32>
    %cst_57 = arith.constant 3.000000e-01 : f32
    %129 = vector.broadcast %cst_57 : f32 to vector<64x32xf32>
    %130 = arith.mulf %129, %126 : vector<64x32xf32>
    %131 = arith.addf %128, %130 : vector<64x32xf32>
    %132 = vector.shape_cast %131 : vector<64x32xf32> to vector<8x8x32xf32>
    %c0_58 = arith.constant 0 : index
    %c0_59 = arith.constant 0 : index
    %c0_60 = arith.constant 0 : index
    %133 = vector.load %arg14[%c0_58, %c0_59, %c0_60] : memref<8x8x32xf32, #tpu.memory_space<vmem>>, vector<8x8x32xf32>
    tpu.vector_store %arg14[%c0_58, %c0_59, %c0_60], %132 {strides = array<i32>} : memref<8x8x32xf32, #tpu.memory_space<vmem>>, vector<8x8x32xf32>,
    return
  }
  func.func @transform_0(%arg0: i32) -> (i32, i32, i32) {
    %c0_i32 = arith.constant 0 : i32
    %c0_i32_0 = arith.constant 0 : i32
    %c0_i32_1 = arith.constant 0 : i32
    return %arg0, %c0_i32, %c0_i32_0 : i32, i32, i32
  }
  func.func @transform_1(%arg0: i32) -> (i32, i32, i32) {
    %c0_i32 = arith.constant 0 : i32
    %c0_i32_0 = arith.constant 0 : i32
    %c0_i32_1 = arith.constant 0 : i32
    %c0_i32_2 = arith.constant 0 : i32
    return %c0_i32, %c0_i32_0, %c0_i32_1 : i32, i32, i32
  }
  func.func @transform_2(%arg0: i32) -> (i32, i32) {
    %c0_i32 = arith.constant 0 : i32
    %c0_i32_0 = arith.constant 0 : i32
    %c0_i32_1 = arith.constant 0 : i32
    return %c0_i32, %c0_i32_0 : i32, i32
  }
  func.func @transform_3(%arg0: i32) -> (i32, i32) {
    %c0_i32 = arith.constant 0 : i32
    %c0_i32_0 = arith.constant 0 : i32
    %c0_i32_1 = arith.constant 0 : i32
    return %c0_i32, %c0_i32_0 : i32, i32
  }
  func.func @transform_4(%arg0: i32) -> (i32, i32) {
    %c0_i32 = arith.constant 0 : i32
    %c0_i32_0 = arith.constant 0 : i32
    %c0_i32_1 = arith.constant 0 : i32
    return %c0_i32, %c0_i32_0 : i32, i32
  }
  func.func @transform_5(%arg0: i32) -> (i32, i32) {
    %c0_i32 = arith.constant 0 : i32
    %c0_i32_0 = arith.constant 0 : i32
    %c0_i32_1 = arith.constant 0 : i32
    return %c0_i32, %c0_i32_0 : i32, i32
  }
  func.func @transform_6(%arg0: i32) -> (i32, i32) {
    %c0_i32 = arith.constant 0 : i32
    %c0_i32_0 = arith.constant 0 : i32
    %c0_i32_1 = arith.constant 0 : i32
    return %c0_i32, %c0_i32_0 : i32, i32
  }
  func.func @transform_7(%arg0: i32) -> (i32, i32) {
    %c0_i32 = arith.constant 0 : i32
    %c0_i32_0 = arith.constant 0 : i32
    %c0_i32_1 = arith.constant 0 : i32
    return %c0_i32, %c0_i32_0 : i32, i32
  }
  func.func @transform_8(%arg0: i32) -> (i32, i32) {
    %c0_i32 = arith.constant 0 : i32
    %c0_i32_0 = arith.constant 0 : i32
    %c0_i32_1 = arith.constant 0 : i32
    return %c0_i32, %c0_i32_0 : i32, i32
  }
  func.func @transform_9(%arg0: i32) -> (i32, i32) {
    %c0_i32 = arith.constant 0 : i32
    %c0_i32_0 = arith.constant 0 : i32
    %c0_i32_1 = arith.constant 0 : i32
    return %c0_i32, %c0_i32_0 : i32, i32
  }
  func.func @transform_10(%arg0: i32) -> (i32, i32) {
    %c0_i32 = arith.constant 0 : i32
    %c0_i32_0 = arith.constant 0 : i32
    %c0_i32_1 = arith.constant 0 : i32
    return %c0_i32, %c0_i32_0 : i32, i32
  }
  func.func @transform_11(%arg0: i32) -> (i32, i32) {
    %c0_i32 = arith.constant 0 : i32
    %c0_i32_0 = arith.constant 0 : i32
    %c0_i32_1 = arith.constant 0 : i32
    return %c0_i32, %c0_i32_0 : i32, i32
  }
  func.func @transform_12(%arg0: i32) -> (i32, i32) {
    %c0_i32 = arith.constant 0 : i32
    %c0_i32_0 = arith.constant 0 : i32
    %c0_i32_1 = arith.constant 0 : i32
    return %c0_i32, %c0_i32_0 : i32, i32
  }
  func.func @transform_13(%arg0: i32) -> (i32, i32, i32) {
    %c0_i32 = arith.constant 0 : i32
    %c0_i32_0 = arith.constant 0 : i32
    %c0_i32_1 = arith.constant 0 : i32
    return %arg0, %c0_i32, %c0_i32_0 : i32, i32, i32
  }
}

module attributes {stable_mosaic.version = 11 : i64} {
  func.func @bsarec_kernel(%arg0: i32, %arg1: memref<8x8x32xf32, #tpu.memory_space<vmem>>, %arg2: memref<1x8x8xf32, #tpu.memory_space<vmem>>, %arg3: memref<8x8xbf16, #tpu.memory_space<vmem>>, %arg4: memref<1x32xf32, #tpu.memory_space<vmem>>, %arg5: memref<1x32xf32, #tpu.memory_space<vmem>>, %arg6: memref<1x32xf32, #tpu.memory_space<vmem>>, %arg7: memref<1x32xf32, #tpu.memory_space<vmem>>, %arg8: memref<32x768xbf16, #tpu.memory_space<vmem>>, %arg9: memref<1x768xf32, #tpu.memory_space<vmem>>, %arg10: memref<256x32xbf16, #tpu.memory_space<vmem>>, %arg11: memref<1x32xf32, #tpu.memory_space<vmem>>, %arg12: memref<1x32xf32, #tpu.memory_space<vmem>>, %arg13: memref<1x32xf32, #tpu.memory_space<vmem>>, %arg14: memref<8x8x32xf32, #tpu.memory_space<vmem>>, %arg15: memref<8x8x256xf32, #tpu.memory_space<vmem>>) attributes {dimension_semantics = [#tpu.dimension_semantics<parallel>], iteration_bounds = array<i64: 1>, scalar_prefetch = 0 : i64, scratch_operands = 1 : i64, tpu.core_type = #tpu.core_type<tc>, window_params = [{transform_indices = @transform_0, window_bounds = array<i64: 8, 8, 32>}, {pipeline_mode = #tpu.pipeline_mode<synchronous>, transform_indices = @transform_1, window_bounds = array<i64: 1, 8, 8>}, {pipeline_mode = #tpu.pipeline_mode<synchronous>, transform_indices = @transform_2, window_bounds = array<i64: 8, 8>}, {pipeline_mode = #tpu.pipeline_mode<synchronous>, transform_indices = @transform_3, window_bounds = array<i64: 1, 32>}, {pipeline_mode = #tpu.pipeline_mode<synchronous>, transform_indices = @transform_4, window_bounds = array<i64: 1, 32>}, {pipeline_mode = #tpu.pipeline_mode<synchronous>, transform_indices = @transform_5, window_bounds = array<i64: 1, 32>}, {pipeline_mode = #tpu.pipeline_mode<synchronous>, transform_indices = @transform_6, window_bounds = array<i64: 1, 32>}, {pipeline_mode = #tpu.pipeline_mode<synchronous>, transform_indices = @transform_7, window_bounds = array<i64: 32, 768>}, {pipeline_mode = #tpu.pipeline_mode<synchronous>, transform_indices = @transform_8, window_bounds = array<i64: 1, 768>}, {pipeline_mode = #tpu.pipeline_mode<synchronous>, transform_indices = @transform_9, window_bounds = array<i64: 256, 32>}, {pipeline_mode = #tpu.pipeline_mode<synchronous>, transform_indices = @transform_10, window_bounds = array<i64: 1, 32>}, {pipeline_mode = #tpu.pipeline_mode<synchronous>, transform_indices = @transform_11, window_bounds = array<i64: 1, 32>}, {pipeline_mode = #tpu.pipeline_mode<synchronous>, transform_indices = @transform_12, window_bounds = array<i64: 1, 32>}, {transform_indices = @transform_13, window_bounds = array<i64: 8, 8, 32>}]} {
    %c0 = arith.constant 0 : index
    %c0_0 = arith.constant 0 : index
    %c0_1 = arith.constant 0 : index
    %0 = vector.load %arg1[%c0, %c0_0, %c0_1] : memref<8x8x32xf32, #tpu.memory_space<vmem>>, vector<8x8x32xf32>
    %1 = vector.shape_cast %0 : vector<8x8x32xf32> to vector<64x32xf32>
    %2 = arith.truncf %0 : vector<8x8x32xf32> to vector<8x8x32xbf16>
    %c0_2 = arith.constant 0 : index
    %c0_3 = arith.constant 0 : index
    %3 = vector.load %arg3[%c0_2, %c0_3] : memref<8x8xbf16, #tpu.memory_space<vmem>>, vector<8x8xbf16>
    %4 = vector.shape_cast %3 : vector<8x8xbf16> to vector<1x8x8xbf16>
    %5 = vector.shape_cast %4 : vector<1x8x8xbf16> to vector<1x8x8xbf16>
    %6 = vector.broadcast %5 : vector<1x8x8xbf16> to vector<8x8x8xbf16>
    "tpu.trace_start"() <{level = 10 : i32, message = "bsr,bsh->brh"}> : () -> ()
    %cst = arith.constant dense<0.000000e+00> : vector<8x8x32xf32>
    %7 = tpu.matmul %6, %2, %cst {dimension_numbers = #tpu.dot_dimension_numbers<[1], [1], [2], [2], [0, 0, 0, 2, 1, 2], [0], [0]>} : vector<8x8x8xbf16>, vector<8x8x32xbf16>, vector<8x8x32xf32> -> vector<8x8x32xf32>
    "tpu.trace_stop"() : () -> ()
    %8 = arith.truncf %7 : vector<8x8x32xf32> to vector<8x8x32xbf16>
    "tpu.trace_start"() <{level = 10 : i32, message = "bsr,brh->bsh"}> : () -> ()
    %cst_4 = arith.constant dense<0.000000e+00> : vector<8x8x32xf32>
    %9 = tpu.matmul %6, %8, %cst_4 {dimension_numbers = #tpu.dot_dimension_numbers<[2], [1], [1], [2], [0, 0, 0, 1, 1, 2], [0], [0]>} : vector<8x8x8xbf16>, vector<8x8x32xbf16>, vector<8x8x32xf32> -> vector<8x8x32xf32>
    "tpu.trace_stop"() : () -> ()
    %10 = vector.shape_cast %9 : vector<8x8x32xf32> to vector<64x32xf32>
    %c0_5 = arith.constant 0 : index
    %c0_6 = arith.constant 0 : index
    %11 = vector.load %arg4[%c0_5, %c0_6] : memref<1x32xf32, #tpu.memory_space<vmem>>, vector<1x32xf32>
    %12 = vector.broadcast %11 : vector<1x32xf32> to vector<64x32xf32>
    %13 = arith.mulf %12, %10 : vector<64x32xf32>
    %c0_7 = arith.constant 0 : index
    %c0_8 = arith.constant 0 : index
    %14 = vector.load %arg5[%c0_7, %c0_8] : memref<1x32xf32, #tpu.memory_space<vmem>>, vector<1x32xf32>
    %15 = vector.broadcast %14 : vector<1x32xf32> to vector<64x32xf32>
    %16 = arith.mulf %15, %1 : vector<64x32xf32>
    %17 = arith.addf %13, %16 : vector<64x32xf32>
    %c0_9 = arith.constant 0 : index
    %c0_10 = arith.constant 0 : index
    %18 = vector.load %arg6[%c0_9, %c0_10] : memref<1x32xf32, #tpu.memory_space<vmem>>, vector<1x32xf32>
    %c0_11 = arith.constant 0 : index
    %c0_12 = arith.constant 0 : index
    %19 = vector.load %arg7[%c0_11, %c0_12] : memref<1x32xf32, #tpu.memory_space<vmem>>, vector<1x32xf32>
    %cst_13 = arith.constant dense<0.000000e+00> : vector<64xf32>
    %20 = vector.multi_reduction <add>, %17, %cst_13 [1] : vector<64x32xf32> to vector<64xf32>
    %21 = vector.shape_cast %20 : vector<64xf32> to vector<64x1xf32>
    %cst_14 = arith.constant 3.200000e+01 : f32
    %22 = vector.broadcast %cst_14 : f32 to vector<64x1xf32>
    %23 = arith.divf %21, %22 : vector<64x1xf32>
    %24 = vector.broadcast %23 : vector<64x1xf32> to vector<64x32xf32>
    %25 = arith.subf %17, %24 : vector<64x32xf32>
    %26 = arith.mulf %25, %25 : vector<64x32xf32>
    %cst_15 = arith.constant dense<0.000000e+00> : vector<64xf32>
    %27 = vector.multi_reduction <add>, %26, %cst_15 [1] : vector<64x32xf32> to vector<64xf32>
    %28 = vector.shape_cast %27 : vector<64xf32> to vector<64x1xf32>
    %cst_16 = arith.constant 3.200000e+01 : f32
    %29 = vector.broadcast %cst_16 : f32 to vector<64x1xf32>
    %30 = arith.divf %28, %29 : vector<64x1xf32>
    %31 = vector.broadcast %23 : vector<64x1xf32> to vector<64x32xf32>
    %32 = arith.subf %17, %31 : vector<64x32xf32>
    %cst_17 = arith.constant 9.99999996E-13 : f32
    %33 = vector.broadcast %cst_17 : f32 to vector<64x1xf32>
    %34 = arith.addf %30, %33 : vector<64x1xf32>
    %35 = math.rsqrt %34 : vector<64x1xf32>
    %36 = vector.broadcast %35 : vector<64x1xf32> to vector<64x32xf32>
    %37 = arith.mulf %32, %36 : vector<64x32xf32>
    %38 = vector.broadcast %18 : vector<1x32xf32> to vector<64x32xf32>
    %39 = arith.mulf %37, %38 : vector<64x32xf32>
    %40 = vector.broadcast %19 : vector<1x32xf32> to vector<64x32xf32>
    %41 = arith.addf %39, %40 : vector<64x32xf32>
    %42 = arith.truncf %1 : vector<64x32xf32> to vector<64x32xbf16>
    %c0_18 = arith.constant 0 : index
    %c0_19 = arith.constant 0 : index
    %43 = vector.load %arg8[%c0_18, %c0_19] : memref<32x768xbf16, #tpu.memory_space<vmem>>, vector<32x768xbf16>
    %cst_20 = arith.constant dense<0.000000e+00> : vector<64x768xf32>
    %44 = tpu.matmul %42, %43, %cst_20 {dimension_numbers = #tpu.dot_dimension_numbers<[1], [0], [0], [1], [0, 0, 1, 1], [], []>} : vector<64x32xbf16>, vector<32x768xbf16>, vector<64x768xf32> -> vector<64x768xf32>
    %c0_21 = arith.constant 0 : index
    %c0_22 = arith.constant 0 : index
    %45 = vector.load %arg9[%c0_21, %c0_22] : memref<1x768xf32, #tpu.memory_space<vmem>>, vector<1x768xf32>
    %46 = vector.broadcast %45 : vector<1x768xf32> to vector<64x768xf32>
    %47 = arith.addf %44, %46 : vector<64x768xf32>
    %48 = vector.shape_cast %47 : vector<64x768xf32> to vector<8x8x768xf32>
    %c0_23 = arith.constant 0 : index
    %c0_24 = arith.constant 0 : index
    %c0_25 = arith.constant 0 : index
    %49 = vector.load %arg2[%c0_23, %c0_24, %c0_25] : memref<1x8x8xf32, #tpu.memory_space<vmem>>, vector<1x8x8xf32>
    %50 = vector.extract_strided_slice %48 {offsets = [0, 0, 0], sizes = [8, 8, 128], strides = [1, 1, 1]} : vector<8x8x768xf32> to vector<8x8x128xf32>
    %51 = arith.truncf %50 : vector<8x8x128xf32> to vector<8x8x128xbf16>
    %52 = vector.extract_strided_slice %48 {offsets = [0, 0, 256], sizes = [8, 8, 128], strides = [1, 1, 1]} : vector<8x8x768xf32> to vector<8x8x128xf32>
    %53 = arith.truncf %52 : vector<8x8x128xf32> to vector<8x8x128xbf16>
    %54 = vector.extract_strided_slice %48 {offsets = [0, 0, 512], sizes = [8, 8, 128], strides = [1, 1, 1]} : vector<8x8x768xf32> to vector<8x8x128xf32>
    %55 = arith.truncf %54 : vector<8x8x128xf32> to vector<8x8x128xbf16>
    "tpu.trace_start"() <{level = 10 : i32, message = "bqd,bkd->bqk"}> : () -> ()
    %cst_26 = arith.constant dense<0.000000e+00> : vector<8x8x8xf32>
    %56 = tpu.matmul %51, %53, %cst_26 {dimension_numbers = #tpu.dot_dimension_numbers<[2], [2], [1], [1], [0, 0, 0, 1, 1, 1], [0], [0]>} : vector<8x8x128xbf16>, vector<8x8x128xbf16>, vector<8x8x8xf32> -> vector<8x8x8xf32>
    "tpu.trace_stop"() : () -> ()
    %57 = vector.broadcast %49 : vector<1x8x8xf32> to vector<8x8x8xf32>
    %58 = arith.addf %56, %57 : vector<8x8x8xf32>
    %cst_27 = arith.constant dense<0xFF800000> : vector<8x8xf32>
    %59 = vector.multi_reduction <maximumf>, %58, %cst_27 [2] : vector<8x8x8xf32> to vector<8x8xf32>
    %60 = vector.shape_cast %59 : vector<8x8xf32> to vector<8x8x1xf32>
    %61 = vector.broadcast %60 : vector<8x8x1xf32> to vector<8x8x8xf32>
    %62 = arith.subf %58, %61 : vector<8x8x8xf32>
    %63 = math.exp %62 : vector<8x8x8xf32>
    %cst_28 = arith.constant dense<0.000000e+00> : vector<8x8xf32>
    %64 = vector.multi_reduction <add>, %63, %cst_28 [2] : vector<8x8x8xf32> to vector<8x8xf32>
    %65 = vector.shape_cast %64 : vector<8x8xf32> to vector<8x8x1xf32>
    %66 = tpu.reciprocal %65 {approx = true} : vector<8x8x1xf32> -> vector<8x8x1xf32>
    %67 = vector.broadcast %66 : vector<8x8x1xf32> to vector<8x8x8xf32>
    %68 = arith.mulf %63, %67 : vector<8x8x8xf32>
    %69 = arith.truncf %68 : vector<8x8x8xf32> to vector<8x8x8xbf16>
    "tpu.trace_start"() <{level = 10 : i32, message = "bqk,bkd->bqd"}> : () -> ()
    %cst_29 = arith.constant dense<0.000000e+00> : vector<8x8x128xf32>
    %70 = tpu.matmul %69, %55, %cst_29 {dimension_numbers = #tpu.dot_dimension_numbers<[2], [1], [1], [2], [0, 0, 0, 1, 1, 2], [0], [0]>} : vector<8x8x8xbf16>, vector<8x8x128xbf16>, vector<8x8x128xf32> -> vector<8x8x128xf32>
    "tpu.trace_stop"() : () -> ()
    %c0_30 = arith.constant 0 : index
    %c0_31 = arith.constant 0 : index
    %c0_32 = arith.constant 0 : index
    %71 = vector.load %arg15[%c0_30, %c0_31, %c0_32] : memref<8x8x256xf32, #tpu.memory_space<vmem>>, vector<8x8x128xf32>
    tpu.vector_store %arg15[%c0_30, %c0_31, %c0_32], %70 {strides = array<i32>} : memref<8x8x256xf32, #tpu.memory_space<vmem>>, vector<8x8x128xf32>,
    %72 = vector.extract_strided_slice %48 {offsets = [0, 0, 128], sizes = [8, 8, 128], strides = [1, 1, 1]} : vector<8x8x768xf32> to vector<8x8x128xf32>
    %73 = arith.truncf %72 : vector<8x8x128xf32> to vector<8x8x128xbf16>
    %74 = vector.extract_strided_slice %48 {offsets = [0, 0, 384], sizes = [8, 8, 128], strides = [1, 1, 1]} : vector<8x8x768xf32> to vector<8x8x128xf32>
    %75 = arith.truncf %74 : vector<8x8x128xf32> to vector<8x8x128xbf16>
    %76 = vector.extract_strided_slice %48 {offsets = [0, 0, 640], sizes = [8, 8, 128], strides = [1, 1, 1]} : vector<8x8x768xf32> to vector<8x8x128xf32>
    %77 = arith.truncf %76 : vector<8x8x128xf32> to vector<8x8x128xbf16>
    "tpu.trace_start"() <{level = 10 : i32, message = "bqd,bkd->bqk"}> : () -> ()
    %cst_33 = arith.constant dense<0.000000e+00> : vector<8x8x8xf32>
    %78 = tpu.matmul %73, %75, %cst_33 {dimension_numbers = #tpu.dot_dimension_numbers<[2], [2], [1], [1], [0, 0, 0, 1, 1, 1], [0], [0]>} : vector<8x8x128xbf16>, vector<8x8x128xbf16>, vector<8x8x8xf32> -> vector<8x8x8xf32>
    "tpu.trace_stop"() : () -> ()
    %79 = vector.broadcast %49 : vector<1x8x8xf32> to vector<8x8x8xf32>
    %80 = arith.addf %78, %79 : vector<8x8x8xf32>
    %cst_34 = arith.constant dense<0xFF800000> : vector<8x8xf32>
    %81 = vector.multi_reduction <maximumf>, %80, %cst_34 [2] : vector<8x8x8xf32> to vector<8x8xf32>
    %82 = vector.shape_cast %81 : vector<8x8xf32> to vector<8x8x1xf32>
    %83 = vector.broadcast %82 : vector<8x8x1xf32> to vector<8x8x8xf32>
    %84 = arith.subf %80, %83 : vector<8x8x8xf32>
    %85 = math.exp %84 : vector<8x8x8xf32>
    %cst_35 = arith.constant dense<0.000000e+00> : vector<8x8xf32>
    %86 = vector.multi_reduction <add>, %85, %cst_35 [2] : vector<8x8x8xf32> to vector<8x8xf32>
    %87 = vector.shape_cast %86 : vector<8x8xf32> to vector<8x8x1xf32>
    %88 = tpu.reciprocal %87 {approx = true} : vector<8x8x1xf32> -> vector<8x8x1xf32>
    %89 = vector.broadcast %88 : vector<8x8x1xf32> to vector<8x8x8xf32>
    %90 = arith.mulf %85, %89 : vector<8x8x8xf32>
    %91 = arith.truncf %90 : vector<8x8x8xf32> to vector<8x8x8xbf16>
    "tpu.trace_start"() <{level = 10 : i32, message = "bqk,bkd->bqd"}> : () -> ()
    %cst_36 = arith.constant dense<0.000000e+00> : vector<8x8x128xf32>
    %92 = tpu.matmul %91, %77, %cst_36 {dimension_numbers = #tpu.dot_dimension_numbers<[2], [1], [1], [2], [0, 0, 0, 1, 1, 2], [0], [0]>} : vector<8x8x8xbf16>, vector<8x8x128xbf16>, vector<8x8x128xf32> -> vector<8x8x128xf32>
    "tpu.trace_stop"() : () -> ()
    %c0_37 = arith.constant 0 : index
    %c0_38 = arith.constant 0 : index
    %c128 = arith.constant 128 : index
    %93 = vector.load %arg15[%c0_37, %c0_38, %c128] : memref<8x8x256xf32, #tpu.memory_space<vmem>>, vector<8x8x128xf32>
    tpu.vector_store %arg15[%c0_37, %c0_38, %c128], %92 {strides = array<i32>} : memref<8x8x256xf32, #tpu.memory_space<vmem>>, vector<8x8x128xf32>,
    %c0_39 = arith.constant 0 : index
    %c0_40 = arith.constant 0 : index
    %c0_41 = arith.constant 0 : index
    %94 = vector.load %arg15[%c0_39, %c0_40, %c0_41] : memref<8x8x256xf32, #tpu.memory_space<vmem>>, vector<8x8x256xf32>
    %95 = vector.shape_cast %94 : vector<8x8x256xf32> to vector<64x256xf32>
    %96 = arith.truncf %95 : vector<64x256xf32> to vector<64x256xbf16>
    %c0_42 = arith.constant 0 : index
    %c0_43 = arith.constant 0 : index
    %97 = vector.load %arg10[%c0_42, %c0_43] : memref<256x32xbf16, #tpu.memory_space<vmem>>, vector<256x32xbf16>
    %cst_44 = arith.constant dense<0.000000e+00> : vector<64x32xf32>
    %98 = tpu.matmul %96, %97, %cst_44 {dimension_numbers = #tpu.dot_dimension_numbers<[1], [0], [0], [1], [0, 0, 1, 1], [], []>} : vector<64x256xbf16>, vector<256x32xbf16>, vector<64x32xf32> -> vector<64x32xf32>
    %c0_45 = arith.constant 0 : index
    %c0_46 = arith.constant 0 : index
    %99 = vector.load %arg11[%c0_45, %c0_46] : memref<1x32xf32, #tpu.memory_space<vmem>>, vector<1x32xf32>
    %100 = vector.broadcast %99 : vector<1x32xf32> to vector<64x32xf32>
    %101 = arith.addf %98, %100 : vector<64x32xf32>
    %102 = arith.addf %101, %1 : vector<64x32xf32>
    %c0_47 = arith.constant 0 : index
    %c0_48 = arith.constant 0 : index
    %103 = vector.load %arg12[%c0_47, %c0_48] : memref<1x32xf32, #tpu.memory_space<vmem>>, vector<1x32xf32>
    %c0_49 = arith.constant 0 : index
    %c0_50 = arith.constant 0 : index
    %104 = vector.load %arg13[%c0_49, %c0_50] : memref<1x32xf32, #tpu.memory_space<vmem>>, vector<1x32xf32>
    %cst_51 = arith.constant dense<0.000000e+00> : vector<64xf32>
    %105 = vector.multi_reduction <add>, %102, %cst_51 [1] : vector<64x32xf32> to vector<64xf32>
    %106 = vector.shape_cast %105 : vector<64xf32> to vector<64x1xf32>
    %cst_52 = arith.constant 3.200000e+01 : f32
    %107 = vector.broadcast %cst_52 : f32 to vector<64x1xf32>
    %108 = arith.divf %106, %107 : vector<64x1xf32>
    %109 = vector.broadcast %108 : vector<64x1xf32> to vector<64x32xf32>
    %110 = arith.subf %102, %109 : vector<64x32xf32>
    %111 = arith.mulf %110, %110 : vector<64x32xf32>
    %cst_53 = arith.constant dense<0.000000e+00> : vector<64xf32>
    %112 = vector.multi_reduction <add>, %111, %cst_53 [1] : vector<64x32xf32> to vector<64xf32>
    %113 = vector.shape_cast %112 : vector<64xf32> to vector<64x1xf32>
    %cst_54 = arith.constant 3.200000e+01 : f32
    %114 = vector.broadcast %cst_54 : f32 to vector<64x1xf32>
    %115 = arith.divf %113, %114 : vector<64x1xf32>
    %116 = vector.broadcast %108 : vector<64x1xf32> to vector<64x32xf32>
    %117 = arith.subf %102, %116 : vector<64x32xf32>
    %cst_55 = arith.constant 9.99999996E-13 : f32
    %118 = vector.broadcast %cst_55 : f32 to vector<64x1xf32>
    %119 = arith.addf %115, %118 : vector<64x1xf32>
    %120 = math.rsqrt %119 : vector<64x1xf32>
    %121 = vector.broadcast %120 : vector<64x1xf32> to vector<64x32xf32>
    %122 = arith.mulf %117, %121 : vector<64x32xf32>
    %123 = vector.broadcast %103 : vector<1x32xf32> to vector<64x32xf32>
    %124 = arith.mulf %122, %123 : vector<64x32xf32>
    %125 = vector.broadcast %104 : vector<1x32xf32> to vector<64x32xf32>
    %126 = arith.addf %124, %125 : vector<64x32xf32>
    %cst_56 = arith.constant 0.699999988 : f32
    %127 = vector.broadcast %cst_56 : f32 to vector<64x32xf32>
    %128 = arith.mulf %127, %41 : vector<64x32xf32>
    %cst_57 = arith.constant 3.000000e-01 : f32
    %129 = vector.broadcast %cst_57 : f32 to vector<64x32xf32>
    %130 = arith.mulf %129, %126 : vector<64x32xf32>
    %131 = arith.addf %128, %130 : vector<64x32xf32>
    %132 = vector.shape_cast %131 : vector<64x32xf32> to vector<8x8x32xf32>
    %c0_58 = arith.constant 0 : index
    %c0_59 = arith.constant 0 : index
    %c0_60 = arith.constant 0 : index
    %133 = vector.load %arg14[%c0_58, %c0_59, %c0_60] : memref<8x8x32xf32, #tpu.memory_space<vmem>>, vector<8x8x32xf32>
    tpu.vector_store %arg14[%c0_58, %c0_59, %c0_60], %132 {strides = array<i32>} : memref<8x8x32xf32, #tpu.memory_space<vmem>>, vector<8x8x32xf32>,
    return
  }
  func.func @transform_0(%arg0: i32) -> (i32, i32, i32) {
    %c0_i32 = arith.constant 0 : i32
    %c0_i32_0 = arith.constant 0 : i32
    %c0_i32_1 = arith.constant 0 : i32
    return %arg0, %c0_i32, %c0_i32_0 : i32, i32, i32
  }
  func.func @transform_1(%arg0: i32) -> (i32, i32, i32) {
    %c0_i32 = arith.constant 0 : i32
    %c0_i32_0 = arith.constant 0 : i32
    %c0_i32_1 = arith.constant 0 : i32
    %c0_i32_2 = arith.constant 0 : i32
    return %c0_i32, %c0_i32_0, %c0_i32_1 : i32, i32, i32
  }
  func.func @transform_2(%arg0: i32) -> (i32, i32) {
    %c0_i32 = arith.constant 0 : i32
    %c0_i32_0 = arith.constant 0 : i32
    %c0_i32_1 = arith.constant 0 : i32
    return %c0_i32, %c0_i32_0 : i32, i32
  }
  func.func @transform_3(%arg0: i32) -> (i32, i32) {
    %c0_i32 = arith.constant 0 : i32
    %c0_i32_0 = arith.constant 0 : i32
    %c0_i32_1 = arith.constant 0 : i32
    return %c0_i32, %c0_i32_0 : i32, i32
  }
  func.func @transform_4(%arg0: i32) -> (i32, i32) {
    %c0_i32 = arith.constant 0 : i32
    %c0_i32_0 = arith.constant 0 : i32
    %c0_i32_1 = arith.constant 0 : i32
    return %c0_i32, %c0_i32_0 : i32, i32
  }
  func.func @transform_5(%arg0: i32) -> (i32, i32) {
    %c0_i32 = arith.constant 0 : i32
    %c0_i32_0 = arith.constant 0 : i32
    %c0_i32_1 = arith.constant 0 : i32
    return %c0_i32, %c0_i32_0 : i32, i32
  }
  func.func @transform_6(%arg0: i32) -> (i32, i32) {
    %c0_i32 = arith.constant 0 : i32
    %c0_i32_0 = arith.constant 0 : i32
    %c0_i32_1 = arith.constant 0 : i32
    return %c0_i32, %c0_i32_0 : i32, i32
  }
  func.func @transform_7(%arg0: i32) -> (i32, i32) {
    %c0_i32 = arith.constant 0 : i32
    %c0_i32_0 = arith.constant 0 : i32
    %c0_i32_1 = arith.constant 0 : i32
    return %c0_i32, %c0_i32_0 : i32, i32
  }
  func.func @transform_8(%arg0: i32) -> (i32, i32) {
    %c0_i32 = arith.constant 0 : i32
    %c0_i32_0 = arith.constant 0 : i32
    %c0_i32_1 = arith.constant 0 : i32
    return %c0_i32, %c0_i32_0 : i32, i32
  }
  func.func @transform_9(%arg0: i32) -> (i32, i32) {
    %c0_i32 = arith.constant 0 : i32
    %c0_i32_0 = arith.constant 0 : i32
    %c0_i32_1 = arith.constant 0 : i32
    return %c0_i32, %c0_i32_0 : i32, i32
  }
  func.func @transform_10(%arg0: i32) -> (i32, i32) {
    %c0_i32 = arith.constant 0 : i32
    %c0_i32_0 = arith.constant 0 : i32
    %c0_i32_1 = arith.constant 0 : i32
    return %c0_i32, %c0_i32_0 : i32, i32
  }
  func.func @transform_11(%arg0: i32) -> (i32, i32) {
    %c0_i32 = arith.constant 0 : i32
    %c0_i32_0 = arith.constant 0 : i32
    %c0_i32_1 = arith.constant 0 : i32
    return %c0_i32, %c0_i32_0 : i32, i32
  }
  func.func @transform_12(%arg0: i32) -> (i32, i32) {
    %c0_i32 = arith.constant 0 : i32
    %c0_i32_0 = arith.constant 0 : i32
    %c0_i32_1 = arith.constant 0 : i32
    return %c0_i32, %c0_i32_0 : i32, i32
  }
  func.func @transform_13(%arg0: i32) -> (i32, i32, i32) {
    %c0_i32 = arith.constant 0 : i32
    %c0_i32_0 = arith.constant 0 : i32
    %c0_i32_1 = arith.constant 0 : i32
    return %arg0, %c0_i32, %c0_i32_0 : i32, i32, i32
  }
}

</mosaic_0001>

<bundles_post_ra>
// kernel: tpu_custom_call.1
= control target key start
LH: loop header
LB: loop body
LE: loop exit
PB: predicated region body
PF: predicated region fallthrough
CT: control target
= control target key end

     0   :  { %18 = vsyncpa [#allocation4], 0  ;;  %s5358_s0 = inlined_call_operand.vmem [shape: f32[8,8,32], index: 0, kind: input, shape index: {}]   ;;  %s5359_s1 = inlined_call_operand.hbm [shape: f32[1,8,8], index: 1, kind: input, shape index: {}]   ;;  %s5360_s2 = inlined_call_operand.hbm [shape: bf16[8,8], index: 2, kind: input, shape index: {}]   ;;  %s5361_s3 = inlined_call_operand.vmem [shape: f32[1,32], index: 3, kind: input, shape index: {}]   ;;  %s5362_s4 = inlined_call_operand.vmem [shape: f32[1,32], index: 4, kind: input, shape index: {}]   ;;  %s5363_s5 = inlined_call_operand.hbm [shape: f32[1,32], index: 5, kind: input, shape index: {}]   ;;  %s5364_s6 = inlined_call_operand.hbm [shape: f32[1,32], index: 6, kind: input, shape index: {}]   ;;  %s5365_s7 = inlined_call_operand.vmem [shape: bf16[32,768], index: 7, kind: input, shape index: {}]   ;;  %s5366_s8 = inlined_call_operand.hbm [shape: f32[1,768], index: 8, kind: input, shape index: {}]   ;;  %s5367_s9 = inlined_call_operand.vmem [shape: bf16[256,32], index: 9, kind: input, shape index: {}]   ;;  %s5368_s10 = inlined_call_operand.vmem [shape: f32[1,32], index: 10, kind: input, shape index: {}]   ;;  %s5369_s11 = inlined_call_operand.vmem [shape: f32[1,32], index: 11, kind: input, shape index: {}]   ;;  %s5370_s12 = inlined_call_operand.vmem [shape: f32[1,32], index: 12, kind: input, shape index: {}]   ;;  %s5371_s13 = inlined_call_operand.hbm [shape: f32[8,8,32], index: 13, kind: output, shape index: {}]  }
   0x1   :  { %19 = vsyncpa [#allocation7], 0 }
   0x2   :  { %20 = vsyncpa [#allocation10], 0 }
   0x3   :  { %21 = vsyncpa [#allocation5], 0  ;;  %s4196_s25 = smov [#allocation6]   ;;  %s4197_s27 = smov [#allocation9]  }
   0x4   :  { %s40_s26 = sshll.u32 %s4196_s25, 4  ;;  %s64_s28 = sshll.u32 %s4197_s27, 4  ;;  %s41_s26 = int_to_ptr.vmem [resolvable:$true] %s40_s26  ;;  %s65_s28 = int_to_ptr.vmem [resolvable:$true] %s64_s28 }
   0x5   :  { %s4056_s14 = scalar_lea.hbm %s5360_s2, 64 }
   0x6   :  { %p4057_p0 = scmp.ne.s32.totalorder %s5360_s2, %s4056_s14  ;;  %p4060_p1 = scmp.lt.u32.totalorder %s4056_s14, %s5360_s2 }
   0x8   :  { %p4062_p2 = pnand %p4060_p1, %p4057_p0 }
   0xa   :  { %4065 = shalt.err (!%p4062_p2)
}
   0xb   :  { %s4066_s19 = scalar_lea.vmem %s41_s26, 64  ;;  %p4071_p4 = scmp.lt.s32.totalorder %s41_s26, %s41_s26 }
   0xc   :  { %p4067_p3 = scmp.ne.s32.totalorder %s41_s26, %s4066_s19  ;;  %p4072_p5 = scmp.lt.s32.totalorder %s4066_s19, %s4066_s19 }
   0xe   :  { %p4073_p6 = por %p4072_p5, %p4071_p4 }
  0x10   :  { %p4074_p7 = pnand %p4073_p6, %p4067_p3 }
  0x12   :  { %4077 = shalt.err (!%p4074_p7)
}
  0x13   :  { %43 = dma.hbm_to_vmem [thread:$0]  %s5360_s2, 64, %s41_s26, [#allocation7]  }
  0x14   :  { %s4078_s24 = scalar_lea.hbm %s5364_s6, 16 }
  0x15   :  { %p4079_p8 = scmp.ne.s32.totalorder %s5364_s6, %s4078_s24  ;;  %p4082_p9 = scmp.lt.u32.totalorder %s4078_s24, %s5364_s6 }
  0x17   :  { %p4084_p10 = pnand %p4082_p9, %p4079_p8 }
  0x19   :  { %4087 = shalt.err (!%p4084_p10)
}
  0x1a   :  { %s4088_s14 = scalar_lea.vmem %s65_s28, 16  ;;  %s4092_s15 = scalar_lea.vmem %s65_s28, 32 }
  0x1b   :  { %p4089_p11 = scmp.ne.s32.totalorder %s65_s28, %s4088_s14  ;;  %p4093_p12 = scmp.lt.s32.totalorder %s65_s28, %s65_s28 }
  0x1c   :  { %p4094_p13 = scmp.lt.s32.totalorder %s4092_s15, %s4088_s14 }
  0x1e   :  { %p4095_p0 = por %p4094_p13, %p4093_p12 }
  0x20   :  { %p4096_p1 = pnand %p4095_p0, %p4089_p11 }
  0x22   :  { %4099 = shalt.err (!%p4096_p1)
}
  0x23   :  { %67 = dma.hbm_to_vmem [thread:$0]  %s5364_s6, 16, %s65_s28, [#allocation10]  }
  0x24   :  { %s4198_s16 = smov [#allocation3]   ;;  %s4199_s18 = smov [#allocation8]  }
  0x25   :  { %s30_s17 = sshll.u32 %s4198_s16, 4  ;;  %s54_s19 = sshll.u32 %s4199_s18, 4  ;;  %s31_s17 = int_to_ptr.vmem [resolvable:$true] %s30_s17  ;;  %s55_s19 = int_to_ptr.vmem [resolvable:$true] %s54_s19 }
  0x26   :  { %s4100_s22 = scalar_lea.hbm %s5359_s1, 128 }
  0x27   :  { %p4101_p2 = scmp.ne.s32.totalorder %s5359_s1, %s4100_s22  ;;  %p4104_p3 = scmp.lt.u32.totalorder %s4100_s22, %s5359_s1 }
  0x29   :  { %p4106_p4 = pnand %p4104_p3, %p4101_p2 }
  0x2b   :  { %4109 = shalt.err (!%p4106_p4)
}
  0x2c   :  { %s4110_s6 = scalar_lea.vmem %s31_s17, 128  ;;  %p4115_p6 = scmp.lt.s32.totalorder %s31_s17, %s31_s17 }
  0x2d   :  { %p4111_p5 = scmp.ne.s32.totalorder %s31_s17, %s4110_s6  ;;  %p4116_p7 = scmp.lt.s32.totalorder %s4110_s6, %s4110_s6 }
  0x2f   :  { %p4117_p8 = por %p4116_p7, %p4115_p6 }
  0x31   :  { %p4118_p9 = pnand %p4117_p8, %p4111_p5 }
  0x33   :  { %4121 = shalt.err (!%p4118_p9)
}
  0x34   :  { %33 = dma.hbm_to_vmem [thread:$0]  %s5359_s1, 128, %s31_s17, [#allocation4]  }
  0x35   :  { %s4122_s15 = scalar_lea.hbm %s5363_s5, 16 }
  0x36   :  { %p4123_p10 = scmp.ne.s32.totalorder %s5363_s5, %s4122_s15  ;;  %p4126_p11 = scmp.lt.u32.totalorder %s4122_s15, %s5363_s5 }
  0x38   :  { %p4128_p12 = pnand %p4126_p11, %p4123_p10 }
  0x3a   :  { %4131 = shalt.err (!%p4128_p12)
}
  0x3b   :  { %s4132_s20 = scalar_lea.vmem %s55_s19, 16  ;;  %s4136_s21 = scalar_lea.vmem %s55_s19, 32 }
  0x3c   :  { %p4133_p13 = scmp.ne.s32.totalorder %s55_s19, %s4132_s20  ;;  %p4137_p0 = scmp.lt.s32.totalorder %s55_s19, %s55_s19 }
  0x3d   :  { %p4138_p1 = scmp.lt.s32.totalorder %s4136_s21, %s4132_s20 }
  0x3f   :  { %p4139_p2 = por %p4138_p1, %p4137_p0 }
  0x41   :  { %p4140_p3 = pnand %p4139_p2, %p4133_p13 }
  0x43   :  { %4143 = shalt.err (!%p4140_p3)
}
  0x44   :  { %57 = dma.hbm_to_vmem [thread:$0]  %s5363_s5, 16, %s55_s19, [#allocation7]  }
  0x45   :  { %s4200_s22 = smov [#allocation11]   ;;  %s4144_s27 = scalar_lea.hbm %s5366_s8, 96 }
  0x46   :  { %s76_s23 = sshll.u32 %s4200_s22, 4  ;;  %p4145_p4 = scmp.ne.s32.totalorder %s5366_s8, %s4144_s27  ;;  %s77_s23 = int_to_ptr.vmem [resolvable:$true] %s76_s23 }
  0x47   :  { %p4148_p5 = scmp.lt.u32.totalorder %s4144_s27, %s5366_s8 }
  0x49   :  { %p4150_p6 = pnand %p4148_p5, %p4145_p4 }
  0x4b   :  { %4153 = shalt.err (!%p4150_p6)
}
  0x4c   :  { %s4154_s14 = scalar_lea.vmem %s77_s23, 96  ;;  %p4159_p8 = scmp.lt.s32.totalorder %s77_s23, %s77_s23 }
  0x4d   :  { %p4155_p7 = scmp.ne.s32.totalorder %s77_s23, %s4154_s14  ;;  %p4160_p9 = scmp.lt.s32.totalorder %s4154_s14, %s4154_s14 }
  0x4f   :  { %p4161_p10 = por %p4160_p9, %p4159_p8 }
  0x51   :  { %p4162_p11 = pnand %p4161_p10, %p4155_p7 }
  0x53   :  { %4165 = shalt.err (!%p4162_p11)
}
  0x54   :  { %79 = dma.hbm_to_vmem [thread:$0]  %s5366_s8, 96, %s77_s23, [#allocation10]  }
  0x55   :  { %4188 = dma.done.wait [#allocation4], 128  }
  0x56   :  { %4189 = vsyncadd [#allocation4], 4294967168 }
  0x57   :  { %4190 = dma.done.wait [#allocation7], 80  }
  0x58   :  { %4191 = vsyncadd [#allocation7], 4294967216 }
  0x59   :  { %4192 = dma.done.wait [#allocation10], 112  }
  0x5a   :  { %4193 = vsyncadd [#allocation10], 4294967184  ;;  %v5372_v0 = vmov 0.0   ;;  %vm4202_vm0 = vmmov 0   ;;  %v4343_v1 = vld [vmem:[#allocation6] sm:$0xf] }
  0x5b   :  { %3619 = vmatprep.subr.bf16.mxu0 %v5372_v0  ;;  %3625 = vmatprep.subr.bf16.mxu1 %v5372_v0  ;;  %v4348_v2 = vld [vmem:[%s5358_s0] sm:$0xff]  ;;  %vm141_vm1 = vcmask 1043456   ;;  %v4353_v3 = vld [vmem:[%s5358_s0 + $0x8] sm:$0xff]  ;;  %v4367_v8 = vld [vmem:[%s5358_s0 + $0x10] sm:$0xff]  ;;  %vm137_vm2 = vcmask 64512   ;;  %vm881_vm3 = vcmask 261120  }
  0x5c   :  { %3621 = vmatprep.mubr.msk.bf16.mxu0 %vm4202_vm0, %v5372_v0  ;;  %3627 = vmatprep.mubr.msk.bf16.mxu1 %vm4202_vm0, %v5372_v0  ;;  %v112_v4 = vpack.c.bf16 %v4348_v2, %v4348_v2  ;;  %v113_v5 = vpack.c.bf16 %v4353_v3, %v4353_v3  ;;  %v4372_v9 = vld [vmem:[%s5358_s0 + $0x18] sm:$0xff]  ;;  %v114_v10 = vpack.c.bf16 %v4367_v8, %v4367_v8  ;;  %v4383_v15 = vld [vmem:[%s5358_s0 + $0x20] sm:$0xff]  ;;  %v4388_v16 = vld [vmem:[%s5358_s0 + $0x28] sm:$0xff] }
  0x5d   :  { %121 = vxpose.xlu0.c.b16.start.end [1/1] (short) (narrow) %v4343_v1, 16  ;;  %v115_v11 = vpack.c.bf16 %v4372_v9, %v4372_v9  ;;  %v116_v17 = vpack.c.bf16 %v4383_v15, %v4383_v15  ;;  %v117_v18 = vpack.c.bf16 %v4388_v16, %v4388_v16  ;;  %v4407_v21 = vld [vmem:[%s5358_s0 + $0x30] sm:$0xff]  ;;  %v4412_v22 = vld [vmem:[%s5358_s0 + $0x38] sm:$0xff] }
  0x5e   :  { %v143_v6 = vsel %vm141_vm1, %v112_v4, 0  ;;  %v186_v7 = vsel %vm141_vm1, %v113_v5, 0  ;;  %v229_v12 = vsel %vm141_vm1, %v114_v10, 0  ;;  %v118_v23 = vpack.c.bf16 %v4407_v21, %v4407_v21 }
  0x5f   :  { %3620 = vmatpush3.bf16.msra.mxu0 %v143_v6  ;;  %3626 = vmatpush3.bf16.msra.mxu1 %v186_v7  ;;  %v272_v13 = vsel %vm141_vm1, %v115_v11, 0  ;;  %v315_v19 = vsel %vm141_vm1, %v116_v17, 0  ;;  %v358_v20 = vsel %vm141_vm1, %v117_v18, 0  ;;  %v119_v24 = vpack.c.bf16 %v4412_v22, %v4412_v22  ;;  %v3920_v11 = vld [vmem:[%s5365_s7 + $0x4] ss:$24 sps:$4 sm:$0xff]  }
  0x60   :  { %3631 = vmatprep.subr.bf16.mxu0 %v5372_v0  ;;  %3637 = vmatprep.subr.bf16.mxu1 %v5372_v0  ;;  %v401_v25 = vsel %vm141_vm1, %v118_v23, 0  ;;  %v3923_v23 = vld [vmem:[%s5365_s7 + $0x34] ss:$24 sps:$4 sm:$0xff]  }
  0x61   :  { %v444_v26 = vsel %vm141_vm1, %v119_v24, 0  ;;  %v3921_v24 = vld [vmem:[%s5365_s7 + $0x30] ss:$24 sps:$4 sm:$0xff]  }
  0xc3   :  { %v129_v14 = vpop.trf.xlu0 }
  0xc4   :  { %3622 = vmatmul.mubr.msk.bf16.vlgmr.msra.gmra.mrb[0].mxu0 %vm137_vm2, %v129_v14  ;;  %3628 = vmatmul.mubr.msk.bf16.vlgmr.msra.gmra.mrb[0].mxu1 %vm137_vm2, %v129_v14 }
  0xc5   :  { %3632 = vmatpush3.bf16.msra.mxu0 %v229_v12  ;;  %3638 = vmatpush3.bf16.msra.mxu1 %v272_v13 }
  0xc6   :  { %3633 = vmatprep.mubr.msk.bf16.mxu0 %vm4202_vm0, %v5372_v0  ;;  %3639 = vmatprep.mubr.msk.bf16.mxu1 %vm4202_vm0, %v5372_v0 }
  0xc7   :  { %3643 = vmatprep.subr.bf16.mxu0 %v5372_v0  ;;  %3649 = vmatprep.subr.bf16.mxu1 %v5372_v0 }
  0xcc   :  { %3634 = vmatmul.mubr.msk.bf16.vlgmr.msra.gmra.mrb[4].mxu0 %vm137_vm2, %v129_v14  ;;  %3640 = vmatmul.mubr.msk.bf16.vlgmr.msra.gmra.mrb[4].mxu1 %vm137_vm2, %v129_v14 }
  0xcd   :  { %3644 = vmatpush3.bf16.msra.mxu0 %v315_v19  ;;  %3650 = vmatpush3.bf16.msra.mxu1 %v358_v20  ;;  %v3918_v20 = vld [vmem:[%s5365_s7] ss:$24 sps:$4 sm:$0xff]  }
  0xce   :  { %3645 = vmatprep.mubr.msk.bf16.mxu0 %vm4202_vm0, %v5372_v0  ;;  %3651 = vmatprep.mubr.msk.bf16.mxu1 %vm4202_vm0, %v5372_v0 }
  0xcf   :  { %3655 = vmatprep.subr.bf16.mxu0 %v5372_v0  ;;  %3661 = vmatprep.subr.bf16.mxu1 %v5372_v0 }
  0xd4   :  { %3646 = vmatmul.mubr.msk.bf16.vlgmr.msra.gmra.mrb[8].mxu0 %vm137_vm2, %v129_v14  ;;  %3652 = vmatmul.mubr.msk.bf16.vlgmr.msra.gmra.mrb[8].mxu1 %vm137_vm2, %v129_v14 }
  0xd5   :  { %3656 = vmatpush3.bf16.msra.mxu0 %v401_v25  ;;  %3662 = vmatpush3.bf16.msra.mxu1 %v444_v26  ;;  %v4203_v25 = vmov 0   ;;  %v3926_v26 = vld [vmem:[%s5365_s7 + $0xc] ss:$24 sps:$4 sm:$0xff]  }
  0xd6   :  { %3657 = vmatprep.mubr.msk.bf16.mxu0 %vm4202_vm0, %v5372_v0  ;;  %3663 = vmatprep.mubr.msk.bf16.mxu1 %vm4202_vm0, %v5372_v0 }
  0xd7   :  { %3667 = vmatprep.subr.bf16.mxu0 %v5372_v0  ;;  %3673 = vmatprep.subr.bf16.mxu1 %v5372_v0 }
  0xdc   :  { %3658 = vmatmul.mubr.msk.bf16.vlgmr.msra.gmra.mrb[12].mxu0 %vm137_vm2, %v129_v14  ;;  %3664 = vmatmul.mubr.msk.bf16.vlgmr.msra.gmra.mrb[12].mxu1 %vm137_vm2, %v129_v14 }
  0xdd   :  { %3675 = vmatprep.mubr.msk.bf16.mxu1 %vm4202_vm0, %v5372_v0  ;;  %3669 = vmatprep.mubr.msk.bf16.mxu0 %vm4202_vm0, %v5372_v0 }
 0x197   :  { %v179_v27 = vpop.f32.mrb[0].mxu0  ;;  %v222_v28 = vpop.f32.mrb[0].mxu1 }
 0x198   :  { %v486_v29 = vpack.c.bf16 %v179_v27, %v179_v27  ;;  %v487_v30 = vpack.c.bf16 %v222_v28, %v222_v28  ;;  %v3623_v31 = vpop.f32.mrb[1].mxu0  ;;  %v3629_v32 = vpop.f32.mrb[1].mxu1  ;;  %v1015_v27 = vpack.c.bf16 %v4353_v3, %v4348_v2  ;;  %v3929_v28 = vld [vmem:[%s5365_s7 + $0x3c] ss:$24 sps:$4 sm:$0xff]   ;;  %v1016_v2 = vpack.c.bf16 %v4372_v9, %v4367_v8  ;;  %v3930_v9 = vld [vmem:[%s5365_s7 + $0x10] ss:$24 sps:$4 sm:$0xff]  }
 0x199   :  { %v182_v33 = vpop.f32.mrb[2].mxu0  ;;  %v225_v34 = vpop.f32.mrb[2].mxu1  ;;  %v1017_v3 = vpack.c.bf16 %v4388_v16, %v4383_v15  ;;  %v3932_v8 = vld [vmem:[%s5365_s7 + $0x14] ss:$24 sps:$4 sm:$0xff]   ;;  %v3935_v15 = vld [vmem:[%s5365_s7 + $0x44] ss:$24 sps:$4 sm:$0xff]  }
 0x19a   :  { %v498_v35 = vsel %vm141_vm1, %v486_v29, 0  ;;  %v541_v36 = vsel %vm141_vm1, %v487_v30, 0  ;;  %v3624_v37 = vpop.f32.mrb[3].mxu0  ;;  %v3630_v38 = vpop.f32.mrb[3].mxu1  ;;  %v3927_v29 = vld [vmem:[%s5365_s7 + $0x38] ss:$24 sps:$4 sm:$0xff]   ;;  %v1018_v30 = vpack.c.bf16 %v4412_v22, %v4407_v21 }
 0x19b   :  { %3668 = vmatpush3.bf16.msra.mxu0 %v498_v35  ;;  %3674 = vmatpush3.bf16.msra.mxu1 %v541_v36  ;;  %v3933_v16 = vld [vmem:[%s5365_s7 + $0x40] ss:$24 sps:$4 sm:$0xff]  }
 0x19c   :  { %3679 = vmatprep.subr.bf16.mxu0 %v5372_v0  ;;  %3685 = vmatprep.subr.bf16.mxu1 %v5372_v0 }
 0x19e   :  { %3676 = vmatmul.mubr.msk.bf16.vlgmr.msra.gmra.mrb[16].mxu1 %vm137_vm2, %v4343_v1  ;;  %3670 = vmatmul.mubr.msk.bf16.vlgmr.msra.gmra.mrb[16].mxu0 %vm137_vm2, %v4343_v1 }
 0x19f   :  { %v265_v39 = vpop.f32.mrb[4].mxu0  ;;  %v308_v40 = vpop.f32.mrb[4].mxu1  ;;  %3687 = vmatprep.mubr.msk.bf16.mxu1 %vm4202_vm0, %v5372_v0  ;;  %3681 = vmatprep.mubr.msk.bf16.mxu0 %vm4202_vm0, %v5372_v0 }
 0x1a0   :  { %v488_v41 = vpack.c.bf16 %v265_v39, %v265_v39  ;;  %v489_v42 = vpack.c.bf16 %v308_v40, %v308_v40  ;;  %v3635_v43 = vpop.f32.mrb[5].mxu0  ;;  %v3641_v44 = vpop.f32.mrb[5].mxu1 }
 0x1a1   :  { %v268_v45 = vpop.f32.mrb[6].mxu0  ;;  %v311_v46 = vpop.f32.mrb[6].mxu1 }
 0x1a2   :  { %v584_v47 = vsel %vm141_vm1, %v488_v41, 0  ;;  %v627_v48 = vsel %vm141_vm1, %v489_v42, 0  ;;  %v3636_v49 = vpop.f32.mrb[7].mxu0  ;;  %v3642_v50 = vpop.f32.mrb[7].mxu1 }
 0x1a3   :  { %3680 = vmatpush3.bf16.msra.mxu0 %v584_v47  ;;  %3686 = vmatpush3.bf16.msra.mxu1 %v627_v48 }
 0x1a4   :  { %3691 = vmatprep.subr.bf16.mxu0 %v5372_v0  ;;  %3697 = vmatprep.subr.bf16.mxu1 %v5372_v0 }
 0x1a6   :  { %3688 = vmatmul.mubr.msk.bf16.vlgmr.msra.gmra.mrb[20].mxu1 %vm137_vm2, %v4343_v1  ;;  %3682 = vmatmul.mubr.msk.bf16.vlgmr.msra.gmra.mrb[20].mxu0 %vm137_vm2, %v4343_v1 }
 0x1a7   :  { %v351_v51 = vpop.f32.mrb[8].mxu0  ;;  %v394_v52 = vpop.f32.mrb[8].mxu1  ;;  %3699 = vmatprep.mubr.msk.bf16.mxu1 %vm4202_vm0, %v5372_v0  ;;  %3693 = vmatprep.mubr.msk.bf16.mxu0 %vm4202_vm0, %v5372_v0 }
 0x1a8   :  { %v490_v53 = vpack.c.bf16 %v351_v51, %v351_v51  ;;  %v491_v54 = vpack.c.bf16 %v394_v52, %v394_v52  ;;  %v3647_v55 = vpop.f32.mrb[9].mxu0  ;;  %v3653_v56 = vpop.f32.mrb[9].mxu1 }
 0x1a9   :  { %v354_v57 = vpop.f32.mrb[10].mxu0  ;;  %v397_v58 = vpop.f32.mrb[10].mxu1 }
 0x1aa   :  { %v670_v59 = vsel %vm141_vm1, %v490_v53, 0  ;;  %v713_v60 = vsel %vm141_vm1, %v491_v54, 0  ;;  %v3648_v61 = vpop.f32.mrb[11].mxu0  ;;  %v3654_v62 = vpop.f32.mrb[11].mxu1 }
 0x1ab   :  { %3692 = vmatpush3.bf16.msra.mxu0 %v670_v59  ;;  %3698 = vmatpush3.bf16.msra.mxu1 %v713_v60 }
 0x1ac   :  { %3703 = vmatprep.subr.bf16.mxu0 %v5372_v0  ;;  %3709 = vmatprep.subr.bf16.mxu1 %v5372_v0 }
 0x1ae   :  { %3700 = vmatmul.mubr.msk.bf16.vlgmr.msra.gmra.mrb[24].mxu1 %vm137_vm2, %v4343_v1  ;;  %3694 = vmatmul.mubr.msk.bf16.vlgmr.msra.gmra.mrb[24].mxu0 %vm137_vm2, %v4343_v1 }
 0x1af   :  { %v437_v63 = vpop.f32.mrb[12].mxu0  ;;  %v480_v4 = vpop.f32.mrb[12].mxu1  ;;  %3711 = vmatprep.mubr.msk.bf16.mxu1 %vm4202_vm0, %v5372_v0  ;;  %3705 = vmatprep.mubr.msk.bf16.mxu0 %vm4202_vm0, %v5372_v0 }
 0x1b0   :  { %v492_v5 = vpack.c.bf16 %v437_v63, %v437_v63  ;;  %v493_v6 = vpack.c.bf16 %v480_v4, %v480_v4  ;;  %v3659_v7 = vpop.f32.mrb[13].mxu0  ;;  %v3665_v10 = vpop.f32.mrb[13].mxu1 }
 0x1b1   :  { %v440_v12 = vpop.f32.mrb[14].mxu0  ;;  %v483_v13 = vpop.f32.mrb[14].mxu1 }
 0x1b2   :  { %v756_v14 = vsel %vm141_vm1, %v492_v5, 0  ;;  %v799_v17 = vsel %vm141_vm1, %v493_v6, 0  ;;  %v3660_v18 = vpop.f32.mrb[15].mxu0  ;;  %v3666_v19 = vpop.f32.mrb[15].mxu1 }
 0x1b3   :  { %3704 = vmatpush3.bf16.msra.mxu0 %v756_v14  ;;  %3710 = vmatpush3.bf16.msra.mxu1 %v799_v17  ;;  %v1033_v14 = vlaneseq }
 0x1b4   :  { %1135 = vmatprep.subr.bf16.mxu1 %v3920_v11  ;;  %1281 = vmatprep.subr.bf16.mxu0 %v3932_v8 }
 0x1b5   :  { %v4578_v18 = vshrl.u32 %v1033_v14, 7 }
 0x1b6   :  { %3712 = vmatmul.mubr.msk.bf16.vlgmr.msra.gmra.mrb[28].mxu1 %vm137_vm2, %v4343_v1  ;;  %3706 = vmatmul.mubr.msk.bf16.vlgmr.msra.gmra.mrb[28].mxu0 %vm137_vm2, %v4343_v1  ;;  %v3924_v1 = vld [vmem:[%s5365_s7 + $0x8] ss:$24 sps:$4 sm:$0xff]  }
 0x1b7   :  { %1136 = vmatpush1.bf16.msra.mxu1 %v3918_v20  ;;  %1167 = vmatprep.mubr.bf16.mxu1 %v4203_v25 }
 0x1b8   :  { %1137 = vmatprep.subr.bf16.mxu1 %v3923_v23  ;;  %1313 = vmatprep.mubr.bf16.mxu0 %v4203_v25  ;;  %v1043_v23 = vsub.s32 2, %v4578_v18 }
 0x1b9   :  { %1282 = vmatpush1.bf16.msra.mxu0 %v3930_v9 }
 0x1ba   :  { %1283 = vmatprep.subr.bf16.mxu0 %v3935_v15 }
 0x1bb   :  { %1138 = vmatpush1.bf16.msra.mxu1 %v3921_v24 }
 0x1bc   :  { %1208 = vmatprep.subr.bf16.mxu1 %v3926_v26  ;;  %v4587_v26 = vld [vmem:[#allocation11] sm:$0x3f] }
 0x1bd   :  { %1284 = vmatpush1.bf16.msra.mxu0 %v3933_v16 }
 0x1be   :  { %3436 = vmatmul.mubr.msk.bf16.vlgmr.msra.gmra.mrb[32].mxu1 %vm881_vm3, %v1015_v27  ;;  %3739 = vmatprep.subr.bf16.mxu0 %v5372_v0 }
 0x1bf   :  { %1177 = vmatprep.mubr.bf16.mxu1 %v4203_v25  ;;  %1209 = vmatpush1.bf16.msra.mxu1 %v3924_v1  ;;  %v1035_v1 = vsub.s32 0, %v4578_v18 }
 0x1c0   :  { %1210 = vmatprep.subr.bf16.mxu1 %v3929_v28  ;;  %3444 = vmatmul.mubr.msk.bf16.vlgmr.msra.gmra.mrb[32].mxu0 %vm881_vm3, %v1015_v27 }
 0x1c1   :  { %1323 = vmatprep.mubr.bf16.mxu0 %v4203_v25 }
 0x1c3   :  { %1211 = vmatpush1.bf16.msra.mxu1 %v3927_v29 }
 0x1c4   :  { %3715 = vmatprep.subr.bf16.mxu1 %v5372_v0 }
 0x1c6   :  { %3437 = vmatmul.mubr.msk.bf16.gmra.mrb[36].mxu1 %vm881_vm3, %v1016_v2 }
 0x1c7   :  { %1187 = vmatprep.mubr.bf16.mxu1 %v4203_v25 }
 0x1c8   :  { %3445 = vmatmul.mubr.msk.bf16.gmra.mrb[36].mxu0 %vm881_vm3, %v1016_v2 }
 0x1c9   :  { %1333 = vmatprep.mubr.bf16.mxu0 %v4203_v25 }
 0x1ce   :  { %3438 = vmatmul.mubr.msk.bf16.gmra.mrb[40].mxu1 %vm881_vm3, %v1017_v3 }
 0x1cf   :  { %1197 = vmatprep.mubr.bf16.mxu1 %v4203_v25 }
 0x1d0   :  { %3446 = vmatmul.mubr.msk.bf16.gmra.mrb[40].mxu0 %vm881_vm3, %v1017_v3 }
 0x1d1   :  { %1343 = vmatprep.mubr.bf16.mxu0 %v4203_v25 }
 0x1d6   :  { %3439 = vmatmul.mubr.msk.bf16.gmra.mrb[44].mxu1 %vm881_vm3, %v1018_v30 }
 0x1d7   :  { %1240 = vmatprep.mubr.bf16.mxu1 %v4203_v25 }
 0x1d8   :  { %3447 = vmatmul.mubr.msk.bf16.gmra.mrb[44].mxu0 %vm881_vm3, %v1018_v30 }
 0x1d9   :  { %3741 = vmatprep.mubr.msk.bf16.mxu0 %vm4202_vm0, %v5372_v0 }
 0x1de   :  { %3440 = vmatmul.mubr.msk.bf16.vlgmr.msra.gmra.mrb[48].mxu1 %vm881_vm3, %v1015_v27  ;;  %v4590_v27 = vrot.slane %v4587_v26, %v1043_v23 }
 0x1df   :  { %1250 = vmatprep.mubr.bf16.mxu1 %v4203_v25 }
 0x1e6   :  { %3441 = vmatmul.mubr.msk.bf16.gmra.mrb[52].mxu1 %vm881_vm3, %v1016_v2 }
 0x1e7   :  { %1260 = vmatprep.mubr.bf16.mxu1 %v4203_v25 }
 0x1ee   :  { %3442 = vmatmul.mubr.msk.bf16.gmra.mrb[56].mxu1 %vm881_vm3, %v1017_v3  ;;  %v4597_v3 = vrot.slane %v4587_v26, %v1035_v1 }
 0x1ef   :  { %1270 = vmatprep.mubr.bf16.mxu1 %v4203_v25 }
 0x1f6   :  { %3443 = vmatmul.mubr.msk.bf16.gmra.mrb[60].mxu1 %vm881_vm3, %v1018_v30 }
 0x1f7   :  { %3717 = vmatprep.mubr.msk.bf16.mxu1 %vm4202_vm0, %v5372_v0 }
 0x271   :  { %v4546_v21 = vpop.f32.mrb[16].mxu1  ;;  %v4548_v22 = vpop.f32.mrb[16].mxu0 }
 0x272   :  { %v3677_v31 = vpop.f32.mrb[17].mxu1  ;;  %v3671_v32 = vpop.f32.mrb[17].mxu0 }
 0x273   :  { %v580_v33 = vpop.f32.mrb[18].mxu1  ;;  %v537_v34 = vpop.f32.mrb[18].mxu0 }
 0x274   :  { %v3678_v35 = vpop.f32.mrb[19].mxu1  ;;  %v3672_v36 = vpop.f32.mrb[19].mxu0 }
 0x279   :  { %v4550_v37 = vpop.f32.mrb[20].mxu1  ;;  %v4552_v38 = vpop.f32.mrb[20].mxu0 }
 0x27a   :  { %v3689_v39 = vpop.f32.mrb[21].mxu1  ;;  %v3683_v40 = vpop.f32.mrb[21].mxu0 }
 0x27b   :  { %v666_v41 = vpop.f32.mrb[22].mxu1  ;;  %v623_v42 = vpop.f32.mrb[22].mxu0 }
 0x27c   :  { %v3690_v43 = vpop.f32.mrb[23].mxu1  ;;  %v3684_v44 = vpop.f32.mrb[23].mxu0 }
 0x281   :  { %v4554_v45 = vpop.f32.mrb[24].mxu1  ;;  %v4556_v46 = vpop.f32.mrb[24].mxu0 }
 0x282   :  { %v3701_v47 = vpop.f32.mrb[25].mxu1  ;;  %v3695_v48 = vpop.f32.mrb[25].mxu0 }
 0x283   :  { %v752_v49 = vpop.f32.mrb[26].mxu1  ;;  %v709_v50 = vpop.f32.mrb[26].mxu0 }
 0x284   :  { %v3702_v51 = vpop.f32.mrb[27].mxu1  ;;  %v3696_v52 = vpop.f32.mrb[27].mxu0 }
 0x289   :  { %v4558_v53 = vpop.f32.mrb[28].mxu1  ;;  %v4560_v54 = vpop.f32.mrb[28].mxu0 }
 0x28a   :  { %v3713_v55 = vpop.f32.mrb[29].mxu1  ;;  %v3707_v56 = vpop.f32.mrb[29].mxu0 }
 0x28b   :  { %v838_v57 = vpop.f32.mrb[30].mxu1  ;;  %v795_v58 = vpop.f32.mrb[30].mxu0 }
 0x28c   :  { %v3714_v59 = vpop.f32.mrb[31].mxu1  ;;  %v3708_v60 = vpop.f32.mrb[31].mxu0 }
 0x291   :  { %v1169_v61 = vpop.f32.mrb[32].mxu1 }
 0x292   :  { %v4562_v62 = vpop.f32.mrb[33].mxu1  ;;  %v1170_v15 = vadd.f32 %v1169_v61, %v4597_v3 }
 0x293   :  { %v1173_v63 = vpop.f32.mrb[34].mxu1 }
 0x294   :  { %v4564_v4 = vpop.f32.mrb[35].mxu1  ;;  %v1355_v33 = vpack.c.bf16 %v1170_v15, %v1170_v15  ;;  %v1174_v40 = vadd.f32 %v1173_v63, %v4597_v3 }
 0x296   :  { %v1356_v47 = vpack.c.bf16 %v1174_v40, %v1174_v40 }
 0x299   :  { %v1179_v5 = vpop.f32.mrb[36].mxu1 }
 0x29a   :  { %v4566_v6 = vpop.f32.mrb[37].mxu1  ;;  %v1180_v51 = vadd.f32 %v1179_v5, %v4597_v3 }
 0x29b   :  { %v4568_v7 = vpop.f32.mrb[38].mxu1 }
 0x29c   :  { %v4570_v10 = vpop.f32.mrb[39].mxu1  ;;  %v1357_v59 = vpack.c.bf16 %v1180_v51, %v1180_v51  ;;  %v1184_v14 = vadd.f32 %v4568_v7, %v4597_v3 }
 0x2a1   :  { %v1189_v11 = vpop.f32.mrb[40].mxu1 }
 0x2a2   :  { %v4572_v12 = vpop.f32.mrb[41].mxu1  ;;  %v1190_v52 = vadd.f32 %v1189_v11, %v4597_v3 }
 0x2a3   :  { %v4574_v13 = vpop.f32.mrb[42].mxu1 }
 0x2a4   :  { %v4576_v17 = vpop.f32.mrb[43].mxu1  ;;  %v1359_v60 = vpack.c.bf16 %v1190_v52, %v1190_v52  ;;  %v1194_v7 = vadd.f32 %v4574_v13, %v4597_v3 }
 0x2a9   :  { %v1199_v19 = vpop.f32.mrb[44].mxu1 }
 0x2aa   :  { %v4580_v20 = vpop.f32.mrb[45].mxu1  ;;  %v1200_v23 = vadd.f32 %v1199_v19, %v4597_v3 }
 0x2ab   :  { %v4583_v24 = vpop.f32.mrb[46].mxu1 }
 0x2ac   :  { %v4585_v25 = vpop.f32.mrb[47].mxu1 }
 0x2b1   :  { %v1242_v28 = vpop.f32.mrb[48].mxu1 }
 0x2b2   :  { %v1243_v29 = vadd.f32 %v1242_v28, %v4590_v27  ;;  %v4594_v2 = vpop.f32.mrb[49].mxu1  ;;  %v1358_v28 = vpack.c.bf16 %v1184_v14, %v1184_v14 }
 0x2b3   :  { %v1246_v30 = vpop.f32.mrb[50].mxu1 }
 0x2b4   :  { %v1363_v8 = vpack.c.bf16 %v1243_v29, %v1243_v29  ;;  %v4599_v9 = vpop.f32.mrb[51].mxu1  ;;  %v1247_v16 = vadd.f32 %v1246_v30, %v4590_v27  ;;  %v1361_v29 = vpack.c.bf16 %v1200_v23, %v1200_v23 }
 0x2b6   :  { %3716 = vmatpush3.bf16.xpose.msra.mxu1 %v1363_v8  ;;  %v1364_v35 = vpack.c.bf16 %v1247_v16, %v1247_v16  ;;  %v1360_v8 = vpack.c.bf16 %v1194_v7, %v1194_v7  ;;  %v1204_v16 = vadd.f32 %v4583_v24, %v4597_v3 }
 0x2b7   :  { %3721 = vmatprep.subr.bf16.mxu1 %v5372_v0 }
 0x2b8   :  { %v1362_v13 = vpack.c.bf16 %v1204_v16, %v1204_v16 }
 0x2b9   :  { %v1252_v31 = vpop.f32.mrb[52].mxu1 }
 0x2ba   :  { %v4604_v32 = vpop.f32.mrb[53].mxu1  ;;  %v1253_v39 = vadd.f32 %v1252_v31, %v4590_v27  ;;  %v1051_v31 = vsub.s32 4, %v4578_v18 }
 0x2bb   :  { %v1256_v34 = vpop.f32.mrb[54].mxu1 }
 0x2bc   :  { %v4606_v36 = vpop.f32.mrb[55].mxu1  ;;  %v1365_v42 = vpack.c.bf16 %v1253_v39, %v1253_v39  ;;  %v1257_v55 = vadd.f32 %v1256_v34, %v4590_v27 }
 0x2bd   :  { %3718 = vmatmul.mubr.bf16.vlgmr.msra.gmra.mrb[64].mxu1 %v1355_v33  ;;  %v1315_v33 = vpop.f32.mrb[32].mxu0 }
 0x2be   :  { %3722 = vmatpush3.bf16.xpose.msra.mxu1 %v1364_v35  ;;  %3723 = vmatprep.mubr.msk.bf16.mxu1 %vm4202_vm0, %v5372_v0  ;;  %v1366_v63 = vpack.c.bf16 %v1257_v55, %v1257_v55  ;;  %v4659_v24 = vpop.f32.mrb[33].mxu0 }
 0x2bf   :  { %3727 = vmatprep.subr.bf16.mxu1 %v5372_v0  ;;  %v1319_v3 = vpop.f32.mrb[34].mxu0 }
 0x2c0   :  { %v4661_v40 = vpop.f32.mrb[35].mxu0 }
 0x2c1   :  { %v1262_v41 = vpop.f32.mrb[56].mxu1 }
 0x2c2   :  { %v1263_v43 = vadd.f32 %v1262_v41, %v4590_v27  ;;  %v4614_v44 = vpop.f32.mrb[57].mxu1 }
 0x2c3   :  { %v1266_v48 = vpop.f32.mrb[58].mxu1 }
 0x2c4   :  { %v1367_v49 = vpack.c.bf16 %v1263_v43, %v1263_v43  ;;  %v4616_v50 = vpop.f32.mrb[59].mxu1  ;;  %v1267_v1 = vadd.f32 %v1266_v48, %v4590_v27  ;;  %v1325_v48 = vpop.f32.mrb[36].mxu0 }
 0x2c5   :  { %3724 = vmatmul.mubr.bf16.vlgmr.msra.gmra.mrb[68].mxu1 %v1356_v47  ;;  %v1327_v51 = vpop.f32.mrb[37].mxu0 }
 0x2c6   :  { %3728 = vmatpush3.bf16.xpose.msra.mxu1 %v1365_v42  ;;  %3740 = vmatpush3.bf16.xpose.msra.mxu0 %v1367_v49  ;;  %v1368_v30 = vpack.c.bf16 %v1267_v1, %v1267_v1  ;;  %v1055_v42 = vsub.s32 5, %v4578_v18  ;;  %v1329_v52 = vpop.f32.mrb[38].mxu0 }
 0x2c7   :  { %3729 = vmatprep.mubr.msk.bf16.mxu1 %vm4202_vm0, %v5372_v0  ;;  %3733 = vmatprep.subr.bf16.mxu1 %v5372_v0 }
 0x2c8   :  { %3751 = vmatprep.subr.bf16.mxu0 %v5372_v0  ;;  %v4666_v49 = vrot.slane %v4587_v26, %v1055_v42 }
 0x2c9   :  { %v1272_v56 = vpop.f32.mrb[60].mxu1 }
 0x2ca   :  { %v1273_v57 = vadd.f32 %v1272_v56, %v4590_v27  ;;  %v4626_v58 = vpop.f32.mrb[61].mxu1  ;;  %v4672_v56 = vadd.f32 %v1327_v51, %v4666_v49 }
 0x2cb   :  { %v1276_v61 = vpop.f32.mrb[62].mxu1 }
 0x2cc   :  { %v1369_v5 = vpack.c.bf16 %v1273_v57, %v1273_v57  ;;  %v4628_v11 = vpop.f32.mrb[63].mxu1  ;;  %v1277_v19 = vadd.f32 %v1276_v61, %v4590_v27  ;;  %v1052_v27 = vrot.slane %v4587_v26, %v1051_v31 }
 0x2cd   :  { %3730 = vmatmul.mubr.bf16.vlgmr.msra.gmra.mrb[72].mxu1 %v1357_v59  ;;  %3742 = vmatmul.mubr.bf16.vlgmr.msra.gmra.mrb[48].mxu0 %v1359_v60  ;;  %v1331_v59 = vpop.f32.mrb[39].mxu0 }
 0x2ce   :  { %3734 = vmatpush3.bf16.xpose.msra.mxu1 %v1366_v63  ;;  %3752 = vmatpush3.bf16.xpose.msra.mxu0 %v1369_v5  ;;  %v1370_v15 = vpack.c.bf16 %v1277_v19, %v1277_v19  ;;  %v1316_v34 = vadd.f32 %v1315_v33, %v1052_v27  ;;  %v1320_v41 = vadd.f32 %v1319_v3, %v1052_v27  ;;  %v1335_v61 = vpop.f32.mrb[40].mxu0  ;;  %v4699_v33 = vld [vmem:[#allocation3] sm:$0xff] }
 0x2cf   :  { %3735 = vmatprep.mubr.msk.bf16.mxu1 %vm4202_vm0, %v5372_v0  ;;  %3753 = vmatprep.mubr.msk.bf16.mxu0 %vm4202_vm0, %v5372_v0  ;;  %v4669_v55 = vadd.f32 %v1325_v48, %v1052_v27  ;;  %v4674_v57 = vadd.f32 %v1329_v52, %v1052_v27  ;;  %v4677_v60 = vadd.f32 %v1331_v59, %v4666_v49  ;;  %v1337_v5 = vpop.f32.mrb[41].mxu0 }
 0x2d0   :  { %3745 = vmatprep.subr.bf16.mxu1 %v5372_v0  ;;  %3763 = vmatprep.subr.bf16.mxu0 %v5372_v0  ;;  %v1371_v35 = vpack.c.bf16 %v1316_v34, %v1316_v34  ;;  %v1372_v43 = vpack.c.bf16 %v1320_v41, %v1320_v41  ;;  %v4679_v63 = vadd.f32 %v1335_v61, %v1052_v27  ;;  %v1339_v23 = vpop.f32.mrb[42].mxu0 }
 0x2d1   :  { %v4682_v14 = vadd.f32 %v1337_v5, %v4666_v49  ;;  %v4684_v1 = vadd.f32 %v1339_v23, %v1052_v27 }
 0x2d2   :  { %v1799_v39 = vsel %vm141_vm1, %v1371_v35, 0  ;;  %v1845_v47 = vsel %vm141_vm1, %v1372_v43, 0 }
 0x2d5   :  { %3736 = vmatmul.mubr.bf16.vlgmr.msra.gmra.mrb[76].mxu1 %v1358_v28  ;;  %3754 = vmatmul.mubr.bf16.vlgmr.msra.gmra.mrb[52].mxu0 %v1361_v29  ;;  %v1341_v28 = vpop.f32.mrb[43].mxu0 }
 0x2d6   :  { %3746 = vmatpush3.bf16.xpose.msra.mxu1 %v1368_v30  ;;  %3747 = vmatprep.mubr.msk.bf16.mxu1 %vm4202_vm0, %v5372_v0  ;;  %v4687_v29 = vadd.f32 %v1341_v28, %v4666_v49  ;;  %v1345_v30 = vpop.f32.mrb[44].mxu0 }
 0x2d7   :  { %3757 = vmatprep.subr.bf16.mxu1 %v5372_v0  ;;  %3765 = vmatprep.mubr.msk.bf16.mxu0 %vm4202_vm0, %v5372_v0  ;;  %v4689_v7 = vadd.f32 %v1345_v30, %v1052_v27  ;;  %v1347_v19 = vpop.f32.mrb[45].mxu0 }
 0x2d8   :  { %3764 = vmatpush3.bf16.msra.mxu0 %v1799_v39 }
 0x2d9   :  { %3775 = vmatprep.subr.bf16.mxu0 %v5372_v0 }
 0x2dd   :  { %3748 = vmatmul.mubr.bf16.vlgmr.msra.gmra.mrb[80].mxu1 %v1360_v8  ;;  %v4692_v8 = vadd.f32 %v1347_v19, %v4666_v49 }
 0x2de   :  { %3758 = vmatpush3.bf16.xpose.msra.mxu1 %v1370_v15  ;;  %3759 = vmatprep.mubr.msk.bf16.mxu1 %vm4202_vm0, %v5372_v0  ;;  %v1349_v15 = vpop.f32.mrb[46].mxu0 }
 0x2df   :  { %3769 = vmatprep.subr.bf16.mxu1 %v5372_v0  ;;  %5374 = vst [vmem:[#allocation17_spill] sm:$0xff] %v4692_v8  ;;  %v4694_v16 = vadd.f32 %v1349_v15, %v1052_v27 }
 0x2e5   :  { %3760 = vmatmul.mubr.bf16.vlgmr.msra.gmra.mrb[84].mxu1 %v1362_v13  ;;  %v1351_v13 = vpop.f32.mrb[47].mxu0 }
 0x2e6   :  { %3771 = vmatprep.mubr.msk.bf16.mxu1 %vm4202_vm0, %v5372_v0  ;;  %3770 = vmatpush3.bf16.msra.mxu1 %v1845_v47  ;;  %v4697_v31 = vadd.f32 %v1351_v13, %v4666_v49 }
 0x2e7   :  { %3781 = vmatprep.subr.bf16.mxu1 %v5372_v0 }
 0x2e8   :  { %5375 = vst [vmem:[#allocation18_spill] sm:$0xff] %v4697_v31 }
 0x390   :  { %v1413_v34 = vpop.f32.mrb[64].mxu1 }
 0x391   :  { %v1414_v35 = vadd.f32 %v1413_v34, %v4699_v33  ;;  %v3719_v39 = vpop.f32.mrb[65].mxu1 }
 0x392   :  { %v1416_v3 = vpop.f32.mrb[66].mxu1 }
 0x393   :  { %v3720_v41 = vpop.f32.mrb[67].mxu1  ;;  %v1699_v42 = vsel %vm137_vm2, %v1414_v35, -inf }
 0x394   :  { %1700 = vmax.xlane.f32.xlu0 %v1699_v42 }
 0x398   :  { %v1453_v43 = vpop.f32.mrb[68].mxu1 }
 0x399   :  { %v1454_v47 = vadd.f32 %v1453_v43, %v4699_v33  ;;  %v3725_v27 = vpop.f32.mrb[69].mxu1 }
 0x39a   :  { %v1456_v48 = vpop.f32.mrb[70].mxu1 }
 0x39b   :  { %v3726_v51 = vpop.f32.mrb[71].mxu1  ;;  %v1702_v52 = vsel %vm137_vm2, %v1454_v47, -inf }
 0x39c   :  { %1703 = vmax.xlane.f32.xlu1 %v1702_v52 }
 0x3a0   :  { %v1493_v59 = vpop.f32.mrb[72].mxu1  ;;  %v1573_v61 = vpop.f32.mrb[48].mxu0 }
 0x3a1   :  { %v1494_v5 = vadd.f32 %v1493_v59, %v4699_v33  ;;  %v3731_v23 = vpop.f32.mrb[73].mxu1  ;;  %v3743_v28 = vpop.f32.mrb[49].mxu0  ;;  %v1574_v52 = vadd.f32 %v1573_v61, %v4699_v33 }
 0x3a2   :  { %v1496_v30 = vpop.f32.mrb[74].mxu1  ;;  %v1576_v19 = vpop.f32.mrb[50].mxu0 }
 0x3a3   :  { %v3732_v15 = vpop.f32.mrb[75].mxu1  ;;  %v3744_v13 = vpop.f32.mrb[51].mxu0  ;;  %v1705_v34 = vsel %vm137_vm2, %v1494_v5, -inf  ;;  %v1711_v19 = vsel %vm137_vm2, %v1574_v52, -inf }
 0x3a4   :  { %1706 = vmax.xlane.f32.xlu1 %v1705_v34 }
 0x3a8   :  { %v1533_v39 = vpop.f32.mrb[76].mxu1  ;;  %v1653_v3 = vpop.f32.mrb[52].mxu0 }
 0x3a9   :  { %v1534_v41 = vadd.f32 %v1533_v39, %v4699_v33  ;;  %v1654_v42 = vadd.f32 %v1653_v3, %v4699_v33  ;;  %v3737_v43 = vpop.f32.mrb[77].mxu1  ;;  %v3755_v27 = vpop.f32.mrb[53].mxu0 }
 0x3aa   :  { %v1536_v48 = vpop.f32.mrb[78].mxu1  ;;  %v1656_v51 = vpop.f32.mrb[54].mxu0 }
 0x3ab   :  { %v3738_v59 = vpop.f32.mrb[79].mxu1  ;;  %v3756_v23 = vpop.f32.mrb[55].mxu0  ;;  %v1708_v28 = vsel %vm137_vm2, %v1534_v41, -inf  ;;  %v1717_v30 = vsel %vm137_vm2, %v1654_v42, -inf }
 0x3ac   :  { %1709 = vmax.xlane.f32.xlu1 %v1708_v28  ;;  %1718 = vmax.xlane.f32.xlu0 %v1717_v30 }
 0x3b0   :  { %v1613_v15 = vpop.f32.mrb[80].mxu1  ;;  %1712 = vmax.xlane.f32.xlu1 %v1711_v19 }
 0x3b1   :  { %v1614_v13 = vadd.f32 %v1613_v15, %v4699_v33  ;;  %v3749_v34 = vpop.f32.mrb[81].mxu1 }
 0x3b2   :  { %v1616_v39 = vpop.f32.mrb[82].mxu1 }
 0x3b3   :  { %v3750_v3 = vpop.f32.mrb[83].mxu1  ;;  %v1714_v43 = vsel %vm137_vm2, %v1614_v13, -inf }
 0x3b4   :  { %1715 = vmax.xlane.f32.xlu1 %v1714_v43 }
 0x3b8   :  { %v1693_v61 = vpop.f32.mrb[84].mxu1 }
 0x3b9   :  { %v1694_v27 = vadd.f32 %v1693_v61, %v4699_v33  ;;  %v3761_v48 = vpop.f32.mrb[85].mxu1 }
 0x3ba   :  { %v1696_v51 = vpop.f32.mrb[86].mxu1 }
 0x3bb   :  { %v3762_v59 = vpop.f32.mrb[87].mxu1  ;;  %v1720_v23 = vsel %vm137_vm2, %v1694_v27, -inf }
 0x3bc   :  { %1721 = vmax.xlane.f32.xlu1 %v1720_v23 }
 0x421   :  { %v1701_v28 = vpop.xlane.xlu0 %1700 }
 0x422   :  { %v1723_v30 = vsub.f32 %v1414_v35, %v1701_v28 }
 0x424   :  { %v1731_v19 = vmul.f32 1.442695, %v1723_v30 }
 0x426   :  { %3952 = vpow2.f32 %v1731_v19 }
 0x429   :  { %v1704_v15 = vpop.xlane.xlu1 %1703 }
 0x42a   :  { %v1724_v34 = vsub.f32 %v1454_v47, %v1704_v15 }
 0x42c   :  { %v1733_v39 = vmul.f32 1.442695, %v1724_v34 }
 0x42e   :  { %3954 = vpow2.f32 %v1733_v39 }
 0x430   :  { %v3953_v3 = vpop.eup %3952 }
 0x431   :  { %v1707_v0 = vpop.xlane.xlu1 %1706  ;;  %v1747_v43 = vsel %vm137_vm2, %v3953_v3, 0.0 }
 0x432   :  { %v1725_v31 = vsub.f32 %v1494_v5, %v1707_v0  ;;  %1748 = vadd.xlane.f32.xlu0 %v1747_v43 }
 0x434   :  { %v1735_v61 = vmul.f32 1.442695, %v1725_v31 }
 0x436   :  { %3956 = vpow2.f32 %v1735_v61 }
 0x438   :  { %v3955_v48 = vpop.eup %3954 }
 0x439   :  { %v1710_v51 = vpop.xlane.xlu1 %1709  ;;  %v1719_v59 = vpop.xlane.xlu0 %1718  ;;  %v1750_v23 = vsel %vm137_vm2, %v3955_v48, 0.0 }
 0x43a   :  { %v1726_v35 = vsub.f32 %v1534_v41, %v1710_v51  ;;  %1751 = vadd.xlane.f32.xlu1 %v1750_v23  ;;  %v1729_v30 = vsub.f32 %v1654_v42, %v1719_v59 }
 0x43c   :  { %v1737_v28 = vmul.f32 1.442695, %v1726_v35  ;;  %v1743_v34 = vmul.f32 1.442695, %v1729_v30 }
 0x43d   :  { %v1713_v47 = vpop.xlane.xlu1 %1712 }
 0x43e   :  { %3958 = vpow2.f32 %v1737_v28  ;;  %v1727_v19 = vsub.f32 %v1574_v52, %v1713_v47 }
 0x440   :  { %v3957_v15 = vpop.eup %3956  ;;  %v1739_v39 = vmul.f32 1.442695, %v1727_v19 }
 0x441   :  { %v1716_v8 = vpop.xlane.xlu1 %1715  ;;  %v1753_v0 = vsel %vm137_vm2, %v3957_v15, 0.0 }
 0x442   :  { %3960 = vpow2.f32 %v1739_v39  ;;  %v1728_v31 = vsub.f32 %v1614_v13, %v1716_v8  ;;  %1754 = vadd.xlane.f32.xlu0 %v1753_v0 }
 0x443   :  { %3962 = vpow2.f32 %v1743_v34  ;;  %v1373_v34 = vpack.c.bf16 %v4669_v55, %v4669_v55 }
 0x444   :  { %v1741_v5 = vmul.f32 1.442695, %v1728_v31 }
 0x445   :  { %v1891_v31 = vsel %vm141_vm1, %v1373_v34, 0 }
 0x446   :  { %3964 = vpow2.f32 %v1741_v5 }
 0x448   :  { %v3959_v43 = vpop.eup %3958 }
 0x449   :  { %v1722_v41 = vpop.xlane.xlu1 %1721  ;;  %v1756_v61 = vsel %vm137_vm2, %v3959_v43, 0.0 }
 0x44a   :  { %v1730_v42 = vsub.f32 %v1694_v27, %v1722_v41  ;;  %1757 = vadd.xlane.f32.xlu1 %v1756_v61  ;;  %v5376_v41 = vmov 0.0  }
 0x44c   :  { %v4721_v51 = vpop.eup %3960  ;;  %v1745_v52 = vmul.f32 1.442695, %v1730_v42  ;;  %v1374_v42 = vpack.c.bf16 %v4674_v57, %v4674_v57 }
 0x44d   :  { %v1759_v59 = vsel %vm137_vm2, %v4721_v51, 0.0  ;;  %v4725_v23 = vpop.eup %3962 }
 0x44e   :  { %3966 = vpow2.f32 %v1745_v52  ;;  %1760 = vadd.xlane.f32.xlu0 %v1759_v59  ;;  %v1765_v35 = vsel %vm137_vm2, %v4725_v23, 0.0 }
 0x450   :  { %v4727_v8 = vpop.eup %3964 }
 0x451   :  { %v1762_v13 = vsel %vm137_vm2, %v4727_v8, 0.0 }
 0x452   :  { %1763 = vadd.xlane.f32.xlu1 %v1762_v13  ;;  %1766 = vadd.xlane.f32.xlu0 %v1765_v35  ;;  %v1375_v35 = vpack.c.bf16 %v4679_v63, %v4679_v63  ;;  %v1376_v63 = vpack.c.bf16 %v4684_v1, %v4684_v1 }
 0x458   :  { %v4733_v27 = vpop.eup %3966 }
 0x459   :  { %v1768_v28 = vsel %vm137_vm2, %v4733_v27, 0.0 }
 0x45a   :  { %1769 = vadd.xlane.f32.xlu1 %v1768_v28 }
 0x4bf   :  { %v1749_v30 = vpop.xlane.xlu0 %1748 }
 0x4c0   :  { %3968 = vrcp.f32 %v1749_v30  ;;  %v1983_v30 = vsel %vm141_vm1, %v1375_v35, 0 }
 0x4c7   :  { %v1752_v47 = vpop.xlane.xlu1 %1751 }
 0x4c8   :  { %3970 = vrcp.f32 %v1752_v47 }
 0x4ca   :  { %v3969_v19 = vpop.eup %3968 }
 0x4cb   :  { %v1779_v39 = vmul.f32 %v3969_v19, %v3953_v3  ;;  %v1937_v3 = vsel %vm141_vm1, %v1374_v42, 0 }
 0x4cd   :  { %v1787_v0 = vpack.c.bf16 %v1779_v39, %v1779_v39 }
 0x4cf   :  { %v1755_v5 = vpop.xlane.xlu0 %1754  ;;  %3766 = vmatmul.mubr.msk.bf16.vlgmr.msra.gmra.mrb[56].mxu0 %vm137_vm2, %v1787_v0 }
 0x4d0   :  { %3972 = vrcp.f32 %v1755_v5  ;;  %3776 = vmatpush3.bf16.msra.mxu0 %v1891_v31  ;;  %3777 = vmatprep.mubr.msk.bf16.mxu0 %vm4202_vm0, %v5376_v41  ;;  %v1047_v31 = vsub.s32 3, %v4578_v18  ;;  %v2029_v5 = vsel %vm141_vm1, %v1376_v63, 0 }
 0x4d1   :  { %3787 = vmatprep.subr.bf16.mxu0 %v5376_v41 }
 0x4d2   :  { %v3971_v61 = vpop.eup %3970 }
 0x4d3   :  { %v1780_v52 = vmul.f32 %v3971_v61, %v3955_v48  ;;  %v1377_v61 = vpack.c.bf16 %v4689_v7, %v4689_v7 }
 0x4d5   :  { %v1788_v55 = vpack.c.bf16 %v1780_v52, %v1780_v52  ;;  %v2075_v7 = vsel %vm141_vm1, %v1377_v61, 0 }
 0x4d7   :  { %v1758_v59 = vpop.xlane.xlu1 %1757  ;;  %3772 = vmatmul.mubr.msk.bf16.vlgmr.msra.gmra.mrb[88].mxu1 %vm137_vm2, %v1788_v55 }
 0x4d8   :  { %3974 = vrcp.f32 %v1758_v59  ;;  %3782 = vmatpush3.bf16.msra.mxu1 %v1937_v3  ;;  %3783 = vmatprep.mubr.msk.bf16.mxu1 %vm4202_vm0, %v5376_v41  ;;  %v4770_v3 = vrot.slane %v4587_v26, %v1047_v31 }
 0x4d9   :  { %3793 = vmatprep.subr.bf16.mxu1 %v5376_v41 }
 0x4da   :  { %v3973_v13 = vpop.eup %3972 }
 0x4db   :  { %v1781_v28 = vmul.f32 %v3973_v13, %v3957_v15  ;;  %v1761_v57 = vpop.xlane.xlu0 %1760 }
 0x4dc   :  { %3976 = vrcp.f32 %v1761_v57  ;;  %v1245_v57 = vadd.f32 %v4594_v2, %v4770_v3 }
 0x4dd   :  { %v1789_v48 = vpack.c.bf16 %v1781_v28, %v1781_v28  ;;  %v1039_v28 = vsub.s32 1, %v4578_v18  ;;  %v1249_v18 = vadd.f32 %v4599_v9, %v4770_v3 }
 0x4df   :  { %v1764_v47 = vpop.xlane.xlu1 %1763  ;;  %v1767_v19 = vpop.xlane.xlu0 %1766  ;;  %3778 = vmatmul.mubr.msk.bf16.vlgmr.msra.gmra.mrb[60].mxu0 %vm137_vm2, %v1789_v48  ;;  %v4790_v48 = vrot.slane %v4587_v26, %v1039_v28  ;;  %v2180_v26 = vpack.c.bf16 %v1249_v18, %v1249_v18 }
 0x4e0   :  { %3978 = vrcp.f32 %v1764_v47  ;;  %3788 = vmatpush3.bf16.msra.mxu0 %v1983_v30  ;;  %3789 = vmatprep.mubr.msk.bf16.mxu0 %vm4202_vm0, %v5376_v41  ;;  %v2179_v30 = vpack.c.bf16 %v1245_v57, %v1245_v57 }
 0x4e1   :  { %3980 = vrcp.f32 %v1767_v19  ;;  %3799 = vmatprep.subr.bf16.mxu0 %v5376_v41  ;;  %v1172_v19 = vadd.f32 %v4562_v62, %v4790_v48  ;;  %v1259_v62 = vadd.f32 %v4606_v36, %v4770_v3 }
 0x4e2   :  { %v3975_v34 = vpop.eup %3974 }
 0x4e3   :  { %v1782_v15 = vmul.f32 %v3975_v34, %v3959_v43  ;;  %v1255_v34 = vadd.f32 %v4604_v32, %v4770_v3  ;;  %v2171_v9 = vpack.c.bf16 %v1172_v19, %v1172_v19 }
 0x4e5   :  { %v1790_v39 = vpack.c.bf16 %v1782_v15, %v1782_v15  ;;  %v2181_v63 = vpack.c.bf16 %v1255_v34, %v1255_v34  ;;  %v1182_v15 = vadd.f32 %v4566_v6, %v4790_v48  ;;  %v1269_v6 = vadd.f32 %v4616_v50, %v4770_v3 }
 0x4e6   :  { %v3977_v0 = vpop.eup %3976 }
 0x4e7   :  { %v1783_v42 = vmul.f32 %v3977_v0, %v4721_v51  ;;  %v1770_v52 = vpop.xlane.xlu1 %1769  ;;  %3784 = vmatmul.mubr.msk.bf16.vlgmr.msra.gmra.mrb[92].mxu1 %vm137_vm2, %v1790_v39  ;;  %v1378_v51 = vpack.c.bf16 %v4694_v16, %v4694_v16  ;;  %v2182_v39 = vpack.c.bf16 %v1259_v62, %v1259_v62  ;;  %v2173_v36 = vpack.c.bf16 %v1182_v15, %v1182_v15 }
 0x4e8   :  { %3982 = vrcp.f32 %v1770_v52  ;;  %3794 = vmatpush3.bf16.msra.mxu1 %v2029_v5  ;;  %3795 = vmatprep.mubr.msk.bf16.mxu1 %vm4202_vm0, %v5376_v41  ;;  %v1186_v0 = vadd.f32 %v4570_v10, %v4790_v48  ;;  %v1192_v5 = vadd.f32 %v4572_v12, %v4790_v48  ;;  %v2184_v61 = vpack.c.bf16 %v1269_v6, %v1269_v6 }
 0x4e9   :  { %v1791_v1 = vpack.c.bf16 %v1783_v42, %v1783_v42  ;;  %3805 = vmatprep.subr.bf16.mxu1 %v5376_v41  ;;  %v2121_v16 = vsel %vm141_vm1, %v1378_v51, 0  ;;  %v1275_v10 = vadd.f32 %v4626_v58, %v4770_v3  ;;  %v1196_v42 = vadd.f32 %v4576_v17, %v4790_v48 }
 0x4ea   :  { %v3979_v43 = vpop.eup %3978  ;;  %v2175_v50 = vpack.c.bf16 %v1192_v5, %v1192_v5  ;;  %v1279_v12 = vadd.f32 %v4628_v11, %v4770_v3 }
 0x4eb   :  { %v3981_v55 = vpop.eup %3980  ;;  %v1784_v59 = vmul.f32 %v3979_v43, %v4727_v8  ;;  %3790 = vmatmul.mubr.msk.bf16.vlgmr.msra.gmra.mrb[64].mxu0 %vm137_vm2, %v1791_v1  ;;  %v2185_v52 = vpack.c.bf16 %v1275_v10, %v1275_v10  ;;  %v1318_v1 = vadd.f32 %v4659_v24, %v4666_v49  ;;  %v2176_v58 = vpack.c.bf16 %v1196_v42, %v1196_v42 }
 0x4ec   :  { %3800 = vmatpush3.bf16.msra.mxu0 %v2075_v7  ;;  %3801 = vmatprep.mubr.msk.bf16.mxu0 %vm4202_vm0, %v5376_v41  ;;  %v1785_v13 = vmul.f32 %v3981_v55, %v4725_v23  ;;  %v1202_v43 = vadd.f32 %v4580_v20, %v4790_v48  ;;  %v2186_v17 = vpack.c.bf16 %v1279_v12, %v1279_v12 }
 0x4ed   :  { %v1792_v35 = vpack.c.bf16 %v1784_v59, %v1784_v59  ;;  %3811 = vmatprep.subr.bf16.mxu0 %v5376_v41  ;;  %v2187_v55 = vpack.c.bf16 %v1318_v1, %v1318_v1  ;;  %v1322_v7 = vadd.f32 %v4661_v40, %v4666_v49  ;;  %v1206_v24 = vadd.f32 %v4585_v25, %v4790_v48 }
 0x4ee   :  { %v1793_v8 = vpack.c.bf16 %v1785_v13, %v1785_v13  ;;  %v2177_v11 = vpack.c.bf16 %v1202_v43, %v1202_v43 }
 0x4ef   :  { %3796 = vmatmul.mubr.msk.bf16.vlgmr.msra.gmra.mrb[96].mxu1 %vm137_vm2, %v1792_v35  ;;  %v2615_v20 = vsel %vm141_vm1, %v2187_v55, 0  ;;  %v2178_v40 = vpack.c.bf16 %v1206_v24, %v1206_v24 }
 0x4f0   :  { %3806 = vmatpush3.bf16.msra.mxu1 %v2121_v16  ;;  %3807 = vmatprep.mubr.msk.bf16.mxu1 %vm4202_vm0, %v5376_v41 }
 0x4f1   :  { %3817 = vmatprep.subr.bf16.mxu1 %v5376_v41 }
 0x4f2   :  { %v3983_v23 = vpop.eup %3982 }
 0x4f3   :  { %v1786_v2 = vmul.f32 %v3983_v23, %v4733_v27  ;;  %3802 = vmatmul.mubr.msk.bf16.vlgmr.msra.gmra.mrb[68].mxu0 %vm137_vm2, %v1793_v8  ;;  %v1176_v27 = vadd.f32 %v4564_v4, %v4790_v48  ;;  %v1265_v4 = vadd.f32 %v4614_v44, %v4770_v3  ;;  %v2174_v44 = vpack.c.bf16 %v1186_v0, %v1186_v0 }
 0x4f4   :  { %3813 = vmatprep.mubr.msk.bf16.mxu0 %vm4202_vm0, %v5376_v41  ;;  %v2188_v3 = vpack.c.bf16 %v1322_v7, %v1322_v7 }
 0x4f5   :  { %3812 = vmatpush3.bf16.xpose.msra.mxu0 %v2179_v30  ;;  %v1794_v47 = vpack.c.bf16 %v1786_v2, %v1786_v2  ;;  %v2172_v32 = vpack.c.bf16 %v1176_v27, %v1176_v27  ;;  %v2183_v31 = vpack.c.bf16 %v1265_v4, %v1265_v4 }
 0x4f6   :  { %3823 = vmatprep.subr.bf16.mxu0 %v5376_v41  ;;  %v2661_v49 = vsel %vm141_vm1, %v2188_v3, 0 }
 0x4f7   :  { %3808 = vmatmul.mubr.msk.bf16.vlgmr.msra.gmra.mrb[100].mxu1 %vm137_vm2, %v1794_v47 }
 0x4f8   :  { %3819 = vmatprep.mubr.msk.bf16.mxu1 %vm4202_vm0, %v5376_v41 }
 0x4f9   :  { %3818 = vmatpush3.bf16.xpose.msra.mxu1 %v2180_v26 }
 0x4fa   :  { %3829 = vmatprep.subr.bf16.mxu1 %v5376_v41 }
 0x4fc   :  { %3814 = vmatmul.mubr.bf16.vlgmr.msra.gmra.mrb[72].mxu0 %v2171_v9 }
 0x4fd   :  { %3824 = vmatpush3.bf16.xpose.msra.mxu0 %v2181_v63  ;;  %3825 = vmatprep.mubr.msk.bf16.mxu0 %vm4202_vm0, %v5376_v41 }
 0x4fe   :  { %3835 = vmatprep.subr.bf16.mxu0 %v5376_v41 }
 0x500   :  { %3820 = vmatmul.mubr.bf16.vlgmr.msra.gmra.mrb[104].mxu1 %v2172_v32 }
 0x501   :  { %3830 = vmatpush3.bf16.xpose.msra.mxu1 %v2182_v39  ;;  %3831 = vmatprep.mubr.msk.bf16.mxu1 %vm4202_vm0, %v5376_v41 }
 0x502   :  { %3841 = vmatprep.subr.bf16.mxu1 %v5376_v41 }
 0x504   :  { %3826 = vmatmul.mubr.bf16.vlgmr.msra.gmra.mrb[76].mxu0 %v2173_v36 }
 0x505   :  { %3836 = vmatpush3.bf16.xpose.msra.mxu0 %v2183_v31  ;;  %3837 = vmatprep.mubr.msk.bf16.mxu0 %vm4202_vm0, %v5376_v41 }
 0x506   :  { %3847 = vmatprep.subr.bf16.mxu0 %v5376_v41 }
 0x508   :  { %3832 = vmatmul.mubr.bf16.vlgmr.msra.gmra.mrb[108].mxu1 %v2174_v44 }
 0x509   :  { %3842 = vmatpush3.bf16.xpose.msra.mxu1 %v2184_v61  ;;  %3843 = vmatprep.mubr.msk.bf16.mxu1 %vm4202_vm0, %v5376_v41 }
 0x50a   :  { %3853 = vmatprep.subr.bf16.mxu1 %v5376_v41 }
 0x50c   :  { %3838 = vmatmul.mubr.bf16.vlgmr.msra.gmra.mrb[80].mxu0 %v2175_v50 }
 0x50d   :  { %3848 = vmatpush3.bf16.xpose.msra.mxu0 %v2185_v52  ;;  %3849 = vmatprep.mubr.msk.bf16.mxu0 %vm4202_vm0, %v5376_v41 }
 0x50e   :  { %3859 = vmatprep.subr.bf16.mxu0 %v5376_v41 }
 0x510   :  { %3844 = vmatmul.mubr.bf16.vlgmr.msra.gmra.mrb[112].mxu1 %v2176_v58 }
 0x511   :  { %3854 = vmatpush3.bf16.xpose.msra.mxu1 %v2186_v17  ;;  %3855 = vmatprep.mubr.msk.bf16.mxu1 %vm4202_vm0, %v5376_v41 }
 0x512   :  { %3865 = vmatprep.subr.bf16.mxu1 %v5376_v41 }
 0x514   :  { %3850 = vmatmul.mubr.bf16.vlgmr.msra.gmra.mrb[84].mxu0 %v2177_v11 }
 0x515   :  { %3860 = vmatpush3.bf16.msra.mxu0 %v2615_v20  ;;  %3861 = vmatprep.mubr.msk.bf16.mxu0 %vm4202_vm0, %v5376_v41 }
 0x516   :  { %3871 = vmatprep.subr.bf16.mxu0 %v5376_v41 }
 0x518   :  { %3856 = vmatmul.mubr.bf16.vlgmr.msra.gmra.mrb[116].mxu1 %v2178_v40 }
 0x519   :  { %3866 = vmatpush3.bf16.msra.mxu1 %v2661_v49  ;;  %3867 = vmatprep.mubr.msk.bf16.mxu1 %vm4202_vm0, %v5376_v41 }
 0x51a   :  { %3877 = vmatprep.subr.bf16.mxu1 %v5376_v41 }
 0x5a2   :  { %v4861_v25 = vpop.f32.mrb[56].mxu0 }
 0x5a3   :  { %v3767_v51 = vpop.f32.mrb[57].mxu0 }
 0x5a4   :  { %v1838_v59 = vpop.f32.mrb[58].mxu0 }
 0x5a5   :  { %v3768_v13 = vpop.f32.mrb[59].mxu0 }
 0x5aa   :  { %v4863_v35 = vpop.f32.mrb[88].mxu1 }
 0x5ab   :  { %v3003_v28 = vpack.c.bf16 %v4863_v35, %v4861_v25  ;;  %v3773_v57 = vpop.f32.mrb[89].mxu1 }
 0x5ac   :  { %v1884_v16 = vpop.f32.mrb[90].mxu1 }
 0x5ad   :  { %v3774_v8 = vpop.f32.mrb[91].mxu1 }
 0x5b2   :  { %v4867_v23 = vpop.f32.mrb[60].mxu0 }
 0x5b3   :  { %v3779_v48 = vpop.f32.mrb[61].mxu0 }
 0x5b4   :  { %v1930_v30 = vpop.f32.mrb[62].mxu0 }
 0x5b5   :  { %v3780_v18 = vpop.f32.mrb[63].mxu0 }
 0x5ba   :  { %v4869_v2 = vpop.f32.mrb[92].mxu1 }
 0x5bb   :  { %v3005_v47 = vpack.c.bf16 %v4869_v2, %v4867_v23  ;;  %v3785_v19 = vpop.f32.mrb[93].mxu1 }
 0x5bc   :  { %v1976_v26 = vpop.f32.mrb[94].mxu1 }
 0x5bd   :  { %v3786_v34 = vpop.f32.mrb[95].mxu1 }
 0x5be   :  { %v4873_v9 = vpop.f32.mrb[64].mxu0 }
 0x5bf   :  { %v3791_v27 = vpop.f32.mrb[65].mxu0 }
 0x5c0   :  { %v2022_v63 = vpop.f32.mrb[66].mxu0 }
 0x5c1   :  { %v3792_v62 = vpop.f32.mrb[67].mxu0 }
 0x5c2   :  { %v4875_v32 = vpop.f32.mrb[96].mxu1 }
 0x5c3   :  { %v3007_v15 = vpack.c.bf16 %v4875_v32, %v4873_v9  ;;  %v3797_v39 = vpop.f32.mrb[97].mxu1 }
 0x5c4   :  { %v2068_v4 = vpop.f32.mrb[98].mxu1 }
 0x5c5   :  { %v3798_v36 = vpop.f32.mrb[99].mxu1 }
 0x5c6   :  { %v4879_v0 = vpop.f32.mrb[68].mxu0 }
 0x5c7   :  { %v3803_v31 = vpop.f32.mrb[69].mxu0 }
 0x5c8   :  { %v2114_v6 = vpop.f32.mrb[70].mxu0 }
 0x5c9   :  { %v3804_v44 = vpop.f32.mrb[71].mxu0 }
 0x5ca   :  { %v4881_v5 = vpop.f32.mrb[100].mxu1 }
 0x5cb   :  { %v3009_v61 = vpack.c.bf16 %v4881_v5, %v4879_v0  ;;  %v3809_v10 = vpop.f32.mrb[101].mxu1 }
 0x5cc   :  { %v2160_v50 = vpop.f32.mrb[102].mxu1 }
 0x5cd   :  { %v3810_v42 = vpop.f32.mrb[103].mxu1 }
 0x5cf   :  { %v2229_v52 = vpop.f32.mrb[72].mxu0 }
 0x5d0   :  { %v2230_v12 = vadd.f32 %v2229_v52, %v4699_v33  ;;  %v3815_v1 = vpop.f32.mrb[73].mxu0 }
 0x5d1   :  { %v2232_v58 = vpop.f32.mrb[74].mxu0 }
 0x5d2   :  { %v3816_v43 = vpop.f32.mrb[75].mxu0  ;;  %v2515_v17 = vsel %vm137_vm2, %v2230_v12, -inf }
 0x5d3   :  { %v2269_v55 = vpop.f32.mrb[104].mxu1  ;;  %2516 = vmax.xlane.f32.xlu0 %v2515_v17 }
 0x5d4   :  { %v2270_v7 = vadd.f32 %v2269_v55, %v4699_v33  ;;  %v3821_v11 = vpop.f32.mrb[105].mxu1 }
 0x5d5   :  { %v2272_v24 = vpop.f32.mrb[106].mxu1 }
 0x5d6   :  { %v3822_v20 = vpop.f32.mrb[107].mxu1  ;;  %v2518_v3 = vsel %vm137_vm2, %v2270_v7, -inf }
 0x5d7   :  { %2519 = vmax.xlane.f32.xlu1 %v2518_v3  ;;  %v2309_v40 = vpop.f32.mrb[76].mxu0 }
 0x5d8   :  { %v2310_v49 = vadd.f32 %v2309_v40, %v4699_v33  ;;  %v3827_v51 = vpop.f32.mrb[77].mxu0 }
 0x5d9   :  { %v2312_v59 = vpop.f32.mrb[78].mxu0 }
 0x5da   :  { %v3828_v13 = vpop.f32.mrb[79].mxu0  ;;  %v2521_v57 = vsel %vm137_vm2, %v2310_v49, -inf }
 0x5db   :  { %v2349_v16 = vpop.f32.mrb[108].mxu1  ;;  %2522 = vmax.xlane.f32.xlu0 %v2521_v57 }
 0x5dc   :  { %v2350_v8 = vadd.f32 %v2349_v16, %v4699_v33  ;;  %v3833_v48 = vpop.f32.mrb[109].mxu1 }
 0x5dd   :  { %v2352_v30 = vpop.f32.mrb[110].mxu1 }
 0x5de   :  { %v3834_v18 = vpop.f32.mrb[111].mxu1  ;;  %v2524_v19 = vsel %vm137_vm2, %v2350_v8, -inf }
 0x5df   :  { %2525 = vmax.xlane.f32.xlu1 %v2524_v19  ;;  %v2389_v26 = vpop.f32.mrb[80].mxu0 }
 0x5e0   :  { %v2390_v34 = vadd.f32 %v2389_v26, %v4699_v33  ;;  %v3839_v27 = vpop.f32.mrb[81].mxu0 }
 0x5e1   :  { %v2392_v63 = vpop.f32.mrb[82].mxu0 }
 0x5e2   :  { %v3840_v62 = vpop.f32.mrb[83].mxu0  ;;  %v2527_v39 = vsel %vm137_vm2, %v2390_v34, -inf }
 0x5e3   :  { %v2429_v4 = vpop.f32.mrb[112].mxu1  ;;  %2528 = vmax.xlane.f32.xlu0 %v2527_v39 }
 0x5e4   :  { %v2430_v36 = vadd.f32 %v2429_v4, %v4699_v33  ;;  %v3845_v31 = vpop.f32.mrb[113].mxu1 }
 0x5e5   :  { %v2432_v6 = vpop.f32.mrb[114].mxu1 }
 0x5e6   :  { %v3846_v44 = vpop.f32.mrb[115].mxu1  ;;  %v2530_v10 = vsel %vm137_vm2, %v2430_v36, -inf }
 0x5e7   :  { %2531 = vmax.xlane.f32.xlu1 %v2530_v10  ;;  %v2469_v50 = vpop.f32.mrb[84].mxu0 }
 0x5e8   :  { %v2470_v42 = vadd.f32 %v2469_v50, %v4699_v33  ;;  %v3851_v52 = vpop.f32.mrb[85].mxu0 }
 0x5e9   :  { %v2472_v1 = vpop.f32.mrb[86].mxu0 }
 0x5ea   :  { %v3852_v58 = vpop.f32.mrb[87].mxu0  ;;  %v2533_v43 = vsel %vm137_vm2, %v2470_v42, -inf }
 0x5eb   :  { %v2509_v17 = vpop.f32.mrb[116].mxu1  ;;  %2534 = vmax.xlane.f32.xlu0 %v2533_v43 }
 0x5ec   :  { %v2510_v55 = vadd.f32 %v2509_v17, %v4699_v33  ;;  %v3857_v11 = vpop.f32.mrb[117].mxu1 }
 0x5ed   :  { %v2512_v24 = vpop.f32.mrb[118].mxu1 }
 0x5ee   :  { %v3858_v20 = vpop.f32.mrb[119].mxu1  ;;  %v2536_v3 = vsel %vm137_vm2, %v2510_v55, -inf  ;;  %v3420_v24 = vld [vmem:[%s5361_s3] ss:$0 sm:$0xff] }
 0x5ef   :  { %2537 = vmax.xlane.f32.xlu1 %v2536_v3  ;;  %v3421_v20 = vld [vmem:[%s5362_s4] ss:$0 sm:$0xff] }
 0x660   :  { %v2517_v40 = vpop.xlane.xlu0 %2516 }
 0x661   :  { %v2539_v51 = vsub.f32 %v2230_v12, %v2517_v40  ;;  %v4935_v40 = vld [vmem:[%s5358_s0] sm:$0xff] }
 0x663   :  { %v2547_v59 = vmul.f32 1.442695, %v2539_v51  ;;  %v863_v51 = vmul.f32 %v4935_v40, %v3421_v20 }
 0x664   :  { %v2520_v13 = vpop.xlane.xlu1 %2519 }
 0x665   :  { %3984 = vpow2.f32 %v2547_v59  ;;  %v2540_v57 = vsub.f32 %v2270_v7, %v2520_v13  ;;  %v849_v13 = vmul.f32 %v3420_v24, %v4546_v21 }
 0x667   :  { %v2549_v16 = vmul.f32 1.442695, %v2540_v57  ;;  %v4944_v57 = vld [vmem:[%s5358_s0 + $0x8] sm:$0xff] }
 0x668   :  { %v2523_v48 = vpop.xlane.xlu0 %2522 }
 0x669   :  { %3986 = vpow2.f32 %v2549_v16  ;;  %v2541_v30 = vsub.f32 %v2310_v49, %v2523_v48  ;;  %v850_v16 = vmul.f32 %v3420_v24, %v4552_v38 }
 0x66b   :  { %v2551_v18 = vmul.f32 1.442695, %v2541_v30 }
 0x66c   :  { %v2526_v19 = vpop.xlane.xlu1 %2525 }
 0x66d   :  { %3988 = vpow2.f32 %v2551_v18  ;;  %v2542_v33 = vsub.f32 %v2350_v8, %v2526_v19  ;;  %v4955_v18 = vld [vmem:[%s5358_s0 + $0x10] sm:$0xff] }
 0x66e   :  { %v865_v21 = vmul.f32 %v4955_v18, %v3421_v20 }
 0x66f   :  { %v4901_v26 = vpop.eup %3984  ;;  %v2553_v27 = vmul.f32 1.442695, %v2542_v33  ;;  %v851_v33 = vmul.f32 %v3420_v24, %v4550_v37  ;;  %v4979_v37 = vld [vmem:[%s5358_s0 + $0x20] sm:$0xff] }
 0x670   :  { %v2529_v63 = vpop.xlane.xlu0 %2528  ;;  %v2563_v62 = vsel %vm137_vm2, %v4901_v26, 0.0 }
 0x671   :  { %3990 = vpow2.f32 %v2553_v27  ;;  %v2543_v12 = vsub.f32 %v2390_v34, %v2529_v63  ;;  %2564 = vadd.xlane.f32.xlu0 %v2563_v62  ;;  %v852_v27 = vmul.f32 %v3420_v24, %v4556_v46  ;;  %v4967_v63 = vld [vmem:[%s5358_s0 + $0x18] sm:$0xff]  ;;  %v867_v46 = vmul.f32 %v4979_v37, %v3421_v20 }
 0x672   :  { %v866_v62 = vmul.f32 %v4967_v63, %v3421_v20 }
 0x673   :  { %v4905_v39 = vpop.eup %3986  ;;  %v2555_v7 = vmul.f32 1.442695, %v2543_v12 }
 0x674   :  { %v2532_v4 = vpop.xlane.xlu1 %2531  ;;  %v2566_v49 = vsel %vm137_vm2, %v4905_v39, 0.0 }
 0x675   :  { %3992 = vpow2.f32 %v2555_v7  ;;  %v2544_v31 = vsub.f32 %v2430_v36, %v2532_v4  ;;  %2567 = vadd.xlane.f32.xlu1 %v2566_v49  ;;  %v4974_v4 = vadd.f32 %v865_v21, %v850_v16  ;;  %v853_v49 = vmul.f32 %v3420_v24, %v4554_v45  ;;  %v5001_v45 = vld [vmem:[%s5358_s0 + $0x30] sm:$0xff] }
 0x677   :  { %v4909_v8 = vpop.eup %3988  ;;  %v2557_v6 = vmul.f32 1.442695, %v2544_v31 }
 0x678   :  { %v2535_v44 = vpop.xlane.xlu0 %2534  ;;  %v2569_v10 = vsel %vm137_vm2, %v4909_v8, 0.0 }
 0x679   :  { %3994 = vpow2.f32 %v2557_v6  ;;  %v2545_v34 = vsub.f32 %v2470_v42, %v2535_v44  ;;  %2570 = vadd.xlane.f32.xlu0 %v2569_v10  ;;  %v4985_v6 = vadd.f32 %v866_v62, %v851_v33  ;;  %v4990_v44 = vld [vmem:[%s5358_s0 + $0x28] sm:$0xff]  ;;  %v2189_v33 = vpack.c.bf16 %v4672_v56, %v4672_v56 }
 0x67a   :  { %v868_v10 = vmul.f32 %v4990_v44, %v3421_v20 }
 0x67b   :  { %v4913_v50 = vpop.eup %3990  ;;  %v2559_v52 = vmul.f32 1.442695, %v2545_v34  ;;  %v854_v34 = vmul.f32 %v3420_v24, %v4560_v54  ;;  %v5009_v54 = vld [vmem:[%s5358_s0 + $0x38] sm:$0xff] }
 0x67c   :  { %v2538_v1 = vpop.xlane.xlu1 %2537  ;;  %v2572_v58 = vsel %vm137_vm2, %v4913_v50, 0.0 }
 0x67d   :  { %3996 = vpow2.f32 %v2559_v52  ;;  %v2546_v36 = vsub.f32 %v2510_v55, %v2538_v1  ;;  %2573 = vadd.xlane.f32.xlu1 %v2572_v58  ;;  %v848_v55 = vmul.f32 %v3420_v24, %v4548_v22  ;;  %v864_v22 = vmul.f32 %v4944_v57, %v3421_v20 }
 0x67e   :  { %v888_v52 = vsel %vm881_vm3, %v4974_v4, 0.0  ;;  %v4996_v1 = vadd.f32 %v867_v46, %v852_v27  ;;  %v869_v58 = vmul.f32 %v5001_v45, %v3421_v20  ;;  %v2707_v46 = vsel %vm141_vm1, %v2189_v33, 0 }
 0x67f   :  { %v4917_v43 = vpop.eup %3992  ;;  %v2561_v17 = vmul.f32 1.442695, %v2546_v36  ;;  %v4950_v30 = vadd.f32 %v863_v51, %v848_v55  ;;  %v4962_v38 = vadd.f32 %v864_v22, %v849_v13  ;;  %v891_v36 = vsel %vm881_vm3, %v4985_v6, 0.0 }
 0x680   :  { %v2575_v11 = vsel %vm137_vm2, %v4917_v43, 0.0  ;;  %v894_v55 = vsel %vm881_vm3, %v4996_v1, 0.0  ;;  %v5017_v51 = vadd.f32 %v869_v58, %v854_v34 }
 0x681   :  { %3998 = vpow2.f32 %v2561_v17  ;;  %2576 = vadd.xlane.f32.xlu0 %v2575_v11  ;;  %v882_v7 = vsel %vm881_vm3, %v4950_v30, 0.0  ;;  %v885_v31 = vsel %vm881_vm3, %v4962_v38, 0.0  ;;  %v870_v17 = vmul.f32 %v5009_v54, %v3421_v20 }
 0x682   :  { %v855_v11 = vmul.f32 %v3420_v24, %v4558_v53  ;;  %v900_v22 = vsel %vm881_vm3, %v5017_v51, 0.0 }
 0x683   :  { %v4921_v42 = vpop.eup %3994 }
 0x684   :  { %v2578_v3 = vsel %vm137_vm2, %v4921_v42, 0.0  ;;  %v5023_v16 = vadd.f32 %v870_v17, %v855_v11  ;;  %v2192_v11 = vpack.c.bf16 %v4687_v29, %v4687_v29 }
 0x685   :  { %2579 = vadd.xlane.f32.xlu1 %v2578_v3  ;;  %v5015_v3 = vadd.f32 %v868_v10, %v853_v49  ;;  %v2190_v49 = vpack.c.bf16 %v4677_v60, %v4677_v60 }
 0x686   :  { %v903_v53 = vsel %vm881_vm3, %v5023_v16, 0.0 }
 0x687   :  { %v4938_v59 = vpop.eup %3996  ;;  %v897_v13 = vsel %vm881_vm3, %v5015_v3, 0.0  ;;  %v2753_v34 = vsel %vm141_vm1, %v2190_v49, 0 }
 0x688   :  { %v2581_v48 = vsel %vm137_vm2, %v4938_v59, 0.0 }
 0x689   :  { %2582 = vadd.xlane.f32.xlu0 %v2581_v48 }
 0x68b   :  { %v4958_v19 = vpop.eup %3998 }
 0x68c   :  { %v2584_v12 = vsel %vm137_vm2, %v4958_v19, 0.0 }
 0x68d   :  { %2585 = vadd.xlane.f32.xlu1 %v2584_v12  ;;  %883 = vadd.xlane.f32.xlu0 %v882_v7 }
 0x691   :  { %886 = vadd.xlane.f32.xlu1 %v885_v31  ;;  %889 = vadd.xlane.f32.xlu0 %v888_v52  ;;  %v2191_v52 = vpack.c.bf16 %v4682_v14, %v4682_v14 }
 0x693   :  { %v2799_v17 = vsel %vm141_vm1, %v2191_v52, 0  ;;  %v3942_v52 = vld [vmem:[%s5367_s9 + $0x58] sm:$0xff]  }
 0x695   :  { %892 = vadd.xlane.f32.xlu1 %v891_v36  ;;  %895 = vadd.xlane.f32.xlu0 %v894_v55 }
 0x699   :  { %898 = vadd.xlane.f32.xlu1 %v897_v13  ;;  %901 = vadd.xlane.f32.xlu0 %v900_v22  ;;  %v2845_v22 = vsel %vm141_vm1, %v2192_v11, 0  ;;  %v3948_v11 = vld [vmem:[%s5367_s9 + $0x70] sm:$0xff]  }
 0x69d   :  { %904 = vadd.xlane.f32.xlu1 %v903_v53  ;;  %v5377_v53 = vld [vmem:[#allocation17_spill] sm:$0xff] }
 0x6fe   :  { %v2565_v24 = vpop.xlane.xlu0 %2564 }
 0x6ff   :  { %4000 = vrcp.f32 %v2565_v24  ;;  %v2193_v24 = vpack.c.bf16 %v5377_v53, %v5377_v53 }
 0x701   :  { %v2891_v33 = vsel %vm141_vm1, %v2193_v24, 0 }
 0x702   :  { %v2568_v20 = vpop.xlane.xlu1 %2567 }
 0x703   :  { %4002 = vrcp.f32 %v2568_v20 }
 0x706   :  { %v2571_v48 = vpop.xlane.xlu0 %2570 }
 0x707   :  { %4004 = vrcp.f32 %v2571_v48  ;;  %v3936_v48 = vld [vmem:[%s5367_s9 + $0x40] sm:$0xff]  }
 0x709   :  { %v4001_v21 = vpop.eup %4000 }
 0x70a   :  { %v2595_v27 = vmul.f32 %v4001_v21, %v4901_v26  ;;  %v2574_v62 = vpop.xlane.xlu1 %2573 }
 0x70b   :  { %4006 = vrcp.f32 %v2574_v62 }
 0x70c   :  { %v2603_v12 = vpack.c.bf16 %v2595_v27, %v2595_v27  ;;  %v5378_v27 = vld [vmem:[#allocation18_spill] sm:$0xff] }
 0x70d   :  { %v4003_v7 = vpop.eup %4002 }
 0x70e   :  { %v2596_v31 = vmul.f32 %v4003_v7, %v4905_v39  ;;  %3862 = vmatmul.mubr.msk.bf16.vlgmr.msra.gmra.mrb[88].mxu0 %vm137_vm2, %v2603_v12  ;;  %v2577_v10 = vpop.xlane.xlu0 %2576 }
 0x70f   :  { %3872 = vmatpush3.bf16.msra.mxu0 %v2707_v46  ;;  %4008 = vrcp.f32 %v2577_v10  ;;  %3873 = vmatprep.mubr.msk.bf16.mxu0 %vm4202_vm0, %v5376_v41  ;;  %v3938_v10 = vld [vmem:[%s5367_s9 + $0x48] sm:$0xff]  }
 0x710   :  { %v2604_v56 = vpack.c.bf16 %v2596_v31, %v2596_v31  ;;  %3883 = vmatprep.subr.bf16.mxu0 %v5376_v41 }
 0x711   :  { %v4005_v26 = vpop.eup %4004 }
 0x712   :  { %v2597_v60 = vmul.f32 %v4005_v26, %v4909_v8  ;;  %3868 = vmatmul.mubr.msk.bf16.vlgmr.msra.gmra.mrb[120].mxu1 %vm137_vm2, %v2604_v56  ;;  %v2580_v39 = vpop.xlane.xlu1 %2579 }
 0x713   :  { %3878 = vmatpush3.bf16.msra.mxu1 %v2753_v34  ;;  %4010 = vrcp.f32 %v2580_v39  ;;  %3879 = vmatprep.mubr.msk.bf16.mxu1 %vm4202_vm0, %v5376_v41  ;;  %v3940_v34 = vld [vmem:[%s5367_s9 + $0x50] sm:$0xff]   ;;  %v3944_v39 = vld [vmem:[%s5367_s9 + $0x60] sm:$0xff]  }
 0x714   :  { %v2605_v58 = vpack.c.bf16 %v2597_v60, %v2597_v60  ;;  %3889 = vmatprep.subr.bf16.mxu1 %v5376_v41  ;;  %v3943_v60 = vld [vmem:[%s5367_s9 + $0x18] sm:$0xff]  }
 0x715   :  { %v4007_v36 = vpop.eup %4006 }
 0x716   :  { %v2598_v14 = vmul.f32 %v4007_v36, %v4913_v50  ;;  %3874 = vmatmul.mubr.msk.bf16.vlgmr.msra.gmra.mrb[92].mxu0 %vm137_vm2, %v2605_v58  ;;  %v2583_v8 = vpop.xlane.xlu0 %2582  ;;  %v3945_v58 = vld [vmem:[%s5367_s9 + $0x20] sm:$0xff]   ;;  %v3946_v36 = vld [vmem:[%s5367_s9 + $0x68] sm:$0xff]  }
 0x717   :  { %3884 = vmatpush3.bf16.msra.mxu0 %v2799_v17  ;;  %4012 = vrcp.f32 %v2583_v8  ;;  %3885 = vmatprep.mubr.msk.bf16.mxu0 %vm4202_vm0, %v5376_v41  ;;  %v3947_v17 = vld [vmem:[%s5367_s9 + $0x28] sm:$0xff]   ;;  %v3950_v8 = vld [vmem:[%s5367_s9 + $0x78] sm:$0xff]  }
 0x718   :  { %v2606_v55 = vpack.c.bf16 %v2598_v14, %v2598_v14  ;;  %3895 = vmatprep.subr.bf16.mxu0 %v5376_v41  ;;  %v3949_v14 = vld [vmem:[%s5367_s9 + $0x30] sm:$0xff]  }
 0x719   :  { %v4009_v13 = vpop.eup %4008 }
 0x71a   :  { %v2599_v29 = vmul.f32 %v4009_v13, %v4917_v43  ;;  %3880 = vmatmul.mubr.msk.bf16.vlgmr.msra.gmra.mrb[124].mxu1 %vm137_vm2, %v2606_v55  ;;  %v2586_v50 = vpop.xlane.xlu1 %2585  ;;  %v2194_v43 = vpack.c.bf16 %v5378_v27, %v5378_v27  ;;  %v3951_v55 = vld [vmem:[%s5367_s9 + $0x38] sm:$0xff]  }
 0x71b   :  { %3890 = vmatpush3.bf16.msra.mxu1 %v2845_v22  ;;  %4014 = vrcp.f32 %v2586_v50  ;;  %3891 = vmatprep.mubr.msk.bf16.mxu1 %vm4202_vm0, %v5376_v41 }
 0x71c   :  { %v2607_v20 = vpack.c.bf16 %v2599_v29, %v2599_v29  ;;  %3901 = vmatprep.subr.bf16.mxu1 %v5376_v41  ;;  %v2937_v46 = vsel %vm141_vm1, %v2194_v43, 0 }
 0x71d   :  { %v4011_v21 = vpop.eup %4010 }
 0x71e   :  { %v2600_v62 = vmul.f32 %v4011_v21, %v4921_v42  ;;  %3886 = vmatmul.mubr.msk.bf16.vlgmr.msra.gmra.mrb[96].mxu0 %vm137_vm2, %v2607_v20  ;;  %v3937_v42 = vld [vmem:[%s5367_s9] sm:$0xff]  }
 0x71f   :  { %3896 = vmatpush3.bf16.msra.mxu0 %v2891_v33  ;;  %3897 = vmatprep.mubr.msk.bf16.mxu0 %vm4202_vm0, %v5376_v41 }
 0x720   :  { %v2608_v12 = vpack.c.bf16 %v2600_v62, %v2600_v62  ;;  %3579 = vmatprep.subr.bf16.mxu0 %v3936_v48 }
 0x721   :  { %v4013_v7 = vpop.eup %4012 }
 0x722   :  { %v2601_v49 = vmul.f32 %v4013_v7, %v4938_v59  ;;  %3892 = vmatmul.mubr.msk.bf16.vlgmr.msra.gmra.mrb[128].mxu1 %vm137_vm2, %v2608_v12  ;;  %v3939_v59 = vld [vmem:[%s5367_s9 + $0x8] sm:$0xff]  }
 0x723   :  { %3902 = vmatpush3.bf16.msra.mxu1 %v2937_v46  ;;  %3903 = vmatprep.mubr.msk.bf16.mxu1 %vm4202_vm0, %v5376_v41 }
 0x724   :  { %v2609_v31 = vpack.c.bf16 %v2601_v49, %v2601_v49 }
 0x725   :  { %v4015_v56 = vpop.eup %4014 }
 0x726   :  { %v2602_v26 = vmul.f32 %v4015_v56, %v4958_v19  ;;  %3898 = vmatmul.mubr.msk.bf16.vlgmr.msra.gmra.mrb[100].mxu0 %vm137_vm2, %v2609_v31  ;;  %v3941_v19 = vld [vmem:[%s5367_s9 + $0x10] sm:$0xff]  }
 0x727   :  { %3580 = vmatpush3.bf16.msra.mxu0 %v3937_v42 }
 0x728   :  { %v2610_v41 = vpack.c.bf16 %v2602_v26, %v2602_v26  ;;  %3581 = vmatprep.subr.bf16.mxu0 %v3938_v10 }
 0x72a   :  { %3904 = vmatmul.mubr.msk.bf16.vlgmr.msra.gmra.mrb[132].mxu1 %vm137_vm2, %v2610_v41 }
 0x72b   :  { %3582 = vmatpush3.bf16.msra.mxu0 %v3939_v59 }
 0x72c   :  { %3583 = vmatprep.subr.bf16.mxu0 %v3940_v34 }
 0x72f   :  { %3584 = vmatpush3.bf16.msra.mxu0 %v3941_v19 }
 0x730   :  { %3585 = vmatprep.subr.bf16.mxu0 %v3942_v52 }
 0x733   :  { %3586 = vmatpush3.bf16.msra.mxu0 %v3943_v60 }
 0x734   :  { %3587 = vmatprep.subr.bf16.mxu0 %v3944_v39 }
 0x737   :  { %3588 = vmatpush3.bf16.msra.mxu0 %v3945_v58 }
 0x738   :  { %3589 = vmatprep.subr.bf16.mxu0 %v3946_v36 }
 0x73b   :  { %3590 = vmatpush3.bf16.msra.mxu0 %v3947_v17  ;;  %v3464_v17 = vld [vmem:[%s5368_s10] ss:$0 sm:$0xff] }
 0x73c   :  { %3591 = vmatprep.subr.bf16.mxu0 %v3948_v11 }
 0x73f   :  { %3592 = vmatpush3.bf16.msra.mxu0 %v3949_v14 }
 0x740   :  { %3593 = vmatprep.subr.bf16.mxu0 %v3950_v8 }
 0x743   :  { %3594 = vmatpush3.bf16.msra.mxu0 %v3951_v55 }
 0x7e1   :  { %v2651_v13 = vpop.f32.mrb[88].mxu0 }
 0x7e2   :  { %v3863_v22 = vpop.f32.mrb[89].mxu0 }
 0x7e3   :  { %v2654_v53 = vpop.f32.mrb[90].mxu0 }
 0x7e4   :  { %v3864_v24 = vpop.f32.mrb[91].mxu0 }
 0x7e5   :  { %v2697_v29 = vpop.f32.mrb[120].mxu1 }
 0x7e6   :  { %v3004_v50 = vpack.c.bf16 %v2697_v29, %v2651_v13  ;;  %v3869_v20 = vpop.f32.mrb[121].mxu1 }
 0x7e7   :  { %v2700_v48 = vpop.f32.mrb[122].mxu1 }
 0x7e8   :  { %v3870_v21 = vpop.f32.mrb[123].mxu1  ;;  %3178 = vmatprep.mubr.bf16.mxu0 %v3004_v50 }
 0x7e9   :  { %v2743_v33 = vpop.f32.mrb[92].mxu0  ;;  %3179 = vmatmul.mubr.bf16.vlgmr.msra.gmra.mrb[104].mxu0 %v3003_v28 }
 0x7ea   :  { %v3875_v27 = vpop.f32.mrb[93].mxu0 }
 0x7eb   :  { %v2746_v43 = vpop.f32.mrb[94].mxu0 }
 0x7ec   :  { %v3876_v62 = vpop.f32.mrb[95].mxu0 }
 0x7ed   :  { %v2789_v12 = vpop.f32.mrb[124].mxu1  ;;  %v887_v62 = vpop.xlane.xlu1 %886 }
 0x7ee   :  { %v3006_v7 = vpack.c.bf16 %v2789_v12, %v2743_v33  ;;  %v3881_v46 = vpop.f32.mrb[125].mxu1  ;;  %v884_v33 = vpop.xlane.xlu0 %883 }
 0x7ef   :  { %v2792_v49 = vpop.f32.mrb[126].mxu1 }
 0x7f0   :  { %v3882_v42 = vpop.f32.mrb[127].mxu1  ;;  %3186 = vmatprep.mubr.bf16.mxu0 %v3006_v7 }
 0x7f1   :  { %v2835_v31 = vpop.f32.mrb[96].mxu0  ;;  %3187 = vmatmul.mubr.bf16.gmra.mrb[108].mxu0 %v3005_v47 }
 0x7f2   :  { %v3887_v10 = vpop.f32.mrb[97].mxu0 }
 0x7f3   :  { %v2838_v56 = vpop.f32.mrb[98].mxu0  ;;  %v890_v10 = vpop.xlane.xlu0 %889 }
 0x7f4   :  { %v3888_v26 = vpop.f32.mrb[99].mxu0 }
 0x7f5   :  { %v2881_v59 = vpop.f32.mrb[128].mxu1 }
 0x7f6   :  { %v3008_v25 = vpack.c.bf16 %v2881_v59, %v2835_v31  ;;  %v3893_v35 = vpop.f32.mrb[129].mxu1  ;;  %v907_v59 = vmul.f32 0.03125, %v884_v33 }
 0x7f7   :  { %v2884_v28 = vpop.f32.mrb[130].mxu1 }
 0x7f8   :  { %v3894_v41 = vpop.f32.mrb[131].mxu1  ;;  %3194 = vmatprep.mubr.bf16.mxu0 %v3008_v25 }
 0x7f9   :  { %v2927_v34 = vpop.f32.mrb[100].mxu0  ;;  %3195 = vmatmul.mubr.bf16.gmra.mrb[112].mxu0 %v3007_v15 }
 0x7fa   :  { %v3899_v19 = vpop.f32.mrb[101].mxu0 }
 0x7fb   :  { %v2930_v52 = vpop.f32.mrb[102].mxu0 }
 0x7fc   :  { %v3900_v60 = vpop.f32.mrb[103].mxu0 }
 0x7fd   :  { %v2973_v39 = vpop.f32.mrb[132].mxu1 }
 0x7fe   :  { %v3010_v23 = vpack.c.bf16 %v2973_v39, %v2927_v34  ;;  %v3905_v2 = vpop.f32.mrb[133].mxu1  ;;  %v908_v34 = vmul.f32 0.03125, %v887_v62  ;;  %v896_v39 = vpop.xlane.xlu0 %895 }
 0x7ff   :  { %v2976_v47 = vpop.f32.mrb[134].mxu1  ;;  %v909_v2 = vmul.f32 0.03125, %v890_v10 }
 0x800   :  { %v3906_v58 = vpop.f32.mrb[135].mxu1  ;;  %3202 = vmatprep.mubr.bf16.mxu0 %v3010_v23 }
 0x801   :  { %3203 = vmatmul.mubr.bf16.gmra.mrb[116].mxu0 %v3009_v61 }
 0x8bc   :  { %v3595_v36 = vpop.f32.mrb[104].mxu0 }
 0x8bd   :  { %v3596_v9 = vpop.f32.mrb[105].mxu0 }
 0x8be   :  { %v3597_v32 = vadd.f32 %v3596_v9, %v3595_v36  ;;  %v3598_v15 = vpop.f32.mrb[106].mxu0 }
 0x8bf   :  { %v3599_v11 = vpop.f32.mrb[107].mxu0 }
 0x8c0   :  { %v3181_v14 = vadd.f32 %v3597_v32, %v3464_v17  ;;  %v3600_v8 = vadd.f32 %v3599_v11, %v3598_v15 }
 0x8c2   :  { %v3184_v55 = vadd.f32 %v3600_v8, %v3464_v17  ;;  %v5141_v13 = vadd.f32 %v4935_v40, %v3181_v14  ;;  %v911_v14 = vmul.f32 0.03125, %v896_v39 }
 0x8c4   :  { %v3601_v22 = vpop.f32.mrb[108].mxu0  ;;  %v3221_v0 = vsel %vm881_vm3, %v5141_v13, 0.0  ;;  %v5146_v5 = vadd.f32 %v4944_v57, %v3184_v55 }
 0x8c5   :  { %v3602_v61 = vpop.f32.mrb[109].mxu0  ;;  %3222 = vadd.xlane.f32.xlu0 %v3221_v0 }
 0x8c6   :  { %v3603_v53 = vadd.f32 %v3602_v61, %v3601_v22  ;;  %v3604_v24 = vpop.f32.mrb[110].mxu0  ;;  %v3224_v29 = vsel %vm881_vm3, %v5146_v5, 0.0  ;;  %v5197_v61 = vsub.f32 %v4996_v1, %v911_v14 }
 0x8c7   :  { %v3605_v50 = vpop.f32.mrb[111].mxu0  ;;  %3225 = vadd.xlane.f32.xlu1 %v3224_v29 }
 0x8c8   :  { %v3189_v20 = vadd.f32 %v3603_v53, %v3464_v17  ;;  %v3606_v48 = vadd.f32 %v3605_v50, %v3604_v24 }
 0x8ca   :  { %v3192_v40 = vadd.f32 %v3606_v48, %v3464_v17  ;;  %v5151_v21 = vadd.f32 %v4955_v18, %v3189_v20 }
 0x8cc   :  { %v3607_v27 = vpop.f32.mrb[112].mxu0  ;;  %v3227_v57 = vsel %vm881_vm3, %v5151_v21, 0.0  ;;  %v5156_v43 = vadd.f32 %v4967_v63, %v3192_v40  ;;  %v893_v63 = vpop.xlane.xlu1 %892  ;;  %v927_v40 = vmul.f32 %v5197_v61, %v5197_v61 }
 0x8cd   :  { %v3608_v12 = vpop.f32.mrb[113].mxu0  ;;  %3228 = vadd.xlane.f32.xlu0 %v3227_v57  ;;  %v910_v9 = vmul.f32 0.03125, %v893_v63 }
 0x8ce   :  { %v3609_v7 = vadd.f32 %v3608_v12, %v3607_v27  ;;  %v3610_v46 = vpop.f32.mrb[114].mxu0  ;;  %v3230_v49 = vsel %vm881_vm3, %v5156_v43, 0.0  ;;  %v943_v57 = vsel %vm881_vm3, %v927_v40, 0.0 }
 0x8cf   :  { %v3611_v42 = vpop.f32.mrb[115].mxu0  ;;  %3231 = vadd.xlane.f32.xlu1 %v3230_v49 }
 0x8d0   :  { %v3197_v18 = vadd.f32 %v3609_v7, %v3464_v17  ;;  %v3612_v31 = vadd.f32 %v3611_v42, %v3610_v46  ;;  %v899_v36 = vpop.xlane.xlu1 %898 }
 0x8d2   :  { %v3200_v56 = vadd.f32 %v3612_v31, %v3464_v17  ;;  %v5161_v26 = vadd.f32 %v4979_v37, %v3197_v18  ;;  %v5171_v37 = vsub.f32 %v4950_v30, %v907_v59  ;;  %v5182_v30 = vsub.f32 %v4974_v4, %v909_v2 }
 0x8d4   :  { %v3613_v25 = vpop.f32.mrb[116].mxu0  ;;  %v3233_v35 = vsel %vm881_vm3, %v5161_v26, 0.0  ;;  %v5166_v28 = vadd.f32 %v4990_v44, %v3200_v56  ;;  %v5174_v44 = vsub.f32 %v4962_v38, %v908_v34  ;;  %v923_v11 = vmul.f32 %v5171_v37, %v5171_v37  ;;  %v902_v38 = vpop.xlane.xlu0 %901 }
 0x8d5   :  { %v3614_v41 = vpop.f32.mrb[117].mxu0  ;;  %3234 = vadd.xlane.f32.xlu0 %v3233_v35  ;;  %v905_v0 = vpop.xlane.xlu1 %904  ;;  %v913_v53 = vmul.f32 0.03125, %v902_v38  ;;  %v925_v24 = vmul.f32 %v5182_v30, %v5182_v30 }
 0x8d6   :  { %v3615_v19 = vadd.f32 %v3614_v41, %v3613_v25  ;;  %v3616_v52 = vpop.f32.mrb[118].mxu0  ;;  %v3236_v60 = vsel %vm881_vm3, %v5166_v28, 0.0  ;;  %v924_v4 = vmul.f32 %v5174_v44, %v5174_v44  ;;  %v914_v29 = vmul.f32 0.03125, %v905_v0 }
 0x8d7   :  { %v3617_v23 = vpop.f32.mrb[119].mxu0  ;;  %3237 = vadd.xlane.f32.xlu1 %v3236_v60  ;;  %v5209_v1 = vsub.f32 %v5017_v51, %v913_v53  ;;  %v937_v48 = vsel %vm881_vm3, %v925_v24, 0.0 }
 0x8d8   :  { %v3205_v47 = vadd.f32 %v3615_v19, %v3464_v17  ;;  %v3618_v58 = vadd.f32 %v3617_v23, %v3616_v52  ;;  %v934_v50 = vsel %vm881_vm3, %v924_v4, 0.0  ;;  %v5215_v33 = vsub.f32 %v5023_v16, %v914_v29 }
 0x8d9   :  { %v929_v51 = vmul.f32 %v5209_v1, %v5209_v1 }
 0x8da   :  { %v3208_v32 = vadd.f32 %v3618_v58, %v3464_v17  ;;  %v5177_v15 = vadd.f32 %v5001_v45, %v3205_v47  ;;  %v5190_v17 = vsub.f32 %v4985_v6, %v910_v9  ;;  %v912_v45 = vmul.f32 0.03125, %v899_v36 }
 0x8db   :  { %v930_v12 = vmul.f32 %v5215_v33, %v5215_v33  ;;  %v949_v16 = vsel %vm881_vm3, %v929_v51, 0.0 }
 0x8dc   :  { %v3239_v8 = vsel %vm881_vm3, %v5177_v15, 0.0  ;;  %v5187_v55 = vadd.f32 %v5009_v54, %v3208_v32  ;;  %v931_v54 = vsel %vm881_vm3, %v923_v11, 0.0  ;;  %v5203_v6 = vsub.f32 %v5015_v3, %v912_v45 }
 0x8dd   :  { %3240 = vadd.xlane.f32.xlu0 %v3239_v8  ;;  %v926_v20 = vmul.f32 %v5190_v17, %v5190_v17  ;;  %v952_v7 = vsel %vm881_vm3, %v930_v12, 0.0 }
 0x8de   :  { %v3242_v22 = vsel %vm881_vm3, %v5187_v55, 0.0  ;;  %v928_v27 = vmul.f32 %v5203_v6, %v5203_v6 }
 0x8df   :  { %3243 = vadd.xlane.f32.xlu1 %v3242_v22  ;;  %v940_v3 = vsel %vm881_vm3, %v926_v20, 0.0 }
 0x8e0   :  { %v946_v62 = vsel %vm881_vm3, %v928_v27, 0.0 }
 0x8e1   :  { %932 = vadd.xlane.f32.xlu0 %v931_v54 }
 0x8e3   :  { %935 = vadd.xlane.f32.xlu1 %v934_v50 }
 0x8e5   :  { %938 = vadd.xlane.f32.xlu0 %v937_v48 }
 0x8e7   :  { %941 = vadd.xlane.f32.xlu1 %v940_v3 }
 0x8e9   :  { %944 = vadd.xlane.f32.xlu0 %v943_v57 }
 0x8eb   :  { %947 = vadd.xlane.f32.xlu1 %v946_v62 }
 0x8ed   :  { %950 = vadd.xlane.f32.xlu0 %v949_v16 }
 0x8ef   :  { %953 = vadd.xlane.f32.xlu1 %v952_v7 }
 0x952   :  { %v3223_v46 = vpop.xlane.xlu0 %3222 }
 0x953   :  { %v3245_v49 = vmul.f32 0.03125, %v3223_v46 }
 0x954   :  { %v3226_v42 = vpop.xlane.xlu1 %3225 }
 0x955   :  { %v5229_v18 = vsub.f32 %v5141_v13, %v3245_v49  ;;  %v3246_v31 = vmul.f32 0.03125, %v3226_v42 }
 0x957   :  { %v5232_v10 = vsub.f32 %v5146_v5, %v3246_v31  ;;  %v3261_v56 = vmul.f32 %v5229_v18, %v5229_v18 }
 0x959   :  { %v3269_v59 = vsel %vm881_vm3, %v3261_v56, 0.0  ;;  %v3262_v63 = vmul.f32 %v5232_v10, %v5232_v10 }
 0x95a   :  { %3270 = vadd.xlane.f32.xlu0 %v3269_v59  ;;  %v3229_v25 = vpop.xlane.xlu0 %3228 }
 0x95b   :  { %v3247_v35 = vmul.f32 0.03125, %v3229_v25  ;;  %v3272_v41 = vsel %vm881_vm3, %v3262_v63, 0.0 }
 0x95c   :  { %3273 = vadd.xlane.f32.xlu1 %v3272_v41  ;;  %v3232_v13 = vpop.xlane.xlu1 %3231 }
 0x95d   :  { %v5241_v34 = vsub.f32 %v5151_v21, %v3247_v35  ;;  %v3248_v5 = vmul.f32 0.03125, %v3232_v13 }
 0x95f   :  { %v5244_v19 = vsub.f32 %v5156_v43, %v3248_v5  ;;  %v3263_v52 = vmul.f32 %v5241_v34, %v5241_v34 }
 0x961   :  { %v3275_v60 = vsel %vm881_vm3, %v3263_v52, 0.0  ;;  %v3264_v39 = vmul.f32 %v5244_v19, %v5244_v19 }
 0x962   :  { %3276 = vadd.xlane.f32.xlu0 %v3275_v60  ;;  %v3235_v23 = vpop.xlane.xlu0 %3234 }
 0x963   :  { %v3249_v2 = vmul.f32 0.03125, %v3235_v23  ;;  %v3278_v47 = vsel %vm881_vm3, %v3264_v39, 0.0 }
 0x964   :  { %3279 = vadd.xlane.f32.xlu1 %v3278_v47  ;;  %v3238_v21 = vpop.xlane.xlu1 %3237 }
 0x965   :  { %v5253_v58 = vsub.f32 %v5161_v26, %v3249_v2  ;;  %v3250_v43 = vmul.f32 0.03125, %v3238_v21  ;;  %v5277_v2 = vld [vmem:[#allocation8] ss:$0 sm:$0xff] }
 0x967   :  { %v5256_v36 = vsub.f32 %v5166_v28, %v3250_v43  ;;  %v3265_v9 = vmul.f32 %v5253_v58, %v5253_v58 }
 0x969   :  { %v3281_v32 = vsel %vm881_vm3, %v3265_v9, 0.0  ;;  %v3266_v11 = vmul.f32 %v5256_v36, %v5256_v36 }
 0x96a   :  { %3282 = vadd.xlane.f32.xlu0 %v3281_v32  ;;  %v3241_v14 = vpop.xlane.xlu0 %3240 }
 0x96b   :  { %v3251_v8 = vmul.f32 0.03125, %v3241_v14  ;;  %v3284_v38 = vsel %vm881_vm3, %v3266_v11, 0.0 }
 0x96c   :  { %3285 = vadd.xlane.f32.xlu1 %v3284_v38  ;;  %v3244_v26 = vpop.xlane.xlu1 %3243 }
 0x96d   :  { %v5265_v45 = vsub.f32 %v5177_v15, %v3251_v8  ;;  %v3252_v28 = vmul.f32 0.03125, %v3244_v26  ;;  %v5281_v26 = vld [vmem:[#allocation9] ss:$0 sm:$0xff] }
 0x96e   :  { %v933_v24 = vpop.xlane.xlu0 %932 }
 0x96f   :  { %v5268_v22 = vsub.f32 %v5187_v55, %v3252_v28  ;;  %v3267_v4 = vmul.f32 %v5265_v45, %v5265_v45  ;;  %v955_v20 = vmul.f32 0.03125, %v933_v24 }
 0x970   :  { %v936_v29 = vpop.xlane.xlu1 %935 }
 0x971   :  { %v3287_v0 = vsel %vm881_vm3, %v3267_v4, 0.0  ;;  %v3268_v53 = vmul.f32 %v5268_v22, %v5268_v22  ;;  %v956_v48 = vmul.f32 0.03125, %v936_v29  ;;  %v963_v3 = vadd.f32 1e-12, %v955_v20  ;;  %v5293_v29 = vld [vmem:[%s5370_s12] ss:$0 sm:$0xff] }
 0x972   :  { %3288 = vadd.xlane.f32.xlu0 %v3287_v0  ;;  %v939_v15 = vpop.xlane.xlu0 %938 }
 0x973   :  { %v3290_v54 = vsel %vm881_vm3, %v3268_v53, 0.0  ;;  %v964_v27 = vadd.f32 1e-12, %v956_v48  ;;  %v957_v57 = vmul.f32 0.03125, %v939_v15  ;;  %4016 = vrsqrt.f32 %v963_v3 }
 0x974   :  { %3291 = vadd.xlane.f32.xlu1 %v3290_v54  ;;  %v942_v50 = vpop.xlane.xlu1 %941 }
 0x975   :  { %4018 = vrsqrt.f32 %v964_v27  ;;  %v958_v62 = vmul.f32 0.03125, %v942_v50  ;;  %v965_v16 = vadd.f32 1e-12, %v957_v57 }
 0x976   :  { %v945_v55 = vpop.xlane.xlu0 %944 }
 0x977   :  { %v966_v49 = vadd.f32 1e-12, %v958_v62  ;;  %4020 = vrsqrt.f32 %v965_v16  ;;  %v959_v59 = vmul.f32 0.03125, %v945_v55 }
 0x978   :  { %v948_v40 = vpop.xlane.xlu1 %947 }
 0x979   :  { %v960_v25 = vmul.f32 0.03125, %v948_v40  ;;  %v967_v13 = vadd.f32 1e-12, %v959_v59 }
 0x97a   :  { %v951_v51 = vpop.xlane.xlu0 %950 }
 0x97b   :  { %v968_v39 = vadd.f32 1e-12, %v960_v25  ;;  %v961_v21 = vmul.f32 0.03125, %v951_v51 }
 0x97c   :  { %v954_v12 = vpop.xlane.xlu1 %953 }
 0x97d   :  { %v4017_v35 = vpop.eup %4016  ;;  %v962_v32 = vmul.f32 0.03125, %v954_v12  ;;  %v969_v28 = vadd.f32 1e-12, %v961_v21 }
 0x97e   :  { %v979_v60 = vmul.f32 %v4017_v35, %v5171_v37 }
 0x97f   :  { %v4019_v41 = vpop.eup %4018  ;;  %v970_v0 = vadd.f32 1e-12, %v962_v32 }
 0x980   :  { %v980_v47 = vmul.f32 %v4019_v41, %v5174_v44  ;;  %v993_v8 = vmul.f32 %v5277_v2, %v979_v60  ;;  %v5287_v44 = vld [vmem:[%s5369_s11] ss:$0 sm:$0xff]  ;;  %s4204_s11 = smov [#allocation12]  }
 0x981   :  { %v4021_v14 = vpop.eup %4020  ;;  %s3390_s12 = sshll.u32 %s4204_s11, 4  ;;  %s3391_s12 = int_to_ptr.vmem [resolvable:$true] %s3390_s12 }
 0x982   :  { %v994_v37 = vmul.f32 %v5277_v2, %v980_v47  ;;  %v1007_v50 = vadd.f32 %v5281_v26, %v993_v8  ;;  %v981_v20 = vmul.f32 %v4021_v14, %v5182_v30  ;;  %s4166_s19 = scalar_lea.vmem %s3391_s12, 1024  ;;  %p4171_p13 = scmp.lt.s32.totalorder %s3391_s12, %s3391_s12 }
 0x983   :  { %p4167_p12 = scmp.ne.s32.totalorder %s3391_s12, %s4166_s19  ;;  %p4172_p0 = scmp.lt.s32.totalorder %s4166_s19, %s4166_s19 }
 0x984   :  { %v1008_v3 = vadd.f32 %v5281_v26, %v994_v37  ;;  %v3353_v16 = vmul.f32 0.7, %v1007_v50 }
 0x985   :  { %p4173_p1 = por %p4172_p0, %p4171_p13 }
 0x987   :  { %p4174_p2 = pnand %p4173_p1, %p4167_p12 }
 0x9e7   :  { %v3271_v7 = vpop.xlane.xlu0 %3270 }
 0x9e8   :  { %v3293_v46 = vmul.f32 0.03125, %v3271_v7  ;;  %v995_v7 = vmul.f32 %v5277_v2, %v981_v20 }
 0x9e9   :  { %v3274_v42 = vpop.xlane.xlu1 %3273 }
 0x9ea   :  { %v3301_v31 = vadd.f32 1e-12, %v3293_v46  ;;  %v3294_v56 = vmul.f32 0.03125, %v3274_v42  ;;  %v3354_v42 = vmul.f32 0.7, %v1008_v3 }
 0x9ec   :  { %4022 = vrsqrt.f32 %v3301_v31  ;;  %v3302_v63 = vadd.f32 1e-12, %v3294_v56 }
 0x9ed   :  { %4024 = vrsqrt.f32 %v966_v49 }
 0x9ee   :  { %4026 = vrsqrt.f32 %v3302_v63 }
 0x9ef   :  { %v3277_v5 = vpop.xlane.xlu0 %3276  ;;  %4028 = vrsqrt.f32 %v967_v13 }
 0x9f0   :  { %v3295_v52 = vmul.f32 0.03125, %v3277_v5  ;;  %v1009_v5 = vadd.f32 %v5281_v26, %v995_v7 }
 0x9f1   :  { %v3280_v23 = vpop.xlane.xlu1 %3279 }
 0x9f2   :  { %v3303_v43 = vadd.f32 1e-12, %v3295_v52  ;;  %v3296_v9 = vmul.f32 0.03125, %v3280_v23 }
 0x9f4   :  { %4030 = vrsqrt.f32 %v3303_v43  ;;  %v3304_v11 = vadd.f32 1e-12, %v3296_v9 }
 0x9f5   :  { %4032 = vrsqrt.f32 %v968_v39 }
 0x9f6   :  { %v4023_v38 = vpop.eup %4022  ;;  %4034 = vrsqrt.f32 %v3304_v11 }
 0x9f7   :  { %v4025_v4 = vpop.eup %4024  ;;  %v3317_v53 = vmul.f32 %v4023_v38, %v5229_v18  ;;  %v3283_v54 = vpop.xlane.xlu0 %3282  ;;  %4036 = vrsqrt.f32 %v969_v28 }
 0x9f8   :  { %v4027_v24 = vpop.eup %4026  ;;  %v3297_v15 = vmul.f32 0.03125, %v3283_v54  ;;  %v982_v57 = vmul.f32 %v4025_v4, %v5190_v17  ;;  %4038 = vrsqrt.f32 %v970_v0 }
 0x9f9   :  { %v3331_v48 = vmul.f32 %v5287_v44, %v3317_v53  ;;  %v3318_v55 = vmul.f32 %v4027_v24, %v5232_v10  ;;  %v3286_v40 = vpop.xlane.xlu1 %3285  ;;  %v4029_v30 = vpop.eup %4028 }
 0x9fa   :  { %v3305_v18 = vadd.f32 1e-12, %v3297_v15  ;;  %v3298_v27 = vmul.f32 0.03125, %v3286_v40  ;;  %v996_v17 = vmul.f32 %v5277_v2, %v982_v57  ;;  %v983_v41 = vmul.f32 %v4029_v30, %v5197_v61 }
 0x9fb   :  { %v3345_v51 = vadd.f32 %v5293_v29, %v3331_v48  ;;  %v3332_v62 = vmul.f32 %v5287_v44, %v3318_v55 }
 0x9fc   :  { %4040 = vrsqrt.f32 %v3305_v18  ;;  %v3306_v12 = vadd.f32 1e-12, %v3298_v27  ;;  %v997_v11 = vmul.f32 %v5277_v2, %v983_v41 }
 0x9fd   :  { %v3361_v10 = vmul.f32 0.3, %v3345_v51  ;;  %v3346_v46 = vadd.f32 %v5293_v29, %v3332_v62 }
 0x9fe   :  { %v4031_v49 = vpop.eup %4030  ;;  %4042 = vrsqrt.f32 %v3306_v12  ;;  %v1011_v15 = vadd.f32 %v5281_v26, %v997_v11 }
 0x9ff   :  { %v4033_v31 = vpop.eup %4032  ;;  %v3369_v56 = vadd.f32 %v3361_v10, %v3353_v16  ;;  %v3362_v59 = vmul.f32 0.3, %v3346_v46  ;;  %v3319_v63 = vmul.f32 %v4031_v49, %v5241_v34  ;;  %v3289_v25 = vpop.xlane.xlu0 %3288  ;;  %v1010_v34 = vadd.f32 %v5281_v26, %v996_v17 }
 0xa00   :  { %v4035_v35 = vpop.eup %4034  ;;  %v3299_v13 = vmul.f32 0.03125, %v3289_v25  ;;  %v984_v47 = vmul.f32 %v4033_v31, %v5203_v6  ;;  %v3357_v27 = vmul.f32 0.7, %v1011_v15 }
 0xa01   :  { %3377 = vst.msk [vmem:[#allocation12] sm:$0xff] %vm881_vm3, %v3369_v56  ;;  %v3370_v52 = vadd.f32 %v3362_v59, %v3354_v42  ;;  %v3333_v60 = vmul.f32 %v5287_v44, %v3319_v63  ;;  %v3320_v39 = vmul.f32 %v4035_v35, %v5244_v19  ;;  %v3292_v23 = vpop.xlane.xlu1 %3291  ;;  %v4037_v32 = vpop.eup %4036  ;;  %v3355_v19 = vmul.f32 0.7, %v1009_v5 }
 0xa02   :  { %v3307_v21 = vadd.f32 1e-12, %v3299_v13  ;;  %v3300_v43 = vmul.f32 0.03125, %v3292_v23  ;;  %v4039_v8 = vpop.eup %4038  ;;  %v998_v28 = vmul.f32 %v5277_v2, %v984_v47  ;;  %v3356_v4 = vmul.f32 0.7, %v1010_v34 }
 0xa03   :  { %3378 = vst.msk [vmem:[#allocation12 + $0x8] sm:$0xff] %vm881_vm3, %v3370_v52  ;;  %v3347_v61 = vadd.f32 %v5293_v29, %v3333_v60  ;;  %v3334_v9 = vmul.f32 %v5287_v44, %v3320_v39  ;;  %v985_v50 = vmul.f32 %v4037_v32, %v5209_v1  ;;  %v986_v3 = vmul.f32 %v4039_v8, %v5215_v33 }
 0xa04   :  { %4044 = vrsqrt.f32 %v3307_v21  ;;  %v3308_v14 = vadd.f32 1e-12, %v3300_v43  ;;  %v1012_v40 = vadd.f32 %v5281_v26, %v998_v28 }
 0xa05   :  { %v3363_v38 = vmul.f32 0.3, %v3347_v61  ;;  %v3348_v6 = vadd.f32 %v5293_v29, %v3334_v9  ;;  %v999_v1 = vmul.f32 %v5277_v2, %v985_v50 }
 0xa06   :  { %v4041_v37 = vpop.eup %4040  ;;  %4046 = vrsqrt.f32 %v3308_v14  ;;  %v3358_v12 = vmul.f32 0.7, %v1012_v40 }
 0xa07   :  { %v3371_v0 = vadd.f32 %v3363_v38, %v3355_v19  ;;  %v3364_v53 = vmul.f32 0.3, %v3348_v6  ;;  %v3321_v54 = vmul.f32 %v4041_v37, %v5253_v58  ;;  %v1013_v10 = vadd.f32 %v5281_v26, %v999_v1 }
 0xa08   :  { %v4043_v24 = vpop.eup %4042 }
 0xa09   :  { %3379 = vst.msk [vmem:[#allocation12 + $0x10] sm:$0xff] %vm881_vm3, %v3371_v0  ;;  %v3372_v20 = vadd.f32 %v3364_v53, %v3356_v4  ;;  %v3335_v48 = vmul.f32 %v5287_v44, %v3321_v54  ;;  %v3322_v55 = vmul.f32 %v4043_v24, %v5256_v36  ;;  %v1000_v36 = vmul.f32 %v5277_v2, %v986_v3 }
 0xa0a   :  { %v3359_v56 = vmul.f32 0.7, %v1013_v10 }
 0xa0b   :  { %3380 = vst.msk [vmem:[#allocation12 + $0x18] sm:$0xff] %vm881_vm3, %v3372_v20  ;;  %v3349_v58 = vadd.f32 %v5293_v29, %v3335_v48  ;;  %v3336_v18 = vmul.f32 %v5287_v44, %v3322_v55  ;;  %v1014_v31 = vadd.f32 %v5281_v26, %v1000_v36 }
 0xa0d   :  { %v3365_v57 = vmul.f32 0.3, %v3349_v58  ;;  %v3350_v51 = vadd.f32 %v5293_v29, %v3336_v18  ;;  %v3360_v63 = vmul.f32 0.7, %v1014_v31 }
 0xa0e   :  { %v4045_v62 = vpop.eup %4044 }
 0xa0f   :  { %v3373_v30 = vadd.f32 %v3365_v57, %v3357_v27  ;;  %v3366_v16 = vmul.f32 0.3, %v3350_v51  ;;  %v3323_v33 = vmul.f32 %v4045_v62, %v5265_v45 }
 0xa10   :  { %v4047_v7 = vpop.eup %4046 }
 0xa11   :  { %3381 = vst.msk [vmem:[#allocation12 + $0x20] sm:$0xff] %vm881_vm3, %v3373_v30  ;;  %v3374_v46 = vadd.f32 %v3366_v16, %v3358_v12  ;;  %v3337_v49 = vmul.f32 %v5287_v44, %v3323_v33  ;;  %v3324_v42 = vmul.f32 %v4047_v7, %v5268_v22 }
 0xa13   :  { %3382 = vst.msk [vmem:[#allocation12 + $0x28] sm:$0xff] %vm881_vm3, %v3374_v46  ;;  %v3351_v2 = vadd.f32 %v5293_v29, %v3337_v49  ;;  %v3338_v17 = vmul.f32 %v5287_v44, %v3324_v42 }
 0xa15   :  { %v3367_v45 = vmul.f32 0.3, %v3351_v2  ;;  %v3352_v59 = vadd.f32 %v5293_v29, %v3338_v17 }
 0xa17   :  { %v3375_v25 = vadd.f32 %v3367_v45, %v3359_v56  ;;  %v3368_v35 = vmul.f32 0.3, %v3352_v59 }
 0xa19   :  { %3383 = vst.msk [vmem:[#allocation12 + $0x30] sm:$0xff] %vm881_vm3, %v3375_v25  ;;  %v3376_v22 = vadd.f32 %v3368_v35, %v3360_v63 }
 0xa1b   :  { %3384 = vst.msk [vmem:[#allocation12 + $0x38] sm:$0xff] %vm881_vm3, %v3376_v22 }
 0xa1c   :  { %4177 = shalt.err (!%p4174_p2)
}
 0xa1d   :  { %s4178_s15 = scalar_lea.hbm %s5371_s13, 1024 }
 0xa1e   :  { %p4179_p3 = scmp.ne.s32.totalorder %s5371_s13, %s4178_s15  ;;  %p4182_p4 = scmp.lt.u32.totalorder %s4178_s15, %s5371_s13 }
 0xa20   :  { %p4184_p5 = pnand %p4182_p4, %p4179_p3 }
 0xa22   :  { %4187 = shalt.err (!%p4184_p5)
}
 0xa23   :  { %s4205_s18 = smov 128   ;;  %s4206_s20 = smov 8  }
 0xa24   :  { %3396 = dma.vmem_to_hbm [thread:$0]  %s3391_s12, 1024, %s5371_s13, [#allocation5], %s4205_s18, %s4205_s18, %s4206_s20  }
 0xa25   :  { %4194 = dma.done.wait [#allocation5], 1024  }
 0xa26   :  { %4195 = vsyncadd [#allocation5], 4294966272 }
 0xa27   :  { %3400 = vsyncpa [#allocation4], 1 }
 0xa28   :  { %3401 = vsyncpa [#allocation7], 1 }
 0xa29   :  { %3402 = vsyncpa [#allocation10], 1 }
 0xa2a   :  { %3403 = vsyncpa [#allocation5], 1 }

// kernel: tpu_custom_call.1
= control target key start
LH: loop header
LB: loop body
LE: loop exit
PB: predicated region body
PF: predicated region fallthrough
CT: control target
= control target key end

     0   :  { %18 = vsyncpa [#allocation4], 0  ;;  %s5358_s0 = inlined_call_operand.vmem [shape: f32[8,8,32], index: 0, kind: input, shape index: {}]   ;;  %s5359_s1 = inlined_call_operand.hbm [shape: f32[1,8,8], index: 1, kind: input, shape index: {}]   ;;  %s5360_s2 = inlined_call_operand.hbm [shape: bf16[8,8], index: 2, kind: input, shape index: {}]   ;;  %s5361_s3 = inlined_call_operand.vmem [shape: f32[1,32], index: 3, kind: input, shape index: {}]   ;;  %s5362_s4 = inlined_call_operand.vmem [shape: f32[1,32], index: 4, kind: input, shape index: {}]   ;;  %s5363_s5 = inlined_call_operand.hbm [shape: f32[1,32], index: 5, kind: input, shape index: {}]   ;;  %s5364_s6 = inlined_call_operand.hbm [shape: f32[1,32], index: 6, kind: input, shape index: {}]   ;;  %s5365_s7 = inlined_call_operand.vmem [shape: bf16[32,768], index: 7, kind: input, shape index: {}]   ;;  %s5366_s8 = inlined_call_operand.hbm [shape: f32[1,768], index: 8, kind: input, shape index: {}]   ;;  %s5367_s9 = inlined_call_operand.vmem [shape: bf16[256,32], index: 9, kind: input, shape index: {}]   ;;  %s5368_s10 = inlined_call_operand.vmem [shape: f32[1,32], index: 10, kind: input, shape index: {}]   ;;  %s5369_s11 = inlined_call_operand.vmem [shape: f32[1,32], index: 11, kind: input, shape index: {}]   ;;  %s5370_s12 = inlined_call_operand.vmem [shape: f32[1,32], index: 12, kind: input, shape index: {}]   ;;  %s5371_s13 = inlined_call_operand.hbm [shape: f32[8,8,32], index: 13, kind: output, shape index: {}]  }
   0x1   :  { %19 = vsyncpa [#allocation7], 0 }
   0x2   :  { %20 = vsyncpa [#allocation10], 0 }
   0x3   :  { %21 = vsyncpa [#allocation5], 0  ;;  %s4196_s25 = smov [#allocation6]   ;;  %s4197_s27 = smov [#allocation9]  }
   0x4   :  { %s40_s26 = sshll.u32 %s4196_s25, 4  ;;  %s64_s28 = sshll.u32 %s4197_s27, 4  ;;  %s41_s26 = int_to_ptr.vmem [resolvable:$true] %s40_s26  ;;  %s65_s28 = int_to_ptr.vmem [resolvable:$true] %s64_s28 }
   0x5   :  { %s4056_s14 = scalar_lea.hbm %s5360_s2, 64 }
   0x6   :  { %p4057_p0 = scmp.ne.s32.totalorder %s5360_s2, %s4056_s14  ;;  %p4060_p1 = scmp.lt.u32.totalorder %s4056_s14, %s5360_s2 }
   0x8   :  { %p4062_p2 = pnand %p4060_p1, %p4057_p0 }
   0xa   :  { %4065 = shalt.err (!%p4062_p2)
}
   0xb   :  { %s4066_s19 = scalar_lea.vmem %s41_s26, 64  ;;  %p4071_p4 = scmp.lt.s32.totalorder %s41_s26, %s41_s26 }
   0xc   :  { %p4067_p3 = scmp.ne.s32.totalorder %s41_s26, %s4066_s19  ;;  %p4072_p5 = scmp.lt.s32.totalorder %s4066_s19, %s4066_s19 }
   0xe   :  { %p4073_p6 = por %p4072_p5, %p4071_p4 }
  0x10   :  { %p4074_p7 = pnand %p4073_p6, %p4067_p3 }
  0x12   :  { %4077 = shalt.err (!%p4074_p7)
}
  0x13   :  { %43 = dma.hbm_to_vmem [thread:$0]  %s5360_s2, 64, %s41_s26, [#allocation7]  }
  0x14   :  { %s4078_s24 = scalar_lea.hbm %s5364_s6, 16 }
  0x15   :  { %p4079_p8 = scmp.ne.s32.totalorder %s5364_s6, %s4078_s24  ;;  %p4082_p9 = scmp.lt.u32.totalorder %s4078_s24, %s5364_s6 }
  0x17   :  { %p4084_p10 = pnand %p4082_p9, %p4079_p8 }
  0x19   :  { %4087 = shalt.err (!%p4084_p10)
}
  0x1a   :  { %s4088_s14 = scalar_lea.vmem %s65_s28, 16  ;;  %s4092_s15 = scalar_lea.vmem %s65_s28, 32 }
  0x1b   :  { %p4089_p11 = scmp.ne.s32.totalorder %s65_s28, %s4088_s14  ;;  %p4093_p12 = scmp.lt.s32.totalorder %s65_s28, %s65_s28 }
  0x1c   :  { %p4094_p13 = scmp.lt.s32.totalorder %s4092_s15, %s4088_s14 }
  0x1e   :  { %p4095_p0 = por %p4094_p13, %p4093_p12 }
  0x20   :  { %p4096_p1 = pnand %p4095_p0, %p4089_p11 }
  0x22   :  { %4099 = shalt.err (!%p4096_p1)
}
  0x23   :  { %67 = dma.hbm_to_vmem [thread:$0]  %s5364_s6, 16, %s65_s28, [#allocation10]  }
  0x24   :  { %s4198_s16 = smov [#allocation3]   ;;  %s4199_s18 = smov [#allocation8]  }
  0x25   :  { %s30_s17 = sshll.u32 %s4198_s16, 4  ;;  %s54_s19 = sshll.u32 %s4199_s18, 4  ;;  %s31_s17 = int_to_ptr.vmem [resolvable:$true] %s30_s17  ;;  %s55_s19 = int_to_ptr.vmem [resolvable:$true] %s54_s19 }
  0x26   :  { %s4100_s22 = scalar_lea.hbm %s5359_s1, 128 }
  0x27   :  { %p4101_p2 = scmp.ne.s32.totalorder %s5359_s1, %s4100_s22  ;;  %p4104_p3 = scmp.lt.u32.totalorder %s4100_s22, %s5359_s1 }
  0x29   :  { %p4106_p4 = pnand %p4104_p3, %p4101_p2 }
  0x2b   :  { %4109 = shalt.err (!%p4106_p4)
}
  0x2c   :  { %s4110_s6 = scalar_lea.vmem %s31_s17, 128  ;;  %p4115_p6 = scmp.lt.s32.totalorder %s31_s17, %s31_s17 }
  0x2d   :  { %p4111_p5 = scmp.ne.s32.totalorder %s31_s17, %s4110_s6  ;;  %p4116_p7 = scmp.lt.s32.totalorder %s4110_s6, %s4110_s6 }
  0x2f   :  { %p4117_p8 = por %p4116_p7, %p4115_p6 }
  0x31   :  { %p4118_p9 = pnand %p4117_p8, %p4111_p5 }
  0x33   :  { %4121 = shalt.err (!%p4118_p9)
}
  0x34   :  { %33 = dma.hbm_to_vmem [thread:$0]  %s5359_s1, 128, %s31_s17, [#allocation4]  }
  0x35   :  { %s4122_s15 = scalar_lea.hbm %s5363_s5, 16 }
  0x36   :  { %p4123_p10 = scmp.ne.s32.totalorder %s5363_s5, %s4122_s15  ;;  %p4126_p11 = scmp.lt.u32.totalorder %s4122_s15, %s5363_s5 }
  0x38   :  { %p4128_p12 = pnand %p4126_p11, %p4123_p10 }
  0x3a   :  { %4131 = shalt.err (!%p4128_p12)
}
  0x3b   :  { %s4132_s20 = scalar_lea.vmem %s55_s19, 16  ;;  %s4136_s21 = scalar_lea.vmem %s55_s19, 32 }
  0x3c   :  { %p4133_p13 = scmp.ne.s32.totalorder %s55_s19, %s4132_s20  ;;  %p4137_p0 = scmp.lt.s32.totalorder %s55_s19, %s55_s19 }
  0x3d   :  { %p4138_p1 = scmp.lt.s32.totalorder %s4136_s21, %s4132_s20 }
  0x3f   :  { %p4139_p2 = por %p4138_p1, %p4137_p0 }
  0x41   :  { %p4140_p3 = pnand %p4139_p2, %p4133_p13 }
  0x43   :  { %4143 = shalt.err (!%p4140_p3)
}
  0x44   :  { %57 = dma.hbm_to_vmem [thread:$0]  %s5363_s5, 16, %s55_s19, [#allocation7]  }
  0x45   :  { %s4200_s22 = smov [#allocation11]   ;;  %s4144_s27 = scalar_lea.hbm %s5366_s8, 96 }
  0x46   :  { %s76_s23 = sshll.u32 %s4200_s22, 4  ;;  %p4145_p4 = scmp.ne.s32.totalorder %s5366_s8, %s4144_s27  ;;  %s77_s23 = int_to_ptr.vmem [resolvable:$true] %s76_s23 }
  0x47   :  { %p4148_p5 = scmp.lt.u32.totalorder %s4144_s27, %s5366_s8 }
  0x49   :  { %p4150_p6 = pnand %p4148_p5, %p4145_p4 }
  0x4b   :  { %4153 = shalt.err (!%p4150_p6)
}
  0x4c   :  { %s4154_s14 = scalar_lea.vmem %s77_s23, 96  ;;  %p4159_p8 = scmp.lt.s32.totalorder %s77_s23, %s77_s23 }
  0x4d   :  { %p4155_p7 = scmp.ne.s32.totalorder %s77_s23, %s4154_s14  ;;  %p4160_p9 = scmp.lt.s32.totalorder %s4154_s14, %s4154_s14 }
  0x4f   :  { %p4161_p10 = por %p4160_p9, %p4159_p8 }
  0x51   :  { %p4162_p11 = pnand %p4161_p10, %p4155_p7 }
  0x53   :  { %4165 = shalt.err (!%p4162_p11)
}
  0x54   :  { %79 = dma.hbm_to_vmem [thread:$0]  %s5366_s8, 96, %s77_s23, [#allocation10]  }
  0x55   :  { %4188 = dma.done.wait [#allocation4], 128  }
  0x56   :  { %4189 = vsyncadd [#allocation4], 4294967168 }
  0x57   :  { %4190 = dma.done.wait [#allocation7], 80  }
  0x58   :  { %4191 = vsyncadd [#allocation7], 4294967216 }
  0x59   :  { %4192 = dma.done.wait [#allocation10], 112  }
  0x5a   :  { %4193 = vsyncadd [#allocation10], 4294967184  ;;  %v5372_v0 = vmov 0.0   ;;  %vm4202_vm0 = vmmov 0   ;;  %v4343_v1 = vld [vmem:[#allocation6] sm:$0xf] }
  0x5b   :  { %3619 = vmatprep.subr.bf16.mxu0 %v5372_v0  ;;  %3625 = vmatprep.subr.bf16.mxu1 %v5372_v0  ;;  %v4348_v2 = vld [vmem:[%s5358_s0] sm:$0xff]  ;;  %vm141_vm1 = vcmask 1043456   ;;  %v4353_v3 = vld [vmem:[%s5358_s0 + $0x8] sm:$0xff]  ;;  %v4367_v8 = vld [vmem:[%s5358_s0 + $0x10] sm:$0xff]  ;;  %vm137_vm2 = vcmask 64512   ;;  %vm881_vm3 = vcmask 261120  }
  0x5c   :  { %3621 = vmatprep.mubr.msk.bf16.mxu0 %vm4202_vm0, %v5372_v0  ;;  %3627 = vmatprep.mubr.msk.bf16.mxu1 %vm4202_vm0, %v5372_v0  ;;  %v112_v4 = vpack.c.bf16 %v4348_v2, %v4348_v2  ;;  %v113_v5 = vpack.c.bf16 %v4353_v3, %v4353_v3  ;;  %v4372_v9 = vld [vmem:[%s5358_s0 + $0x18] sm:$0xff]  ;;  %v114_v10 = vpack.c.bf16 %v4367_v8, %v4367_v8  ;;  %v4383_v15 = vld [vmem:[%s5358_s0 + $0x20] sm:$0xff]  ;;  %v4388_v16 = vld [vmem:[%s5358_s0 + $0x28] sm:$0xff] }
  0x5d   :  { %121 = vxpose.xlu0.c.b16.start.end [1/1] (short) (narrow) %v4343_v1, 16  ;;  %v115_v11 = vpack.c.bf16 %v4372_v9, %v4372_v9  ;;  %v116_v17 = vpack.c.bf16 %v4383_v15, %v4383_v15  ;;  %v117_v18 = vpack.c.bf16 %v4388_v16, %v4388_v16  ;;  %v4407_v21 = vld [vmem:[%s5358_s0 + $0x30] sm:$0xff]  ;;  %v4412_v22 = vld [vmem:[%s5358_s0 + $0x38] sm:$0xff] }
  0x5e   :  { %v143_v6 = vsel %vm141_vm1, %v112_v4, 0  ;;  %v186_v7 = vsel %vm141_vm1, %v113_v5, 0  ;;  %v229_v12 = vsel %vm141_vm1, %v114_v10, 0  ;;  %v118_v23 = vpack.c.bf16 %v4407_v21, %v4407_v21 }
  0x5f   :  { %3620 = vmatpush3.bf16.msra.mxu0 %v143_v6  ;;  %3626 = vmatpush3.bf16.msra.mxu1 %v186_v7  ;;  %v272_v13 = vsel %vm141_vm1, %v115_v11, 0  ;;  %v315_v19 = vsel %vm141_vm1, %v116_v17, 0  ;;  %v358_v20 = vsel %vm141_vm1, %v117_v18, 0  ;;  %v119_v24 = vpack.c.bf16 %v4412_v22, %v4412_v22  ;;  %v3920_v11 = vld [vmem:[%s5365_s7 + $0x4] ss:$24 sps:$4 sm:$0xff]  }
  0x60   :  { %3631 = vmatprep.subr.bf16.mxu0 %v5372_v0  ;;  %3637 = vmatprep.subr.bf16.mxu1 %v5372_v0  ;;  %v401_v25 = vsel %vm141_vm1, %v118_v23, 0  ;;  %v3923_v23 = vld [vmem:[%s5365_s7 + $0x34] ss:$24 sps:$4 sm:$0xff]  }
  0x61   :  { %v444_v26 = vsel %vm141_vm1, %v119_v24, 0  ;;  %v3921_v24 = vld [vmem:[%s5365_s7 + $0x30] ss:$24 sps:$4 sm:$0xff]  }
  0xc3   :  { %v129_v14 = vpop.trf.xlu0 }
  0xc4   :  { %3622 = vmatmul.mubr.msk.bf16.vlgmr.msra.gmra.mrb[0].mxu0 %vm137_vm2, %v129_v14  ;;  %3628 = vmatmul.mubr.msk.bf16.vlgmr.msra.gmra.mrb[0].mxu1 %vm137_vm2, %v129_v14 }
  0xc5   :  { %3632 = vmatpush3.bf16.msra.mxu0 %v229_v12  ;;  %3638 = vmatpush3.bf16.msra.mxu1 %v272_v13 }
  0xc6   :  { %3633 = vmatprep.mubr.msk.bf16.mxu0 %vm4202_vm0, %v5372_v0  ;;  %3639 = vmatprep.mubr.msk.bf16.mxu1 %vm4202_vm0, %v5372_v0 }
  0xc7   :  { %3643 = vmatprep.subr.bf16.mxu0 %v5372_v0  ;;  %3649 = vmatprep.subr.bf16.mxu1 %v5372_v0 }
  0xcc   :  { %3634 = vmatmul.mubr.msk.bf16.vlgmr.msra.gmra.mrb[4].mxu0 %vm137_vm2, %v129_v14  ;;  %3640 = vmatmul.mubr.msk.bf16.vlgmr.msra.gmra.mrb[4].mxu1 %vm137_vm2, %v129_v14 }
  0xcd   :  { %3644 = vmatpush3.bf16.msra.mxu0 %v315_v19  ;;  %3650 = vmatpush3.bf16.msra.mxu1 %v358_v20  ;;  %v3918_v20 = vld [vmem:[%s5365_s7] ss:$24 sps:$4 sm:$0xff]  }
  0xce   :  { %3645 = vmatprep.mubr.msk.bf16.mxu0 %vm4202_vm0, %v5372_v0  ;;  %3651 = vmatprep.mubr.msk.bf16.mxu1 %vm4202_vm0, %v5372_v0 }
  0xcf   :  { %3655 = vmatprep.subr.bf16.mxu0 %v5372_v0  ;;  %3661 = vmatprep.subr.bf16.mxu1 %v5372_v0 }
  0xd4   :  { %3646 = vmatmul.mubr.msk.bf16.vlgmr.msra.gmra.mrb[8].mxu0 %vm137_vm2, %v129_v14  ;;  %3652 = vmatmul.mubr.msk.bf16.vlgmr.msra.gmra.mrb[8].mxu1 %vm137_vm2, %v129_v14 }
  0xd5   :  { %3656 = vmatpush3.bf16.msra.mxu0 %v401_v25  ;;  %3662 = vmatpush3.bf16.msra.mxu1 %v444_v26  ;;  %v4203_v25 = vmov 0   ;;  %v3926_v26 = vld [vmem:[%s5365_s7 + $0xc] ss:$24 sps:$4 sm:$0xff]  }
  0xd6   :  { %3657 = vmatprep.mubr.msk.bf16.mxu0 %vm4202_vm0, %v5372_v0  ;;  %3663 = vmatprep.mubr.msk.bf16.mxu1 %vm4202_vm0, %v5372_v0 }
  0xd7   :  { %3667 = vmatprep.subr.bf16.mxu0 %v5372_v0  ;;  %3673 = vmatprep.subr.bf16.mxu1 %v5372_v0 }
  0xdc   :  { %3658 = vmatmul.mubr.msk.bf16.vlgmr.msra.gmra.mrb[12].mxu0 %vm137_vm2, %v129_v14  ;;  %3664 = vmatmul.mubr.msk.bf16.vlgmr.msra.gmra.mrb[12].mxu1 %vm137_vm2, %v129_v14 }
  0xdd   :  { %3675 = vmatprep.mubr.msk.bf16.mxu1 %vm4202_vm0, %v5372_v0  ;;  %3669 = vmatprep.mubr.msk.bf16.mxu0 %vm4202_vm0, %v5372_v0 }
 0x197   :  { %v179_v27 = vpop.f32.mrb[0].mxu0  ;;  %v222_v28 = vpop.f32.mrb[0].mxu1 }
 0x198   :  { %v486_v29 = vpack.c.bf16 %v179_v27, %v179_v27  ;;  %v487_v30 = vpack.c.bf16 %v222_v28, %v222_v28  ;;  %v3623_v31 = vpop.f32.mrb[1].mxu0  ;;  %v3629_v32 = vpop.f32.mrb[1].mxu1  ;;  %v1015_v27 = vpack.c.bf16 %v4353_v3, %v4348_v2  ;;  %v3929_v28 = vld [vmem:[%s5365_s7 + $0x3c] ss:$24 sps:$4 sm:$0xff]   ;;  %v1016_v2 = vpack.c.bf16 %v4372_v9, %v4367_v8  ;;  %v3930_v9 = vld [vmem:[%s5365_s7 + $0x10] ss:$24 sps:$4 sm:$0xff]  }
 0x199   :  { %v182_v33 = vpop.f32.mrb[2].mxu0  ;;  %v225_v34 = vpop.f32.mrb[2].mxu1  ;;  %v1017_v3 = vpack.c.bf16 %v4388_v16, %v4383_v15  ;;  %v3932_v8 = vld [vmem:[%s5365_s7 + $0x14] ss:$24 sps:$4 sm:$0xff]   ;;  %v3935_v15 = vld [vmem:[%s5365_s7 + $0x44] ss:$24 sps:$4 sm:$0xff]  }
 0x19a   :  { %v498_v35 = vsel %vm141_vm1, %v486_v29, 0  ;;  %v541_v36 = vsel %vm141_vm1, %v487_v30, 0  ;;  %v3624_v37 = vpop.f32.mrb[3].mxu0  ;;  %v3630_v38 = vpop.f32.mrb[3].mxu1  ;;  %v3927_v29 = vld [vmem:[%s5365_s7 + $0x38] ss:$24 sps:$4 sm:$0xff]   ;;  %v1018_v30 = vpack.c.bf16 %v4412_v22, %v4407_v21 }
 0x19b   :  { %3668 = vmatpush3.bf16.msra.mxu0 %v498_v35  ;;  %3674 = vmatpush3.bf16.msra.mxu1 %v541_v36  ;;  %v3933_v16 = vld [vmem:[%s5365_s7 + $0x40] ss:$24 sps:$4 sm:$0xff]  }
 0x19c   :  { %3679 = vmatprep.subr.bf16.mxu0 %v5372_v0  ;;  %3685 = vmatprep.subr.bf16.mxu1 %v5372_v0 }
 0x19e   :  { %3676 = vmatmul.mubr.msk.bf16.vlgmr.msra.gmra.mrb[16].mxu1 %vm137_vm2, %v4343_v1  ;;  %3670 = vmatmul.mubr.msk.bf16.vlgmr.msra.gmra.mrb[16].mxu0 %vm137_vm2, %v4343_v1 }
 0x19f   :  { %v265_v39 = vpop.f32.mrb[4].mxu0  ;;  %v308_v40 = vpop.f32.mrb[4].mxu1  ;;  %3687 = vmatprep.mubr.msk.bf16.mxu1 %vm4202_vm0, %v5372_v0  ;;  %3681 = vmatprep.mubr.msk.bf16.mxu0 %vm4202_vm0, %v5372_v0 }
 0x1a0   :  { %v488_v41 = vpack.c.bf16 %v265_v39, %v265_v39  ;;  %v489_v42 = vpack.c.bf16 %v308_v40, %v308_v40  ;;  %v3635_v43 = vpop.f32.mrb[5].mxu0  ;;  %v3641_v44 = vpop.f32.mrb[5].mxu1 }
 0x1a1   :  { %v268_v45 = vpop.f32.mrb[6].mxu0  ;;  %v311_v46 = vpop.f32.mrb[6].mxu1 }
 0x1a2   :  { %v584_v47 = vsel %vm141_vm1, %v488_v41, 0  ;;  %v627_v48 = vsel %vm141_vm1, %v489_v42, 0  ;;  %v3636_v49 = vpop.f32.mrb[7].mxu0  ;;  %v3642_v50 = vpop.f32.mrb[7].mxu1 }
 0x1a3   :  { %3680 = vmatpush3.bf16.msra.mxu0 %v584_v47  ;;  %3686 = vmatpush3.bf16.msra.mxu1 %v627_v48 }
 0x1a4   :  { %3691 = vmatprep.subr.bf16.mxu0 %v5372_v0  ;;  %3697 = vmatprep.subr.bf16.mxu1 %v5372_v0 }
 0x1a6   :  { %3688 = vmatmul.mubr.msk.bf16.vlgmr.msra.gmra.mrb[20].mxu1 %vm137_vm2, %v4343_v1  ;;  %3682 = vmatmul.mubr.msk.bf16.vlgmr.msra.gmra.mrb[20].mxu0 %vm137_vm2, %v4343_v1 }
 0x1a7   :  { %v351_v51 = vpop.f32.mrb[8].mxu0  ;;  %v394_v52 = vpop.f32.mrb[8].mxu1  ;;  %3699 = vmatprep.mubr.msk.bf16.mxu1 %vm4202_vm0, %v5372_v0  ;;  %3693 = vmatprep.mubr.msk.bf16.mxu0 %vm4202_vm0, %v5372_v0 }
 0x1a8   :  { %v490_v53 = vpack.c.bf16 %v351_v51, %v351_v51  ;;  %v491_v54 = vpack.c.bf16 %v394_v52, %v394_v52  ;;  %v3647_v55 = vpop.f32.mrb[9].mxu0  ;;  %v3653_v56 = vpop.f32.mrb[9].mxu1 }
 0x1a9   :  { %v354_v57 = vpop.f32.mrb[10].mxu0  ;;  %v397_v58 = vpop.f32.mrb[10].mxu1 }
 0x1aa   :  { %v670_v59 = vsel %vm141_vm1, %v490_v53, 0  ;;  %v713_v60 = vsel %vm141_vm1, %v491_v54, 0  ;;  %v3648_v61 = vpop.f32.mrb[11].mxu0  ;;  %v3654_v62 = vpop.f32.mrb[11].mxu1 }
 0x1ab   :  { %3692 = vmatpush3.bf16.msra.mxu0 %v670_v59  ;;  %3698 = vmatpush3.bf16.msra.mxu1 %v713_v60 }
 0x1ac   :  { %3703 = vmatprep.subr.bf16.mxu0 %v5372_v0  ;;  %3709 = vmatprep.subr.bf16.mxu1 %v5372_v0 }
 0x1ae   :  { %3700 = vmatmul.mubr.msk.bf16.vlgmr.msra.gmra.mrb[24].mxu1 %vm137_vm2, %v4343_v1  ;;  %3694 = vmatmul.mubr.msk.bf16.vlgmr.msra.gmra.mrb[24].mxu0 %vm137_vm2, %v4343_v1 }
 0x1af   :  { %v437_v63 = vpop.f32.mrb[12].mxu0  ;;  %v480_v4 = vpop.f32.mrb[12].mxu1  ;;  %3711 = vmatprep.mubr.msk.bf16.mxu1 %vm4202_vm0, %v5372_v0  ;;  %3705 = vmatprep.mubr.msk.bf16.mxu0 %vm4202_vm0, %v5372_v0 }
 0x1b0   :  { %v492_v5 = vpack.c.bf16 %v437_v63, %v437_v63  ;;  %v493_v6 = vpack.c.bf16 %v480_v4, %v480_v4  ;;  %v3659_v7 = vpop.f32.mrb[13].mxu0  ;;  %v3665_v10 = vpop.f32.mrb[13].mxu1 }
 0x1b1   :  { %v440_v12 = vpop.f32.mrb[14].mxu0  ;;  %v483_v13 = vpop.f32.mrb[14].mxu1 }
 0x1b2   :  { %v756_v14 = vsel %vm141_vm1, %v492_v5, 0  ;;  %v799_v17 = vsel %vm141_vm1, %v493_v6, 0  ;;  %v3660_v18 = vpop.f32.mrb[15].mxu0  ;;  %v3666_v19 = vpop.f32.mrb[15].mxu1 }
 0x1b3   :  { %3704 = vmatpush3.bf16.msra.mxu0 %v756_v14  ;;  %3710 = vmatpush3.bf16.msra.mxu1 %v799_v17  ;;  %v1033_v14 = vlaneseq }
 0x1b4   :  { %1135 = vmatprep.subr.bf16.mxu1 %v3920_v11  ;;  %1281 = vmatprep.subr.bf16.mxu0 %v3932_v8 }
 0x1b5   :  { %v4578_v18 = vshrl.u32 %v1033_v14, 7 }
 0x1b6   :  { %3712 = vmatmul.mubr.msk.bf16.vlgmr.msra.gmra.mrb[28].mxu1 %vm137_vm2, %v4343_v1  ;;  %3706 = vmatmul.mubr.msk.bf16.vlgmr.msra.gmra.mrb[28].mxu0 %vm137_vm2, %v4343_v1  ;;  %v3924_v1 = vld [vmem:[%s5365_s7 + $0x8] ss:$24 sps:$4 sm:$0xff]  }
 0x1b7   :  { %1136 = vmatpush1.bf16.msra.mxu1 %v3918_v20  ;;  %1167 = vmatprep.mubr.bf16.mxu1 %v4203_v25 }
 0x1b8   :  { %1137 = vmatprep.subr.bf16.mxu1 %v3923_v23  ;;  %1313 = vmatprep.mubr.bf16.mxu0 %v4203_v25  ;;  %v1043_v23 = vsub.s32 2, %v4578_v18 }
 0x1b9   :  { %1282 = vmatpush1.bf16.msra.mxu0 %v3930_v9 }
 0x1ba   :  { %1283 = vmatprep.subr.bf16.mxu0 %v3935_v15 }
 0x1bb   :  { %1138 = vmatpush1.bf16.msra.mxu1 %v3921_v24 }
 0x1bc   :  { %1208 = vmatprep.subr.bf16.mxu1 %v3926_v26  ;;  %v4587_v26 = vld [vmem:[#allocation11] sm:$0x3f] }
 0x1bd   :  { %1284 = vmatpush1.bf16.msra.mxu0 %v3933_v16 }
 0x1be   :  { %3436 = vmatmul.mubr.msk.bf16.vlgmr.msra.gmra.mrb[32].mxu1 %vm881_vm3, %v1015_v27  ;;  %3739 = vmatprep.subr.bf16.mxu0 %v5372_v0 }
 0x1bf   :  { %1177 = vmatprep.mubr.bf16.mxu1 %v4203_v25  ;;  %1209 = vmatpush1.bf16.msra.mxu1 %v3924_v1  ;;  %v1035_v1 = vsub.s32 0, %v4578_v18 }
 0x1c0   :  { %1210 = vmatprep.subr.bf16.mxu1 %v3929_v28  ;;  %3444 = vmatmul.mubr.msk.bf16.vlgmr.msra.gmra.mrb[32].mxu0 %vm881_vm3, %v1015_v27 }
 0x1c1   :  { %1323 = vmatprep.mubr.bf16.mxu0 %v4203_v25 }
 0x1c3   :  { %1211 = vmatpush1.bf16.msra.mxu1 %v3927_v29 }
 0x1c4   :  { %3715 = vmatprep.subr.bf16.mxu1 %v5372_v0 }
 0x1c6   :  { %3437 = vmatmul.mubr.msk.bf16.gmra.mrb[36].mxu1 %vm881_vm3, %v1016_v2 }
 0x1c7   :  { %1187 = vmatprep.mubr.bf16.mxu1 %v4203_v25 }
 0x1c8   :  { %3445 = vmatmul.mubr.msk.bf16.gmra.mrb[36].mxu0 %vm881_vm3, %v1016_v2 }
 0x1c9   :  { %1333 = vmatprep.mubr.bf16.mxu0 %v4203_v25 }
 0x1ce   :  { %3438 = vmatmul.mubr.msk.bf16.gmra.mrb[40].mxu1 %vm881_vm3, %v1017_v3 }
 0x1cf   :  { %1197 = vmatprep.mubr.bf16.mxu1 %v4203_v25 }
 0x1d0   :  { %3446 = vmatmul.mubr.msk.bf16.gmra.mrb[40].mxu0 %vm881_vm3, %v1017_v3 }
 0x1d1   :  { %1343 = vmatprep.mubr.bf16.mxu0 %v4203_v25 }
 0x1d6   :  { %3439 = vmatmul.mubr.msk.bf16.gmra.mrb[44].mxu1 %vm881_vm3, %v1018_v30 }
 0x1d7   :  { %1240 = vmatprep.mubr.bf16.mxu1 %v4203_v25 }
 0x1d8   :  { %3447 = vmatmul.mubr.msk.bf16.gmra.mrb[44].mxu0 %vm881_vm3, %v1018_v30 }
 0x1d9   :  { %3741 = vmatprep.mubr.msk.bf16.mxu0 %vm4202_vm0, %v5372_v0 }
 0x1de   :  { %3440 = vmatmul.mubr.msk.bf16.vlgmr.msra.gmra.mrb[48].mxu1 %vm881_vm3, %v1015_v27  ;;  %v4590_v27 = vrot.slane %v4587_v26, %v1043_v23 }
 0x1df   :  { %1250 = vmatprep.mubr.bf16.mxu1 %v4203_v25 }
 0x1e6   :  { %3441 = vmatmul.mubr.msk.bf16.gmra.mrb[52].mxu1 %vm881_vm3, %v1016_v2 }
 0x1e7   :  { %1260 = vmatprep.mubr.bf16.mxu1 %v4203_v25 }
 0x1ee   :  { %3442 = vmatmul.mubr.msk.bf16.gmra.mrb[56].mxu1 %vm881_vm3, %v1017_v3  ;;  %v4597_v3 = vrot.slane %v4587_v26, %v1035_v1 }
 0x1ef   :  { %1270 = vmatprep.mubr.bf16.mxu1 %v4203_v25 }
 0x1f6   :  { %3443 = vmatmul.mubr.msk.bf16.gmra.mrb[60].mxu1 %vm881_vm3, %v1018_v30 }
 0x1f7   :  { %3717 = vmatprep.mubr.msk.bf16.mxu1 %vm4202_vm0, %v5372_v0 }
 0x271   :  { %v4546_v21 = vpop.f32.mrb[16].mxu1  ;;  %v4548_v22 = vpop.f32.mrb[16].mxu0 }
 0x272   :  { %v3677_v31 = vpop.f32.mrb[17].mxu1  ;;  %v3671_v32 = vpop.f32.mrb[17].mxu0 }
 0x273   :  { %v580_v33 = vpop.f32.mrb[18].mxu1  ;;  %v537_v34 = vpop.f32.mrb[18].mxu0 }
 0x274   :  { %v3678_v35 = vpop.f32.mrb[19].mxu1  ;;  %v3672_v36 = vpop.f32.mrb[19].mxu0 }
 0x279   :  { %v4550_v37 = vpop.f32.mrb[20].mxu1  ;;  %v4552_v38 = vpop.f32.mrb[20].mxu0 }
 0x27a   :  { %v3689_v39 = vpop.f32.mrb[21].mxu1  ;;  %v3683_v40 = vpop.f32.mrb[21].mxu0 }
 0x27b   :  { %v666_v41 = vpop.f32.mrb[22].mxu1  ;;  %v623_v42 = vpop.f32.mrb[22].mxu0 }
 0x27c   :  { %v3690_v43 = vpop.f32.mrb[23].mxu1  ;;  %v3684_v44 = vpop.f32.mrb[23].mxu0 }
 0x281   :  { %v4554_v45 = vpop.f32.mrb[24].mxu1  ;;  %v4556_v46 = vpop.f32.mrb[24].mxu0 }
 0x282   :  { %v3701_v47 = vpop.f32.mrb[25].mxu1  ;;  %v3695_v48 = vpop.f32.mrb[25].mxu0 }
 0x283   :  { %v752_v49 = vpop.f32.mrb[26].mxu1  ;;  %v709_v50 = vpop.f32.mrb[26].mxu0 }
 0x284   :  { %v3702_v51 = vpop.f32.mrb[27].mxu1  ;;  %v3696_v52 = vpop.f32.mrb[27].mxu0 }
 0x289   :  { %v4558_v53 = vpop.f32.mrb[28].mxu1  ;;  %v4560_v54 = vpop.f32.mrb[28].mxu0 }
 0x28a   :  { %v3713_v55 = vpop.f32.mrb[29].mxu1  ;;  %v3707_v56 = vpop.f32.mrb[29].mxu0 }
 0x28b   :  { %v838_v57 = vpop.f32.mrb[30].mxu1  ;;  %v795_v58 = vpop.f32.mrb[30].mxu0 }
 0x28c   :  { %v3714_v59 = vpop.f32.mrb[31].mxu1  ;;  %v3708_v60 = vpop.f32.mrb[31].mxu0 }
 0x291   :  { %v1169_v61 = vpop.f32.mrb[32].mxu1 }
 0x292   :  { %v4562_v62 = vpop.f32.mrb[33].mxu1  ;;  %v1170_v15 = vadd.f32 %v1169_v61, %v4597_v3 }
 0x293   :  { %v1173_v63 = vpop.f32.mrb[34].mxu1 }
 0x294   :  { %v4564_v4 = vpop.f32.mrb[35].mxu1  ;;  %v1355_v33 = vpack.c.bf16 %v1170_v15, %v1170_v15  ;;  %v1174_v40 = vadd.f32 %v1173_v63, %v4597_v3 }
 0x296   :  { %v1356_v47 = vpack.c.bf16 %v1174_v40, %v1174_v40 }
 0x299   :  { %v1179_v5 = vpop.f32.mrb[36].mxu1 }
 0x29a   :  { %v4566_v6 = vpop.f32.mrb[37].mxu1  ;;  %v1180_v51 = vadd.f32 %v1179_v5, %v4597_v3 }
 0x29b   :  { %v4568_v7 = vpop.f32.mrb[38].mxu1 }
 0x29c   :  { %v4570_v10 = vpop.f32.mrb[39].mxu1  ;;  %v1357_v59 = vpack.c.bf16 %v1180_v51, %v1180_v51  ;;  %v1184_v14 = vadd.f32 %v4568_v7, %v4597_v3 }
 0x2a1   :  { %v1189_v11 = vpop.f32.mrb[40].mxu1 }
 0x2a2   :  { %v4572_v12 = vpop.f32.mrb[41].mxu1  ;;  %v1190_v52 = vadd.f32 %v1189_v11, %v4597_v3 }
 0x2a3   :  { %v4574_v13 = vpop.f32.mrb[42].mxu1 }
 0x2a4   :  { %v4576_v17 = vpop.f32.mrb[43].mxu1  ;;  %v1359_v60 = vpack.c.bf16 %v1190_v52, %v1190_v52  ;;  %v1194_v7 = vadd.f32 %v4574_v13, %v4597_v3 }
 0x2a9   :  { %v1199_v19 = vpop.f32.mrb[44].mxu1 }
 0x2aa   :  { %v4580_v20 = vpop.f32.mrb[45].mxu1  ;;  %v1200_v23 = vadd.f32 %v1199_v19, %v4597_v3 }
 0x2ab   :  { %v4583_v24 = vpop.f32.mrb[46].mxu1 }
 0x2ac   :  { %v4585_v25 = vpop.f32.mrb[47].mxu1 }
 0x2b1   :  { %v1242_v28 = vpop.f32.mrb[48].mxu1 }
 0x2b2   :  { %v1243_v29 = vadd.f32 %v1242_v28, %v4590_v27  ;;  %v4594_v2 = vpop.f32.mrb[49].mxu1  ;;  %v1358_v28 = vpack.c.bf16 %v1184_v14, %v1184_v14 }
 0x2b3   :  { %v1246_v30 = vpop.f32.mrb[50].mxu1 }
 0x2b4   :  { %v1363_v8 = vpack.c.bf16 %v1243_v29, %v1243_v29  ;;  %v4599_v9 = vpop.f32.mrb[51].mxu1  ;;  %v1247_v16 = vadd.f32 %v1246_v30, %v4590_v27  ;;  %v1361_v29 = vpack.c.bf16 %v1200_v23, %v1200_v23 }
 0x2b6   :  { %3716 = vmatpush3.bf16.xpose.msra.mxu1 %v1363_v8  ;;  %v1364_v35 = vpack.c.bf16 %v1247_v16, %v1247_v16  ;;  %v1360_v8 = vpack.c.bf16 %v1194_v7, %v1194_v7  ;;  %v1204_v16 = vadd.f32 %v4583_v24, %v4597_v3 }
 0x2b7   :  { %3721 = vmatprep.subr.bf16.mxu1 %v5372_v0 }
 0x2b8   :  { %v1362_v13 = vpack.c.bf16 %v1204_v16, %v1204_v16 }
 0x2b9   :  { %v1252_v31 = vpop.f32.mrb[52].mxu1 }
 0x2ba   :  { %v4604_v32 = vpop.f32.mrb[53].mxu1  ;;  %v1253_v39 = vadd.f32 %v1252_v31, %v4590_v27  ;;  %v1051_v31 = vsub.s32 4, %v4578_v18 }
 0x2bb   :  { %v1256_v34 = vpop.f32.mrb[54].mxu1 }
 0x2bc   :  { %v4606_v36 = vpop.f32.mrb[55].mxu1  ;;  %v1365_v42 = vpack.c.bf16 %v1253_v39, %v1253_v39  ;;  %v1257_v55 = vadd.f32 %v1256_v34, %v4590_v27 }
 0x2bd   :  { %3718 = vmatmul.mubr.bf16.vlgmr.msra.gmra.mrb[64].mxu1 %v1355_v33  ;;  %v1315_v33 = vpop.f32.mrb[32].mxu0 }
 0x2be   :  { %3722 = vmatpush3.bf16.xpose.msra.mxu1 %v1364_v35  ;;  %3723 = vmatprep.mubr.msk.bf16.mxu1 %vm4202_vm0, %v5372_v0  ;;  %v1366_v63 = vpack.c.bf16 %v1257_v55, %v1257_v55  ;;  %v4659_v24 = vpop.f32.mrb[33].mxu0 }
 0x2bf   :  { %3727 = vmatprep.subr.bf16.mxu1 %v5372_v0  ;;  %v1319_v3 = vpop.f32.mrb[34].mxu0 }
 0x2c0   :  { %v4661_v40 = vpop.f32.mrb[35].mxu0 }
 0x2c1   :  { %v1262_v41 = vpop.f32.mrb[56].mxu1 }
 0x2c2   :  { %v1263_v43 = vadd.f32 %v1262_v41, %v4590_v27  ;;  %v4614_v44 = vpop.f32.mrb[57].mxu1 }
 0x2c3   :  { %v1266_v48 = vpop.f32.mrb[58].mxu1 }
 0x2c4   :  { %v1367_v49 = vpack.c.bf16 %v1263_v43, %v1263_v43  ;;  %v4616_v50 = vpop.f32.mrb[59].mxu1  ;;  %v1267_v1 = vadd.f32 %v1266_v48, %v4590_v27  ;;  %v1325_v48 = vpop.f32.mrb[36].mxu0 }
 0x2c5   :  { %3724 = vmatmul.mubr.bf16.vlgmr.msra.gmra.mrb[68].mxu1 %v1356_v47  ;;  %v1327_v51 = vpop.f32.mrb[37].mxu0 }
 0x2c6   :  { %3728 = vmatpush3.bf16.xpose.msra.mxu1 %v1365_v42  ;;  %3740 = vmatpush3.bf16.xpose.msra.mxu0 %v1367_v49  ;;  %v1368_v30 = vpack.c.bf16 %v1267_v1, %v1267_v1  ;;  %v1055_v42 = vsub.s32 5, %v4578_v18  ;;  %v1329_v52 = vpop.f32.mrb[38].mxu0 }
 0x2c7   :  { %3729 = vmatprep.mubr.msk.bf16.mxu1 %vm4202_vm0, %v5372_v0  ;;  %3733 = vmatprep.subr.bf16.mxu1 %v5372_v0 }
 0x2c8   :  { %3751 = vmatprep.subr.bf16.mxu0 %v5372_v0  ;;  %v4666_v49 = vrot.slane %v4587_v26, %v1055_v42 }
 0x2c9   :  { %v1272_v56 = vpop.f32.mrb[60].mxu1 }
 0x2ca   :  { %v1273_v57 = vadd.f32 %v1272_v56, %v4590_v27  ;;  %v4626_v58 = vpop.f32.mrb[61].mxu1  ;;  %v4672_v56 = vadd.f32 %v1327_v51, %v4666_v49 }
 0x2cb   :  { %v1276_v61 = vpop.f32.mrb[62].mxu1 }
 0x2cc   :  { %v1369_v5 = vpack.c.bf16 %v1273_v57, %v1273_v57  ;;  %v4628_v11 = vpop.f32.mrb[63].mxu1  ;;  %v1277_v19 = vadd.f32 %v1276_v61, %v4590_v27  ;;  %v1052_v27 = vrot.slane %v4587_v26, %v1051_v31 }
 0x2cd   :  { %3730 = vmatmul.mubr.bf16.vlgmr.msra.gmra.mrb[72].mxu1 %v1357_v59  ;;  %3742 = vmatmul.mubr.bf16.vlgmr.msra.gmra.mrb[48].mxu0 %v1359_v60  ;;  %v1331_v59 = vpop.f32.mrb[39].mxu0 }
 0x2ce   :  { %3734 = vmatpush3.bf16.xpose.msra.mxu1 %v1366_v63  ;;  %3752 = vmatpush3.bf16.xpose.msra.mxu0 %v1369_v5  ;;  %v1370_v15 = vpack.c.bf16 %v1277_v19, %v1277_v19  ;;  %v1316_v34 = vadd.f32 %v1315_v33, %v1052_v27  ;;  %v1320_v41 = vadd.f32 %v1319_v3, %v1052_v27  ;;  %v1335_v61 = vpop.f32.mrb[40].mxu0  ;;  %v4699_v33 = vld [vmem:[#allocation3] sm:$0xff] }
 0x2cf   :  { %3735 = vmatprep.mubr.msk.bf16.mxu1 %vm4202_vm0, %v5372_v0  ;;  %3753 = vmatprep.mubr.msk.bf16.mxu0 %vm4202_vm0, %v5372_v0  ;;  %v4669_v55 = vadd.f32 %v1325_v48, %v1052_v27  ;;  %v4674_v57 = vadd.f32 %v1329_v52, %v1052_v27  ;;  %v4677_v60 = vadd.f32 %v1331_v59, %v4666_v49  ;;  %v1337_v5 = vpop.f32.mrb[41].mxu0 }
 0x2d0   :  { %3745 = vmatprep.subr.bf16.mxu1 %v5372_v0  ;;  %3763 = vmatprep.subr.bf16.mxu0 %v5372_v0  ;;  %v1371_v35 = vpack.c.bf16 %v1316_v34, %v1316_v34  ;;  %v1372_v43 = vpack.c.bf16 %v1320_v41, %v1320_v41  ;;  %v4679_v63 = vadd.f32 %v1335_v61, %v1052_v27  ;;  %v1339_v23 = vpop.f32.mrb[42].mxu0 }
 0x2d1   :  { %v4682_v14 = vadd.f32 %v1337_v5, %v4666_v49  ;;  %v4684_v1 = vadd.f32 %v1339_v23, %v1052_v27 }
 0x2d2   :  { %v1799_v39 = vsel %vm141_vm1, %v1371_v35, 0  ;;  %v1845_v47 = vsel %vm141_vm1, %v1372_v43, 0 }
 0x2d5   :  { %3736 = vmatmul.mubr.bf16.vlgmr.msra.gmra.mrb[76].mxu1 %v1358_v28  ;;  %3754 = vmatmul.mubr.bf16.vlgmr.msra.gmra.mrb[52].mxu0 %v1361_v29  ;;  %v1341_v28 = vpop.f32.mrb[43].mxu0 }
 0x2d6   :  { %3746 = vmatpush3.bf16.xpose.msra.mxu1 %v1368_v30  ;;  %3747 = vmatprep.mubr.msk.bf16.mxu1 %vm4202_vm0, %v5372_v0  ;;  %v4687_v29 = vadd.f32 %v1341_v28, %v4666_v49  ;;  %v1345_v30 = vpop.f32.mrb[44].mxu0 }
 0x2d7   :  { %3757 = vmatprep.subr.bf16.mxu1 %v5372_v0  ;;  %3765 = vmatprep.mubr.msk.bf16.mxu0 %vm4202_vm0, %v5372_v0  ;;  %v4689_v7 = vadd.f32 %v1345_v30, %v1052_v27  ;;  %v1347_v19 = vpop.f32.mrb[45].mxu0 }
 0x2d8   :  { %3764 = vmatpush3.bf16.msra.mxu0 %v1799_v39 }
 0x2d9   :  { %3775 = vmatprep.subr.bf16.mxu0 %v5372_v0 }
 0x2dd   :  { %3748 = vmatmul.mubr.bf16.vlgmr.msra.gmra.mrb[80].mxu1 %v1360_v8  ;;  %v4692_v8 = vadd.f32 %v1347_v19, %v4666_v49 }
 0x2de   :  { %3758 = vmatpush3.bf16.xpose.msra.mxu1 %v1370_v15  ;;  %3759 = vmatprep.mubr.msk.bf16.mxu1 %vm4202_vm0, %v5372_v0  ;;  %v1349_v15 = vpop.f32.mrb[46].mxu0 }
 0x2df   :  { %3769 = vmatprep.subr.bf16.mxu1 %v5372_v0  ;;  %5374 = vst [vmem:[#allocation17_spill] sm:$0xff] %v4692_v8  ;;  %v4694_v16 = vadd.f32 %v1349_v15, %v1052_v27 }
 0x2e5   :  { %3760 = vmatmul.mubr.bf16.vlgmr.msra.gmra.mrb[84].mxu1 %v1362_v13  ;;  %v1351_v13 = vpop.f32.mrb[47].mxu0 }
 0x2e6   :  { %3771 = vmatprep.mubr.msk.bf16.mxu1 %vm4202_vm0, %v5372_v0  ;;  %3770 = vmatpush3.bf16.msra.mxu1 %v1845_v47  ;;  %v4697_v31 = vadd.f32 %v1351_v13, %v4666_v49 }
 0x2e7   :  { %3781 = vmatprep.subr.bf16.mxu1 %v5372_v0 }
 0x2e8   :  { %5375 = vst [vmem:[#allocation18_spill] sm:$0xff] %v4697_v31 }
 0x390   :  { %v1413_v34 = vpop.f32.mrb[64].mxu1 }
 0x391   :  { %v1414_v35 = vadd.f32 %v1413_v34, %v4699_v33  ;;  %v3719_v39 = vpop.f32.mrb[65].mxu1 }
 0x392   :  { %v1416_v3 = vpop.f32.mrb[66].mxu1 }
 0x393   :  { %v3720_v41 = vpop.f32.mrb[67].mxu1  ;;  %v1699_v42 = vsel %vm137_vm2, %v1414_v35, -inf }
 0x394   :  { %1700 = vmax.xlane.f32.xlu0 %v1699_v42 }
 0x398   :  { %v1453_v43 = vpop.f32.mrb[68].mxu1 }
 0x399   :  { %v1454_v47 = vadd.f32 %v1453_v43, %v4699_v33  ;;  %v3725_v27 = vpop.f32.mrb[69].mxu1 }
 0x39a   :  { %v1456_v48 = vpop.f32.mrb[70].mxu1 }
 0x39b   :  { %v3726_v51 = vpop.f32.mrb[71].mxu1  ;;  %v1702_v52 = vsel %vm137_vm2, %v1454_v47, -inf }
 0x39c   :  { %1703 = vmax.xlane.f32.xlu1 %v1702_v52 }
 0x3a0   :  { %v1493_v59 = vpop.f32.mrb[72].mxu1  ;;  %v1573_v61 = vpop.f32.mrb[48].mxu0 }
 0x3a1   :  { %v1494_v5 = vadd.f32 %v1493_v59, %v4699_v33  ;;  %v3731_v23 = vpop.f32.mrb[73].mxu1  ;;  %v3743_v28 = vpop.f32.mrb[49].mxu0  ;;  %v1574_v52 = vadd.f32 %v1573_v61, %v4699_v33 }
 0x3a2   :  { %v1496_v30 = vpop.f32.mrb[74].mxu1  ;;  %v1576_v19 = vpop.f32.mrb[50].mxu0 }
 0x3a3   :  { %v3732_v15 = vpop.f32.mrb[75].mxu1  ;;  %v3744_v13 = vpop.f32.mrb[51].mxu0  ;;  %v1705_v34 = vsel %vm137_vm2, %v1494_v5, -inf  ;;  %v1711_v19 = vsel %vm137_vm2, %v1574_v52, -inf }
 0x3a4   :  { %1706 = vmax.xlane.f32.xlu1 %v1705_v34 }
 0x3a8   :  { %v1533_v39 = vpop.f32.mrb[76].mxu1  ;;  %v1653_v3 = vpop.f32.mrb[52].mxu0 }
 0x3a9   :  { %v1534_v41 = vadd.f32 %v1533_v39, %v4699_v33  ;;  %v1654_v42 = vadd.f32 %v1653_v3, %v4699_v33  ;;  %v3737_v43 = vpop.f32.mrb[77].mxu1  ;;  %v3755_v27 = vpop.f32.mrb[53].mxu0 }
 0x3aa   :  { %v1536_v48 = vpop.f32.mrb[78].mxu1  ;;  %v1656_v51 = vpop.f32.mrb[54].mxu0 }
 0x3ab   :  { %v3738_v59 = vpop.f32.mrb[79].mxu1  ;;  %v3756_v23 = vpop.f32.mrb[55].mxu0  ;;  %v1708_v28 = vsel %vm137_vm2, %v1534_v41, -inf  ;;  %v1717_v30 = vsel %vm137_vm2, %v1654_v42, -inf }
 0x3ac   :  { %1709 = vmax.xlane.f32.xlu1 %v1708_v28  ;;  %1718 = vmax.xlane.f32.xlu0 %v1717_v30 }
 0x3b0   :  { %v1613_v15 = vpop.f32.mrb[80].mxu1  ;;  %1712 = vmax.xlane.f32.xlu1 %v1711_v19 }
 0x3b1   :  { %v1614_v13 = vadd.f32 %v1613_v15, %v4699_v33  ;;  %v3749_v34 = vpop.f32.mrb[81].mxu1 }
 0x3b2   :  { %v1616_v39 = vpop.f32.mrb[82].mxu1 }
 0x3b3   :  { %v3750_v3 = vpop.f32.mrb[83].mxu1  ;;  %v1714_v43 = vsel %vm137_vm2, %v1614_v13, -inf }
 0x3b4   :  { %1715 = vmax.xlane.f32.xlu1 %v1714_v43 }
 0x3b8   :  { %v1693_v61 = vpop.f32.mrb[84].mxu1 }
 0x3b9   :  { %v1694_v27 = vadd.f32 %v1693_v61, %v4699_v33  ;;  %v3761_v48 = vpop.f32.mrb[85].mxu1 }
 0x3ba   :  { %v1696_v51 = vpop.f32.mrb[86].mxu1 }
 0x3bb   :  { %v3762_v59 = vpop.f32.mrb[87].mxu1  ;;  %v1720_v23 = vsel %vm137_vm2, %v1694_v27, -inf }
 0x3bc   :  { %1721 = vmax.xlane.f32.xlu1 %v1720_v23 }
 0x421   :  { %v1701_v28 = vpop.xlane.xlu0 %1700 }
 0x422   :  { %v1723_v30 = vsub.f32 %v1414_v35, %v1701_v28 }
 0x424   :  { %v1731_v19 = vmul.f32 1.442695, %v1723_v30 }
 0x426   :  { %3952 = vpow2.f32 %v1731_v19 }
 0x429   :  { %v1704_v15 = vpop.xlane.xlu1 %1703 }
 0x42a   :  { %v1724_v34 = vsub.f32 %v1454_v47, %v1704_v15 }
 0x42c   :  { %v1733_v39 = vmul.f32 1.442695, %v1724_v34 }
 0x42e   :  { %3954 = vpow2.f32 %v1733_v39 }
 0x430   :  { %v3953_v3 = vpop.eup %3952 }
 0x431   :  { %v1707_v0 = vpop.xlane.xlu1 %1706  ;;  %v1747_v43 = vsel %vm137_vm2, %v3953_v3, 0.0 }
 0x432   :  { %v1725_v31 = vsub.f32 %v1494_v5, %v1707_v0  ;;  %1748 = vadd.xlane.f32.xlu0 %v1747_v43 }
 0x434   :  { %v1735_v61 = vmul.f32 1.442695, %v1725_v31 }
 0x436   :  { %3956 = vpow2.f32 %v1735_v61 }
 0x438   :  { %v3955_v48 = vpop.eup %3954 }
 0x439   :  { %v1710_v51 = vpop.xlane.xlu1 %1709  ;;  %v1719_v59 = vpop.xlane.xlu0 %1718  ;;  %v1750_v23 = vsel %vm137_vm2, %v3955_v48, 0.0 }
 0x43a   :  { %v1726_v35 = vsub.f32 %v1534_v41, %v1710_v51  ;;  %1751 = vadd.xlane.f32.xlu1 %v1750_v23  ;;  %v1729_v30 = vsub.f32 %v1654_v42, %v1719_v59 }
 0x43c   :  { %v1737_v28 = vmul.f32 1.442695, %v1726_v35  ;;  %v1743_v34 = vmul.f32 1.442695, %v1729_v30 }
 0x43d   :  { %v1713_v47 = vpop.xlane.xlu1 %1712 }
 0x43e   :  { %3958 = vpow2.f32 %v1737_v28  ;;  %v1727_v19 = vsub.f32 %v1574_v52, %v1713_v47 }
 0x440   :  { %v3957_v15 = vpop.eup %3956  ;;  %v1739_v39 = vmul.f32 1.442695, %v1727_v19 }
 0x441   :  { %v1716_v8 = vpop.xlane.xlu1 %1715  ;;  %v1753_v0 = vsel %vm137_vm2, %v3957_v15, 0.0 }
 0x442   :  { %3960 = vpow2.f32 %v1739_v39  ;;  %v1728_v31 = vsub.f32 %v1614_v13, %v1716_v8  ;;  %1754 = vadd.xlane.f32.xlu0 %v1753_v0 }
 0x443   :  { %3962 = vpow2.f32 %v1743_v34  ;;  %v1373_v34 = vpack.c.bf16 %v4669_v55, %v4669_v55 }
 0x444   :  { %v1741_v5 = vmul.f32 1.442695, %v1728_v31 }
 0x445   :  { %v1891_v31 = vsel %vm141_vm1, %v1373_v34, 0 }
 0x446   :  { %3964 = vpow2.f32 %v1741_v5 }
 0x448   :  { %v3959_v43 = vpop.eup %3958 }
 0x449   :  { %v1722_v41 = vpop.xlane.xlu1 %1721  ;;  %v1756_v61 = vsel %vm137_vm2, %v3959_v43, 0.0 }
 0x44a   :  { %v1730_v42 = vsub.f32 %v1694_v27, %v1722_v41  ;;  %1757 = vadd.xlane.f32.xlu1 %v1756_v61  ;;  %v5376_v41 = vmov 0.0  }
 0x44c   :  { %v4721_v51 = vpop.eup %3960  ;;  %v1745_v52 = vmul.f32 1.442695, %v1730_v42  ;;  %v1374_v42 = vpack.c.bf16 %v4674_v57, %v4674_v57 }
 0x44d   :  { %v1759_v59 = vsel %vm137_vm2, %v4721_v51, 0.0  ;;  %v4725_v23 = vpop.eup %3962 }
 0x44e   :  { %3966 = vpow2.f32 %v1745_v52  ;;  %1760 = vadd.xlane.f32.xlu0 %v1759_v59  ;;  %v1765_v35 = vsel %vm137_vm2, %v4725_v23, 0.0 }
 0x450   :  { %v4727_v8 = vpop.eup %3964 }
 0x451   :  { %v1762_v13 = vsel %vm137_vm2, %v4727_v8, 0.0 }
 0x452   :  { %1763 = vadd.xlane.f32.xlu1 %v1762_v13  ;;  %1766 = vadd.xlane.f32.xlu0 %v1765_v35  ;;  %v1375_v35 = vpack.c.bf16 %v4679_v63, %v4679_v63  ;;  %v1376_v63 = vpack.c.bf16 %v4684_v1, %v4684_v1 }
 0x458   :  { %v4733_v27 = vpop.eup %3966 }
 0x459   :  { %v1768_v28 = vsel %vm137_vm2, %v4733_v27, 0.0 }
 0x45a   :  { %1769 = vadd.xlane.f32.xlu1 %v1768_v28 }
 0x4bf   :  { %v1749_v30 = vpop.xlane.xlu0 %1748 }
 0x4c0   :  { %3968 = vrcp.f32 %v1749_v30  ;;  %v1983_v30 = vsel %vm141_vm1, %v1375_v35, 0 }
 0x4c7   :  { %v1752_v47 = vpop.xlane.xlu1 %1751 }
 0x4c8   :  { %3970 = vrcp.f32 %v1752_v47 }
 0x4ca   :  { %v3969_v19 = vpop.eup %3968 }
 0x4cb   :  { %v1779_v39 = vmul.f32 %v3969_v19, %v3953_v3  ;;  %v1937_v3 = vsel %vm141_vm1, %v1374_v42, 0 }
 0x4cd   :  { %v1787_v0 = vpack.c.bf16 %v1779_v39, %v1779_v39 }
 0x4cf   :  { %v1755_v5 = vpop.xlane.xlu0 %1754  ;;  %3766 = vmatmul.mubr.msk.bf16.vlgmr.msra.gmra.mrb[56].mxu0 %vm137_vm2, %v1787_v0 }
 0x4d0   :  { %3972 = vrcp.f32 %v1755_v5  ;;  %3776 = vmatpush3.bf16.msra.mxu0 %v1891_v31  ;;  %3777 = vmatprep.mubr.msk.bf16.mxu0 %vm4202_vm0, %v5376_v41  ;;  %v1047_v31 = vsub.s32 3, %v4578_v18  ;;  %v2029_v5 = vsel %vm141_vm1, %v1376_v63, 0 }
 0x4d1   :  { %3787 = vmatprep.subr.bf16.mxu0 %v5376_v41 }
 0x4d2   :  { %v3971_v61 = vpop.eup %3970 }
 0x4d3   :  { %v1780_v52 = vmul.f32 %v3971_v61, %v3955_v48  ;;  %v1377_v61 = vpack.c.bf16 %v4689_v7, %v4689_v7 }
 0x4d5   :  { %v1788_v55 = vpack.c.bf16 %v1780_v52, %v1780_v52  ;;  %v2075_v7 = vsel %vm141_vm1, %v1377_v61, 0 }
 0x4d7   :  { %v1758_v59 = vpop.xlane.xlu1 %1757  ;;  %3772 = vmatmul.mubr.msk.bf16.vlgmr.msra.gmra.mrb[88].mxu1 %vm137_vm2, %v1788_v55 }
 0x4d8   :  { %3974 = vrcp.f32 %v1758_v59  ;;  %3782 = vmatpush3.bf16.msra.mxu1 %v1937_v3  ;;  %3783 = vmatprep.mubr.msk.bf16.mxu1 %vm4202_vm0, %v5376_v41  ;;  %v4770_v3 = vrot.slane %v4587_v26, %v1047_v31 }
 0x4d9   :  { %3793 = vmatprep.subr.bf16.mxu1 %v5376_v41 }
 0x4da   :  { %v3973_v13 = vpop.eup %3972 }
 0x4db   :  { %v1781_v28 = vmul.f32 %v3973_v13, %v3957_v15  ;;  %v1761_v57 = vpop.xlane.xlu0 %1760 }
 0x4dc   :  { %3976 = vrcp.f32 %v1761_v57  ;;  %v1245_v57 = vadd.f32 %v4594_v2, %v4770_v3 }
 0x4dd   :  { %v1789_v48 = vpack.c.bf16 %v1781_v28, %v1781_v28  ;;  %v1039_v28 = vsub.s32 1, %v4578_v18  ;;  %v1249_v18 = vadd.f32 %v4599_v9, %v4770_v3 }
 0x4df   :  { %v1764_v47 = vpop.xlane.xlu1 %1763  ;;  %v1767_v19 = vpop.xlane.xlu0 %1766  ;;  %3778 = vmatmul.mubr.msk.bf16.vlgmr.msra.gmra.mrb[60].mxu0 %vm137_vm2, %v1789_v48  ;;  %v4790_v48 = vrot.slane %v4587_v26, %v1039_v28  ;;  %v2180_v26 = vpack.c.bf16 %v1249_v18, %v1249_v18 }
 0x4e0   :  { %3978 = vrcp.f32 %v1764_v47  ;;  %3788 = vmatpush3.bf16.msra.mxu0 %v1983_v30  ;;  %3789 = vmatprep.mubr.msk.bf16.mxu0 %vm4202_vm0, %v5376_v41  ;;  %v2179_v30 = vpack.c.bf16 %v1245_v57, %v1245_v57 }
 0x4e1   :  { %3980 = vrcp.f32 %v1767_v19  ;;  %3799 = vmatprep.subr.bf16.mxu0 %v5376_v41  ;;  %v1172_v19 = vadd.f32 %v4562_v62, %v4790_v48  ;;  %v1259_v62 = vadd.f32 %v4606_v36, %v4770_v3 }
 0x4e2   :  { %v3975_v34 = vpop.eup %3974 }
 0x4e3   :  { %v1782_v15 = vmul.f32 %v3975_v34, %v3959_v43  ;;  %v1255_v34 = vadd.f32 %v4604_v32, %v4770_v3  ;;  %v2171_v9 = vpack.c.bf16 %v1172_v19, %v1172_v19 }
 0x4e5   :  { %v1790_v39 = vpack.c.bf16 %v1782_v15, %v1782_v15  ;;  %v2181_v63 = vpack.c.bf16 %v1255_v34, %v1255_v34  ;;  %v1182_v15 = vadd.f32 %v4566_v6, %v4790_v48  ;;  %v1269_v6 = vadd.f32 %v4616_v50, %v4770_v3 }
 0x4e6   :  { %v3977_v0 = vpop.eup %3976 }
 0x4e7   :  { %v1783_v42 = vmul.f32 %v3977_v0, %v4721_v51  ;;  %v1770_v52 = vpop.xlane.xlu1 %1769  ;;  %3784 = vmatmul.mubr.msk.bf16.vlgmr.msra.gmra.mrb[92].mxu1 %vm137_vm2, %v1790_v39  ;;  %v1378_v51 = vpack.c.bf16 %v4694_v16, %v4694_v16  ;;  %v2182_v39 = vpack.c.bf16 %v1259_v62, %v1259_v62  ;;  %v2173_v36 = vpack.c.bf16 %v1182_v15, %v1182_v15 }
 0x4e8   :  { %3982 = vrcp.f32 %v1770_v52  ;;  %3794 = vmatpush3.bf16.msra.mxu1 %v2029_v5  ;;  %3795 = vmatprep.mubr.msk.bf16.mxu1 %vm4202_vm0, %v5376_v41  ;;  %v1186_v0 = vadd.f32 %v4570_v10, %v4790_v48  ;;  %v1192_v5 = vadd.f32 %v4572_v12, %v4790_v48  ;;  %v2184_v61 = vpack.c.bf16 %v1269_v6, %v1269_v6 }
 0x4e9   :  { %v1791_v1 = vpack.c.bf16 %v1783_v42, %v1783_v42  ;;  %3805 = vmatprep.subr.bf16.mxu1 %v5376_v41  ;;  %v2121_v16 = vsel %vm141_vm1, %v1378_v51, 0  ;;  %v1275_v10 = vadd.f32 %v4626_v58, %v4770_v3  ;;  %v1196_v42 = vadd.f32 %v4576_v17, %v4790_v48 }
 0x4ea   :  { %v3979_v43 = vpop.eup %3978  ;;  %v2175_v50 = vpack.c.bf16 %v1192_v5, %v1192_v5  ;;  %v1279_v12 = vadd.f32 %v4628_v11, %v4770_v3 }
 0x4eb   :  { %v3981_v55 = vpop.eup %3980  ;;  %v1784_v59 = vmul.f32 %v3979_v43, %v4727_v8  ;;  %3790 = vmatmul.mubr.msk.bf16.vlgmr.msra.gmra.mrb[64].mxu0 %vm137_vm2, %v1791_v1  ;;  %v2185_v52 = vpack.c.bf16 %v1275_v10, %v1275_v10  ;;  %v1318_v1 = vadd.f32 %v4659_v24, %v4666_v49  ;;  %v2176_v58 = vpack.c.bf16 %v1196_v42, %v1196_v42 }
 0x4ec   :  { %3800 = vmatpush3.bf16.msra.mxu0 %v2075_v7  ;;  %3801 = vmatprep.mubr.msk.bf16.mxu0 %vm4202_vm0, %v5376_v41  ;;  %v1785_v13 = vmul.f32 %v3981_v55, %v4725_v23  ;;  %v1202_v43 = vadd.f32 %v4580_v20, %v4790_v48  ;;  %v2186_v17 = vpack.c.bf16 %v1279_v12, %v1279_v12 }
 0x4ed   :  { %v1792_v35 = vpack.c.bf16 %v1784_v59, %v1784_v59  ;;  %3811 = vmatprep.subr.bf16.mxu0 %v5376_v41  ;;  %v2187_v55 = vpack.c.bf16 %v1318_v1, %v1318_v1  ;;  %v1322_v7 = vadd.f32 %v4661_v40, %v4666_v49  ;;  %v1206_v24 = vadd.f32 %v4585_v25, %v4790_v48 }
 0x4ee   :  { %v1793_v8 = vpack.c.bf16 %v1785_v13, %v1785_v13  ;;  %v2177_v11 = vpack.c.bf16 %v1202_v43, %v1202_v43 }
 0x4ef   :  { %3796 = vmatmul.mubr.msk.bf16.vlgmr.msra.gmra.mrb[96].mxu1 %vm137_vm2, %v1792_v35  ;;  %v2615_v20 = vsel %vm141_vm1, %v2187_v55, 0  ;;  %v2178_v40 = vpack.c.bf16 %v1206_v24, %v1206_v24 }
 0x4f0   :  { %3806 = vmatpush3.bf16.msra.mxu1 %v2121_v16  ;;  %3807 = vmatprep.mubr.msk.bf16.mxu1 %vm4202_vm0, %v5376_v41 }
 0x4f1   :  { %3817 = vmatprep.subr.bf16.mxu1 %v5376_v41 }
 0x4f2   :  { %v3983_v23 = vpop.eup %3982 }
 0x4f3   :  { %v1786_v2 = vmul.f32 %v3983_v23, %v4733_v27  ;;  %3802 = vmatmul.mubr.msk.bf16.vlgmr.msra.gmra.mrb[68].mxu0 %vm137_vm2, %v1793_v8  ;;  %v1176_v27 = vadd.f32 %v4564_v4, %v4790_v48  ;;  %v1265_v4 = vadd.f32 %v4614_v44, %v4770_v3  ;;  %v2174_v44 = vpack.c.bf16 %v1186_v0, %v1186_v0 }
 0x4f4   :  { %3813 = vmatprep.mubr.msk.bf16.mxu0 %vm4202_vm0, %v5376_v41  ;;  %v2188_v3 = vpack.c.bf16 %v1322_v7, %v1322_v7 }
 0x4f5   :  { %3812 = vmatpush3.bf16.xpose.msra.mxu0 %v2179_v30  ;;  %v1794_v47 = vpack.c.bf16 %v1786_v2, %v1786_v2  ;;  %v2172_v32 = vpack.c.bf16 %v1176_v27, %v1176_v27  ;;  %v2183_v31 = vpack.c.bf16 %v1265_v4, %v1265_v4 }
 0x4f6   :  { %3823 = vmatprep.subr.bf16.mxu0 %v5376_v41  ;;  %v2661_v49 = vsel %vm141_vm1, %v2188_v3, 0 }
 0x4f7   :  { %3808 = vmatmul.mubr.msk.bf16.vlgmr.msra.gmra.mrb[100].mxu1 %vm137_vm2, %v1794_v47 }
 0x4f8   :  { %3819 = vmatprep.mubr.msk.bf16.mxu1 %vm4202_vm0, %v5376_v41 }
 0x4f9   :  { %3818 = vmatpush3.bf16.xpose.msra.mxu1 %v2180_v26 }
 0x4fa   :  { %3829 = vmatprep.subr.bf16.mxu1 %v5376_v41 }
 0x4fc   :  { %3814 = vmatmul.mubr.bf16.vlgmr.msra.gmra.mrb[72].mxu0 %v2171_v9 }
 0x4fd   :  { %3824 = vmatpush3.bf16.xpose.msra.mxu0 %v2181_v63  ;;  %3825 = vmatprep.mubr.msk.bf16.mxu0 %vm4202_vm0, %v5376_v41 }
 0x4fe   :  { %3835 = vmatprep.subr.bf16.mxu0 %v5376_v41 }
 0x500   :  { %3820 = vmatmul.mubr.bf16.vlgmr.msra.gmra.mrb[104].mxu1 %v2172_v32 }
 0x501   :  { %3830 = vmatpush3.bf16.xpose.msra.mxu1 %v2182_v39  ;;  %3831 = vmatprep.mubr.msk.bf16.mxu1 %vm4202_vm0, %v5376_v41 }
 0x502   :  { %3841 = vmatprep.subr.bf16.mxu1 %v5376_v41 }
 0x504   :  { %3826 = vmatmul.mubr.bf16.vlgmr.msra.gmra.mrb[76].mxu0 %v2173_v36 }
 0x505   :  { %3836 = vmatpush3.bf16.xpose.msra.mxu0 %v2183_v31  ;;  %3837 = vmatprep.mubr.msk.bf16.mxu0 %vm4202_vm0, %v5376_v41 }
 0x506   :  { %3847 = vmatprep.subr.bf16.mxu0 %v5376_v41 }
 0x508   :  { %3832 = vmatmul.mubr.bf16.vlgmr.msra.gmra.mrb[108].mxu1 %v2174_v44 }
 0x509   :  { %3842 = vmatpush3.bf16.xpose.msra.mxu1 %v2184_v61  ;;  %3843 = vmatprep.mubr.msk.bf16.mxu1 %vm4202_vm0, %v5376_v41 }
 0x50a   :  { %3853 = vmatprep.subr.bf16.mxu1 %v5376_v41 }
 0x50c   :  { %3838 = vmatmul.mubr.bf16.vlgmr.msra.gmra.mrb[80].mxu0 %v2175_v50 }
 0x50d   :  { %3848 = vmatpush3.bf16.xpose.msra.mxu0 %v2185_v52  ;;  %3849 = vmatprep.mubr.msk.bf16.mxu0 %vm4202_vm0, %v5376_v41 }
 0x50e   :  { %3859 = vmatprep.subr.bf16.mxu0 %v5376_v41 }
 0x510   :  { %3844 = vmatmul.mubr.bf16.vlgmr.msra.gmra.mrb[112].mxu1 %v2176_v58 }
 0x511   :  { %3854 = vmatpush3.bf16.xpose.msra.mxu1 %v2186_v17  ;;  %3855 = vmatprep.mubr.msk.bf16.mxu1 %vm4202_vm0, %v5376_v41 }
 0x512   :  { %3865 = vmatprep.subr.bf16.mxu1 %v5376_v41 }
 0x514   :  { %3850 = vmatmul.mubr.bf16.vlgmr.msra.gmra.mrb[84].mxu0 %v2177_v11 }
 0x515   :  { %3860 = vmatpush3.bf16.msra.mxu0 %v2615_v20  ;;  %3861 = vmatprep.mubr.msk.bf16.mxu0 %vm4202_vm0, %v5376_v41 }
 0x516   :  { %3871 = vmatprep.subr.bf16.mxu0 %v5376_v41 }
 0x518   :  { %3856 = vmatmul.mubr.bf16.vlgmr.msra.gmra.mrb[116].mxu1 %v2178_v40 }
 0x519   :  { %3866 = vmatpush3.bf16.msra.mxu1 %v2661_v49  ;;  %3867 = vmatprep.mubr.msk.bf16.mxu1 %vm4202_vm0, %v5376_v41 }
 0x51a   :  { %3877 = vmatprep.subr.bf16.mxu1 %v5376_v41 }
 0x5a2   :  { %v4861_v25 = vpop.f32.mrb[56].mxu0 }
 0x5a3   :  { %v3767_v51 = vpop.f32.mrb[57].mxu0 }
 0x5a4   :  { %v1838_v59 = vpop.f32.mrb[58].mxu0 }
 0x5a5   :  { %v3768_v13 = vpop.f32.mrb[59].mxu0 }
 0x5aa   :  { %v4863_v35 = vpop.f32.mrb[88].mxu1 }
 0x5ab   :  { %v3003_v28 = vpack.c.bf16 %v4863_v35, %v4861_v25  ;;  %v3773_v57 = vpop.f32.mrb[89].mxu1 }
 0x5ac   :  { %v1884_v16 = vpop.f32.mrb[90].mxu1 }
 0x5ad   :  { %v3774_v8 = vpop.f32.mrb[91].mxu1 }
 0x5b2   :  { %v4867_v23 = vpop.f32.mrb[60].mxu0 }
 0x5b3   :  { %v3779_v48 = vpop.f32.mrb[61].mxu0 }
 0x5b4   :  { %v1930_v30 = vpop.f32.mrb[62].mxu0 }
 0x5b5   :  { %v3780_v18 = vpop.f32.mrb[63].mxu0 }
 0x5ba   :  { %v4869_v2 = vpop.f32.mrb[92].mxu1 }
 0x5bb   :  { %v3005_v47 = vpack.c.bf16 %v4869_v2, %v4867_v23  ;;  %v3785_v19 = vpop.f32.mrb[93].mxu1 }
 0x5bc   :  { %v1976_v26 = vpop.f32.mrb[94].mxu1 }
 0x5bd   :  { %v3786_v34 = vpop.f32.mrb[95].mxu1 }
 0x5be   :  { %v4873_v9 = vpop.f32.mrb[64].mxu0 }
 0x5bf   :  { %v3791_v27 = vpop.f32.mrb[65].mxu0 }
 0x5c0   :  { %v2022_v63 = vpop.f32.mrb[66].mxu0 }
 0x5c1   :  { %v3792_v62 = vpop.f32.mrb[67].mxu0 }
 0x5c2   :  { %v4875_v32 = vpop.f32.mrb[96].mxu1 }
 0x5c3   :  { %v3007_v15 = vpack.c.bf16 %v4875_v32, %v4873_v9  ;;  %v3797_v39 = vpop.f32.mrb[97].mxu1 }
 0x5c4   :  { %v2068_v4 = vpop.f32.mrb[98].mxu1 }
 0x5c5   :  { %v3798_v36 = vpop.f32.mrb[99].mxu1 }
 0x5c6   :  { %v4879_v0 = vpop.f32.mrb[68].mxu0 }
 0x5c7   :  { %v3803_v31 = vpop.f32.mrb[69].mxu0 }
 0x5c8   :  { %v2114_v6 = vpop.f32.mrb[70].mxu0 }
 0x5c9   :  { %v3804_v44 = vpop.f32.mrb[71].mxu0 }
 0x5ca   :  { %v4881_v5 = vpop.f32.mrb[100].mxu1 }
 0x5cb   :  { %v3009_v61 = vpack.c.bf16 %v4881_v5, %v4879_v0  ;;  %v3809_v10 = vpop.f32.mrb[101].mxu1 }
 0x5cc   :  { %v2160_v50 = vpop.f32.mrb[102].mxu1 }
 0x5cd   :  { %v3810_v42 = vpop.f32.mrb[103].mxu1 }
 0x5cf   :  { %v2229_v52 = vpop.f32.mrb[72].mxu0 }
 0x5d0   :  { %v2230_v12 = vadd.f32 %v2229_v52, %v4699_v33  ;;  %v3815_v1 = vpop.f32.mrb[73].mxu0 }
 0x5d1   :  { %v2232_v58 = vpop.f32.mrb[74].mxu0 }
 0x5d2   :  { %v3816_v43 = vpop.f32.mrb[75].mxu0  ;;  %v2515_v17 = vsel %vm137_vm2, %v2230_v12, -inf }
 0x5d3   :  { %v2269_v55 = vpop.f32.mrb[104].mxu1  ;;  %2516 = vmax.xlane.f32.xlu0 %v2515_v17 }
 0x5d4   :  { %v2270_v7 = vadd.f32 %v2269_v55, %v4699_v33  ;;  %v3821_v11 = vpop.f32.mrb[105].mxu1 }
 0x5d5   :  { %v2272_v24 = vpop.f32.mrb[106].mxu1 }
 0x5d6   :  { %v3822_v20 = vpop.f32.mrb[107].mxu1  ;;  %v2518_v3 = vsel %vm137_vm2, %v2270_v7, -inf }
 0x5d7   :  { %2519 = vmax.xlane.f32.xlu1 %v2518_v3  ;;  %v2309_v40 = vpop.f32.mrb[76].mxu0 }
 0x5d8   :  { %v2310_v49 = vadd.f32 %v2309_v40, %v4699_v33  ;;  %v3827_v51 = vpop.f32.mrb[77].mxu0 }
 0x5d9   :  { %v2312_v59 = vpop.f32.mrb[78].mxu0 }
 0x5da   :  { %v3828_v13 = vpop.f32.mrb[79].mxu0  ;;  %v2521_v57 = vsel %vm137_vm2, %v2310_v49, -inf }
 0x5db   :  { %v2349_v16 = vpop.f32.mrb[108].mxu1  ;;  %2522 = vmax.xlane.f32.xlu0 %v2521_v57 }
 0x5dc   :  { %v2350_v8 = vadd.f32 %v2349_v16, %v4699_v33  ;;  %v3833_v48 = vpop.f32.mrb[109].mxu1 }
 0x5dd   :  { %v2352_v30 = vpop.f32.mrb[110].mxu1 }
 0x5de   :  { %v3834_v18 = vpop.f32.mrb[111].mxu1  ;;  %v2524_v19 = vsel %vm137_vm2, %v2350_v8, -inf }
 0x5df   :  { %2525 = vmax.xlane.f32.xlu1 %v2524_v19  ;;  %v2389_v26 = vpop.f32.mrb[80].mxu0 }
 0x5e0   :  { %v2390_v34 = vadd.f32 %v2389_v26, %v4699_v33  ;;  %v3839_v27 = vpop.f32.mrb[81].mxu0 }
 0x5e1   :  { %v2392_v63 = vpop.f32.mrb[82].mxu0 }
 0x5e2   :  { %v3840_v62 = vpop.f32.mrb[83].mxu0  ;;  %v2527_v39 = vsel %vm137_vm2, %v2390_v34, -inf }
 0x5e3   :  { %v2429_v4 = vpop.f32.mrb[112].mxu1  ;;  %2528 = vmax.xlane.f32.xlu0 %v2527_v39 }
 0x5e4   :  { %v2430_v36 = vadd.f32 %v2429_v4, %v4699_v33  ;;  %v3845_v31 = vpop.f32.mrb[113].mxu1 }
 0x5e5   :  { %v2432_v6 = vpop.f32.mrb[114].mxu1 }
 0x5e6   :  { %v3846_v44 = vpop.f32.mrb[115].mxu1  ;;  %v2530_v10 = vsel %vm137_vm2, %v2430_v36, -inf }
 0x5e7   :  { %2531 = vmax.xlane.f32.xlu1 %v2530_v10  ;;  %v2469_v50 = vpop.f32.mrb[84].mxu0 }
 0x5e8   :  { %v2470_v42 = vadd.f32 %v2469_v50, %v4699_v33  ;;  %v3851_v52 = vpop.f32.mrb[85].mxu0 }
 0x5e9   :  { %v2472_v1 = vpop.f32.mrb[86].mxu0 }
 0x5ea   :  { %v3852_v58 = vpop.f32.mrb[87].mxu0  ;;  %v2533_v43 = vsel %vm137_vm2, %v2470_v42, -inf }
 0x5eb   :  { %v2509_v17 = vpop.f32.mrb[116].mxu1  ;;  %2534 = vmax.xlane.f32.xlu0 %v2533_v43 }
 0x5ec   :  { %v2510_v55 = vadd.f32 %v2509_v17, %v4699_v33  ;;  %v3857_v11 = vpop.f32.mrb[117].mxu1 }
 0x5ed   :  { %v2512_v24 = vpop.f32.mrb[118].mxu1 }
 0x5ee   :  { %v3858_v20 = vpop.f32.mrb[119].mxu1  ;;  %v2536_v3 = vsel %vm137_vm2, %v2510_v55, -inf  ;;  %v3420_v24 = vld [vmem:[%s5361_s3] ss:$0 sm:$0xff] }
 0x5ef   :  { %2537 = vmax.xlane.f32.xlu1 %v2536_v3  ;;  %v3421_v20 = vld [vmem:[%s5362_s4] ss:$0 sm:$0xff] }
 0x660   :  { %v2517_v40 = vpop.xlane.xlu0 %2516 }
 0x661   :  { %v2539_v51 = vsub.f32 %v2230_v12, %v2517_v40  ;;  %v4935_v40 = vld [vmem:[%s5358_s0] sm:$0xff] }
 0x663   :  { %v2547_v59 = vmul.f32 1.442695, %v2539_v51  ;;  %v863_v51 = vmul.f32 %v4935_v40, %v3421_v20 }
 0x664   :  { %v2520_v13 = vpop.xlane.xlu1 %2519 }
 0x665   :  { %3984 = vpow2.f32 %v2547_v59  ;;  %v2540_v57 = vsub.f32 %v2270_v7, %v2520_v13  ;;  %v849_v13 = vmul.f32 %v3420_v24, %v4546_v21 }
 0x667   :  { %v2549_v16 = vmul.f32 1.442695, %v2540_v57  ;;  %v4944_v57 = vld [vmem:[%s5358_s0 + $0x8] sm:$0xff] }
 0x668   :  { %v2523_v48 = vpop.xlane.xlu0 %2522 }
 0x669   :  { %3986 = vpow2.f32 %v2549_v16  ;;  %v2541_v30 = vsub.f32 %v2310_v49, %v2523_v48  ;;  %v850_v16 = vmul.f32 %v3420_v24, %v4552_v38 }
 0x66b   :  { %v2551_v18 = vmul.f32 1.442695, %v2541_v30 }
 0x66c   :  { %v2526_v19 = vpop.xlane.xlu1 %2525 }
 0x66d   :  { %3988 = vpow2.f32 %v2551_v18  ;;  %v2542_v33 = vsub.f32 %v2350_v8, %v2526_v19  ;;  %v4955_v18 = vld [vmem:[%s5358_s0 + $0x10] sm:$0xff] }
 0x66e   :  { %v865_v21 = vmul.f32 %v4955_v18, %v3421_v20 }
 0x66f   :  { %v4901_v26 = vpop.eup %3984  ;;  %v2553_v27 = vmul.f32 1.442695, %v2542_v33  ;;  %v851_v33 = vmul.f32 %v3420_v24, %v4550_v37  ;;  %v4979_v37 = vld [vmem:[%s5358_s0 + $0x20] sm:$0xff] }
 0x670   :  { %v2529_v63 = vpop.xlane.xlu0 %2528  ;;  %v2563_v62 = vsel %vm137_vm2, %v4901_v26, 0.0 }
 0x671   :  { %3990 = vpow2.f32 %v2553_v27  ;;  %v2543_v12 = vsub.f32 %v2390_v34, %v2529_v63  ;;  %2564 = vadd.xlane.f32.xlu0 %v2563_v62  ;;  %v852_v27 = vmul.f32 %v3420_v24, %v4556_v46  ;;  %v4967_v63 = vld [vmem:[%s5358_s0 + $0x18] sm:$0xff]  ;;  %v867_v46 = vmul.f32 %v4979_v37, %v3421_v20 }
 0x672   :  { %v866_v62 = vmul.f32 %v4967_v63, %v3421_v20 }
 0x673   :  { %v4905_v39 = vpop.eup %3986  ;;  %v2555_v7 = vmul.f32 1.442695, %v2543_v12 }
 0x674   :  { %v2532_v4 = vpop.xlane.xlu1 %2531  ;;  %v2566_v49 = vsel %vm137_vm2, %v4905_v39, 0.0 }
 0x675   :  { %3992 = vpow2.f32 %v2555_v7  ;;  %v2544_v31 = vsub.f32 %v2430_v36, %v2532_v4  ;;  %2567 = vadd.xlane.f32.xlu1 %v2566_v49  ;;  %v4974_v4 = vadd.f32 %v865_v21, %v850_v16  ;;  %v853_v49 = vmul.f32 %v3420_v24, %v4554_v45  ;;  %v5001_v45 = vld [vmem:[%s5358_s0 + $0x30] sm:$0xff] }
 0x677   :  { %v4909_v8 = vpop.eup %3988  ;;  %v2557_v6 = vmul.f32 1.442695, %v2544_v31 }
 0x678   :  { %v2535_v44 = vpop.xlane.xlu0 %2534  ;;  %v2569_v10 = vsel %vm137_vm2, %v4909_v8, 0.0 }
 0x679   :  { %3994 = vpow2.f32 %v2557_v6  ;;  %v2545_v34 = vsub.f32 %v2470_v42, %v2535_v44  ;;  %2570 = vadd.xlane.f32.xlu0 %v2569_v10  ;;  %v4985_v6 = vadd.f32 %v866_v62, %v851_v33  ;;  %v4990_v44 = vld [vmem:[%s5358_s0 + $0x28] sm:$0xff]  ;;  %v2189_v33 = vpack.c.bf16 %v4672_v56, %v4672_v56 }
 0x67a   :  { %v868_v10 = vmul.f32 %v4990_v44, %v3421_v20 }
 0x67b   :  { %v4913_v50 = vpop.eup %3990  ;;  %v2559_v52 = vmul.f32 1.442695, %v2545_v34  ;;  %v854_v34 = vmul.f32 %v3420_v24, %v4560_v54  ;;  %v5009_v54 = vld [vmem:[%s5358_s0 + $0x38] sm:$0xff] }
 0x67c   :  { %v2538_v1 = vpop.xlane.xlu1 %2537  ;;  %v2572_v58 = vsel %vm137_vm2, %v4913_v50, 0.0 }
 0x67d   :  { %3996 = vpow2.f32 %v2559_v52  ;;  %v2546_v36 = vsub.f32 %v2510_v55, %v2538_v1  ;;  %2573 = vadd.xlane.f32.xlu1 %v2572_v58  ;;  %v848_v55 = vmul.f32 %v3420_v24, %v4548_v22  ;;  %v864_v22 = vmul.f32 %v4944_v57, %v3421_v20 }
 0x67e   :  { %v888_v52 = vsel %vm881_vm3, %v4974_v4, 0.0  ;;  %v4996_v1 = vadd.f32 %v867_v46, %v852_v27  ;;  %v869_v58 = vmul.f32 %v5001_v45, %v3421_v20  ;;  %v2707_v46 = vsel %vm141_vm1, %v2189_v33, 0 }
 0x67f   :  { %v4917_v43 = vpop.eup %3992  ;;  %v2561_v17 = vmul.f32 1.442695, %v2546_v36  ;;  %v4950_v30 = vadd.f32 %v863_v51, %v848_v55  ;;  %v4962_v38 = vadd.f32 %v864_v22, %v849_v13  ;;  %v891_v36 = vsel %vm881_vm3, %v4985_v6, 0.0 }
 0x680   :  { %v2575_v11 = vsel %vm137_vm2, %v4917_v43, 0.0  ;;  %v894_v55 = vsel %vm881_vm3, %v4996_v1, 0.0  ;;  %v5017_v51 = vadd.f32 %v869_v58, %v854_v34 }
 0x681   :  { %3998 = vpow2.f32 %v2561_v17  ;;  %2576 = vadd.xlane.f32.xlu0 %v2575_v11  ;;  %v882_v7 = vsel %vm881_vm3, %v4950_v30, 0.0  ;;  %v885_v31 = vsel %vm881_vm3, %v4962_v38, 0.0  ;;  %v870_v17 = vmul.f32 %v5009_v54, %v3421_v20 }
 0x682   :  { %v855_v11 = vmul.f32 %v3420_v24, %v4558_v53  ;;  %v900_v22 = vsel %vm881_vm3, %v5017_v51, 0.0 }
 0x683   :  { %v4921_v42 = vpop.eup %3994 }
 0x684   :  { %v2578_v3 = vsel %vm137_vm2, %v4921_v42, 0.0  ;;  %v5023_v16 = vadd.f32 %v870_v17, %v855_v11  ;;  %v2192_v11 = vpack.c.bf16 %v4687_v29, %v4687_v29 }
 0x685   :  { %2579 = vadd.xlane.f32.xlu1 %v2578_v3  ;;  %v5015_v3 = vadd.f32 %v868_v10, %v853_v49  ;;  %v2190_v49 = vpack.c.bf16 %v4677_v60, %v4677_v60 }
 0x686   :  { %v903_v53 = vsel %vm881_vm3, %v5023_v16, 0.0 }
 0x687   :  { %v4938_v59 = vpop.eup %3996  ;;  %v897_v13 = vsel %vm881_vm3, %v5015_v3, 0.0  ;;  %v2753_v34 = vsel %vm141_vm1, %v2190_v49, 0 }
 0x688   :  { %v2581_v48 = vsel %vm137_vm2, %v4938_v59, 0.0 }
 0x689   :  { %2582 = vadd.xlane.f32.xlu0 %v2581_v48 }
 0x68b   :  { %v4958_v19 = vpop.eup %3998 }
 0x68c   :  { %v2584_v12 = vsel %vm137_vm2, %v4958_v19, 0.0 }
 0x68d   :  { %2585 = vadd.xlane.f32.xlu1 %v2584_v12  ;;  %883 = vadd.xlane.f32.xlu0 %v882_v7 }
 0x691   :  { %886 = vadd.xlane.f32.xlu1 %v885_v31  ;;  %889 = vadd.xlane.f32.xlu0 %v888_v52  ;;  %v2191_v52 = vpack.c.bf16 %v4682_v14, %v4682_v14 }
 0x693   :  { %v2799_v17 = vsel %vm141_vm1, %v2191_v52, 0  ;;  %v3942_v52 = vld [vmem:[%s5367_s9 + $0x58] sm:$0xff]  }
 0x695   :  { %892 = vadd.xlane.f32.xlu1 %v891_v36  ;;  %895 = vadd.xlane.f32.xlu0 %v894_v55 }
 0x699   :  { %898 = vadd.xlane.f32.xlu1 %v897_v13  ;;  %901 = vadd.xlane.f32.xlu0 %v900_v22  ;;  %v2845_v22 = vsel %vm141_vm1, %v2192_v11, 0  ;;  %v3948_v11 = vld [vmem:[%s5367_s9 + $0x70] sm:$0xff]  }
 0x69d   :  { %904 = vadd.xlane.f32.xlu1 %v903_v53  ;;  %v5377_v53 = vld [vmem:[#allocation17_spill] sm:$0xff] }
 0x6fe   :  { %v2565_v24 = vpop.xlane.xlu0 %2564 }
 0x6ff   :  { %4000 = vrcp.f32 %v2565_v24  ;;  %v2193_v24 = vpack.c.bf16 %v5377_v53, %v5377_v53 }
 0x701   :  { %v2891_v33 = vsel %vm141_vm1, %v2193_v24, 0 }
 0x702   :  { %v2568_v20 = vpop.xlane.xlu1 %2567 }
 0x703   :  { %4002 = vrcp.f32 %v2568_v20 }
 0x706   :  { %v2571_v48 = vpop.xlane.xlu0 %2570 }
 0x707   :  { %4004 = vrcp.f32 %v2571_v48  ;;  %v3936_v48 = vld [vmem:[%s5367_s9 + $0x40] sm:$0xff]  }
 0x709   :  { %v4001_v21 = vpop.eup %4000 }
 0x70a   :  { %v2595_v27 = vmul.f32 %v4001_v21, %v4901_v26  ;;  %v2574_v62 = vpop.xlane.xlu1 %2573 }
 0x70b   :  { %4006 = vrcp.f32 %v2574_v62 }
 0x70c   :  { %v2603_v12 = vpack.c.bf16 %v2595_v27, %v2595_v27  ;;  %v5378_v27 = vld [vmem:[#allocation18_spill] sm:$0xff] }
 0x70d   :  { %v4003_v7 = vpop.eup %4002 }
 0x70e   :  { %v2596_v31 = vmul.f32 %v4003_v7, %v4905_v39  ;;  %3862 = vmatmul.mubr.msk.bf16.vlgmr.msra.gmra.mrb[88].mxu0 %vm137_vm2, %v2603_v12  ;;  %v2577_v10 = vpop.xlane.xlu0 %2576 }
 0x70f   :  { %3872 = vmatpush3.bf16.msra.mxu0 %v2707_v46  ;;  %4008 = vrcp.f32 %v2577_v10  ;;  %3873 = vmatprep.mubr.msk.bf16.mxu0 %vm4202_vm0, %v5376_v41  ;;  %v3938_v10 = vld [vmem:[%s5367_s9 + $0x48] sm:$0xff]  }
 0x710   :  { %v2604_v56 = vpack.c.bf16 %v2596_v31, %v2596_v31  ;;  %3883 = vmatprep.subr.bf16.mxu0 %v5376_v41 }
 0x711   :  { %v4005_v26 = vpop.eup %4004 }
 0x712   :  { %v2597_v60 = vmul.f32 %v4005_v26, %v4909_v8  ;;  %3868 = vmatmul.mubr.msk.bf16.vlgmr.msra.gmra.mrb[120].mxu1 %vm137_vm2, %v2604_v56  ;;  %v2580_v39 = vpop.xlane.xlu1 %2579 }
 0x713   :  { %3878 = vmatpush3.bf16.msra.mxu1 %v2753_v34  ;;  %4010 = vrcp.f32 %v2580_v39  ;;  %3879 = vmatprep.mubr.msk.bf16.mxu1 %vm4202_vm0, %v5376_v41  ;;  %v3940_v34 = vld [vmem:[%s5367_s9 + $0x50] sm:$0xff]   ;;  %v3944_v39 = vld [vmem:[%s5367_s9 + $0x60] sm:$0xff]  }
 0x714   :  { %v2605_v58 = vpack.c.bf16 %v2597_v60, %v2597_v60  ;;  %3889 = vmatprep.subr.bf16.mxu1 %v5376_v41  ;;  %v3943_v60 = vld [vmem:[%s5367_s9 + $0x18] sm:$0xff]  }
 0x715   :  { %v4007_v36 = vpop.eup %4006 }
 0x716   :  { %v2598_v14 = vmul.f32 %v4007_v36, %v4913_v50  ;;  %3874 = vmatmul.mubr.msk.bf16.vlgmr.msra.gmra.mrb[92].mxu0 %vm137_vm2, %v2605_v58  ;;  %v2583_v8 = vpop.xlane.xlu0 %2582  ;;  %v3945_v58 = vld [vmem:[%s5367_s9 + $0x20] sm:$0xff]   ;;  %v3946_v36 = vld [vmem:[%s5367_s9 + $0x68] sm:$0xff]  }
 0x717   :  { %3884 = vmatpush3.bf16.msra.mxu0 %v2799_v17  ;;  %4012 = vrcp.f32 %v2583_v8  ;;  %3885 = vmatprep.mubr.msk.bf16.mxu0 %vm4202_vm0, %v5376_v41  ;;  %v3947_v17 = vld [vmem:[%s5367_s9 + $0x28] sm:$0xff]   ;;  %v3950_v8 = vld [vmem:[%s5367_s9 + $0x78] sm:$0xff]  }
 0x718   :  { %v2606_v55 = vpack.c.bf16 %v2598_v14, %v2598_v14  ;;  %3895 = vmatprep.subr.bf16.mxu0 %v5376_v41  ;;  %v3949_v14 = vld [vmem:[%s5367_s9 + $0x30] sm:$0xff]  }
 0x719   :  { %v4009_v13 = vpop.eup %4008 }
 0x71a   :  { %v2599_v29 = vmul.f32 %v4009_v13, %v4917_v43  ;;  %3880 = vmatmul.mubr.msk.bf16.vlgmr.msra.gmra.mrb[124].mxu1 %vm137_vm2, %v2606_v55  ;;  %v2586_v50 = vpop.xlane.xlu1 %2585  ;;  %v2194_v43 = vpack.c.bf16 %v5378_v27, %v5378_v27  ;;  %v3951_v55 = vld [vmem:[%s5367_s9 + $0x38] sm:$0xff]  }
 0x71b   :  { %3890 = vmatpush3.bf16.msra.mxu1 %v2845_v22  ;;  %4014 = vrcp.f32 %v2586_v50  ;;  %3891 = vmatprep.mubr.msk.bf16.mxu1 %vm4202_vm0, %v5376_v41 }
 0x71c   :  { %v2607_v20 = vpack.c.bf16 %v2599_v29, %v2599_v29  ;;  %3901 = vmatprep.subr.bf16.mxu1 %v5376_v41  ;;  %v2937_v46 = vsel %vm141_vm1, %v2194_v43, 0 }
 0x71d   :  { %v4011_v21 = vpop.eup %4010 }
 0x71e   :  { %v2600_v62 = vmul.f32 %v4011_v21, %v4921_v42  ;;  %3886 = vmatmul.mubr.msk.bf16.vlgmr.msra.gmra.mrb[96].mxu0 %vm137_vm2, %v2607_v20  ;;  %v3937_v42 = vld [vmem:[%s5367_s9] sm:$0xff]  }
 0x71f   :  { %3896 = vmatpush3.bf16.msra.mxu0 %v2891_v33  ;;  %3897 = vmatprep.mubr.msk.bf16.mxu0 %vm4202_vm0, %v5376_v41 }
 0x720   :  { %v2608_v12 = vpack.c.bf16 %v2600_v62, %v2600_v62  ;;  %3579 = vmatprep.subr.bf16.mxu0 %v3936_v48 }
 0x721   :  { %v4013_v7 = vpop.eup %4012 }
 0x722   :  { %v2601_v49 = vmul.f32 %v4013_v7, %v4938_v59  ;;  %3892 = vmatmul.mubr.msk.bf16.vlgmr.msra.gmra.mrb[128].mxu1 %vm137_vm2, %v2608_v12  ;;  %v3939_v59 = vld [vmem:[%s5367_s9 + $0x8] sm:$0xff]  }
 0x723   :  { %3902 = vmatpush3.bf16.msra.mxu1 %v2937_v46  ;;  %3903 = vmatprep.mubr.msk.bf16.mxu1 %vm4202_vm0, %v5376_v41 }
 0x724   :  { %v2609_v31 = vpack.c.bf16 %v2601_v49, %v2601_v49 }
 0x725   :  { %v4015_v56 = vpop.eup %4014 }
 0x726   :  { %v2602_v26 = vmul.f32 %v4015_v56, %v4958_v19  ;;  %3898 = vmatmul.mubr.msk.bf16.vlgmr.msra.gmra.mrb[100].mxu0 %vm137_vm2, %v2609_v31  ;;  %v3941_v19 = vld [vmem:[%s5367_s9 + $0x10] sm:$0xff]  }
 0x727   :  { %3580 = vmatpush3.bf16.msra.mxu0 %v3937_v42 }
 0x728   :  { %v2610_v41 = vpack.c.bf16 %v2602_v26, %v2602_v26  ;;  %3581 = vmatprep.subr.bf16.mxu0 %v3938_v10 }
 0x72a   :  { %3904 = vmatmul.mubr.msk.bf16.vlgmr.msra.gmra.mrb[132].mxu1 %vm137_vm2, %v2610_v41 }
 0x72b   :  { %3582 = vmatpush3.bf16.msra.mxu0 %v3939_v59 }
 0x72c   :  { %3583 = vmatprep.subr.bf16.mxu0 %v3940_v34 }
 0x72f   :  { %3584 = vmatpush3.bf16.msra.mxu0 %v3941_v19 }
 0x730   :  { %3585 = vmatprep.subr.bf16.mxu0 %v3942_v52 }
 0x733   :  { %3586 = vmatpush3.bf16.msra.mxu0 %v3943_v60 }
 0x734   :  { %3587 = vmatprep.subr.bf16.mxu0 %v3944_v39 }
 0x737   :  { %3588 = vmatpush3.bf16.msra.mxu0 %v3945_v58 }
 0x738   :  { %3589 = vmatprep.subr.bf16.mxu0 %v3946_v36 }
 0x73b   :  { %3590 = vmatpush3.bf16.msra.mxu0 %v3947_v17  ;;  %v3464_v17 = vld [vmem:[%s5368_s10] ss:$0 sm:$0xff] }
 0x73c   :  { %3591 = vmatprep.subr.bf16.mxu0 %v3948_v11 }
 0x73f   :  { %3592 = vmatpush3.bf16.msra.mxu0 %v3949_v14 }
 0x740   :  { %3593 = vmatprep.subr.bf16.mxu0 %v3950_v8 }
 0x743   :  { %3594 = vmatpush3.bf16.msra.mxu0 %v3951_v55 }
 0x7e1   :  { %v2651_v13 = vpop.f32.mrb[88].mxu0 }
 0x7e2   :  { %v3863_v22 = vpop.f32.mrb[89].mxu0 }
 0x7e3   :  { %v2654_v53 = vpop.f32.mrb[90].mxu0 }
 0x7e4   :  { %v3864_v24 = vpop.f32.mrb[91].mxu0 }
 0x7e5   :  { %v2697_v29 = vpop.f32.mrb[120].mxu1 }
 0x7e6   :  { %v3004_v50 = vpack.c.bf16 %v2697_v29, %v2651_v13  ;;  %v3869_v20 = vpop.f32.mrb[121].mxu1 }
 0x7e7   :  { %v2700_v48 = vpop.f32.mrb[122].mxu1 }
 0x7e8   :  { %v3870_v21 = vpop.f32.mrb[123].mxu1  ;;  %3178 = vmatprep.mubr.bf16.mxu0 %v3004_v50 }
 0x7e9   :  { %v2743_v33 = vpop.f32.mrb[92].mxu0  ;;  %3179 = vmatmul.mubr.bf16.vlgmr.msra.gmra.mrb[104].mxu0 %v3003_v28 }
 0x7ea   :  { %v3875_v27 = vpop.f32.mrb[93].mxu0 }
 0x7eb   :  { %v2746_v43 = vpop.f32.mrb[94].mxu0 }
 0x7ec   :  { %v3876_v62 = vpop.f32.mrb[95].mxu0 }
 0x7ed   :  { %v2789_v12 = vpop.f32.mrb[124].mxu1  ;;  %v887_v62 = vpop.xlane.xlu1 %886 }
 0x7ee   :  { %v3006_v7 = vpack.c.bf16 %v2789_v12, %v2743_v33  ;;  %v3881_v46 = vpop.f32.mrb[125].mxu1  ;;  %v884_v33 = vpop.xlane.xlu0 %883 }
 0x7ef   :  { %v2792_v49 = vpop.f32.mrb[126].mxu1 }
 0x7f0   :  { %v3882_v42 = vpop.f32.mrb[127].mxu1  ;;  %3186 = vmatprep.mubr.bf16.mxu0 %v3006_v7 }
 0x7f1   :  { %v2835_v31 = vpop.f32.mrb[96].mxu0  ;;  %3187 = vmatmul.mubr.bf16.gmra.mrb[108].mxu0 %v3005_v47 }
 0x7f2   :  { %v3887_v10 = vpop.f32.mrb[97].mxu0 }
 0x7f3   :  { %v2838_v56 = vpop.f32.mrb[98].mxu0  ;;  %v890_v10 = vpop.xlane.xlu0 %889 }
 0x7f4   :  { %v3888_v26 = vpop.f32.mrb[99].mxu0 }
 0x7f5   :  { %v2881_v59 = vpop.f32.mrb[128].mxu1 }
 0x7f6   :  { %v3008_v25 = vpack.c.bf16 %v2881_v59, %v2835_v31  ;;  %v3893_v35 = vpop.f32.mrb[129].mxu1  ;;  %v907_v59 = vmul.f32 0.03125, %v884_v33 }
 0x7f7   :  { %v2884_v28 = vpop.f32.mrb[130].mxu1 }
 0x7f8   :  { %v3894_v41 = vpop.f32.mrb[131].mxu1  ;;  %3194 = vmatprep.mubr.bf16.mxu0 %v3008_v25 }
 0x7f9   :  { %v2927_v34 = vpop.f32.mrb[100].mxu0  ;;  %3195 = vmatmul.mubr.bf16.gmra.mrb[112].mxu0 %v3007_v15 }
 0x7fa   :  { %v3899_v19 = vpop.f32.mrb[101].mxu0 }
 0x7fb   :  { %v2930_v52 = vpop.f32.mrb[102].mxu0 }
 0x7fc   :  { %v3900_v60 = vpop.f32.mrb[103].mxu0 }
 0x7fd   :  { %v2973_v39 = vpop.f32.mrb[132].mxu1 }
 0x7fe   :  { %v3010_v23 = vpack.c.bf16 %v2973_v39, %v2927_v34  ;;  %v3905_v2 = vpop.f32.mrb[133].mxu1  ;;  %v908_v34 = vmul.f32 0.03125, %v887_v62  ;;  %v896_v39 = vpop.xlane.xlu0 %895 }
 0x7ff   :  { %v2976_v47 = vpop.f32.mrb[134].mxu1  ;;  %v909_v2 = vmul.f32 0.03125, %v890_v10 }
 0x800   :  { %v3906_v58 = vpop.f32.mrb[135].mxu1  ;;  %3202 = vmatprep.mubr.bf16.mxu0 %v3010_v23 }
 0x801   :  { %3203 = vmatmul.mubr.bf16.gmra.mrb[116].mxu0 %v3009_v61 }
 0x8bc   :  { %v3595_v36 = vpop.f32.mrb[104].mxu0 }
 0x8bd   :  { %v3596_v9 = vpop.f32.mrb[105].mxu0 }
 0x8be   :  { %v3597_v32 = vadd.f32 %v3596_v9, %v3595_v36  ;;  %v3598_v15 = vpop.f32.mrb[106].mxu0 }
 0x8bf   :  { %v3599_v11 = vpop.f32.mrb[107].mxu0 }
 0x8c0   :  { %v3181_v14 = vadd.f32 %v3597_v32, %v3464_v17  ;;  %v3600_v8 = vadd.f32 %v3599_v11, %v3598_v15 }
 0x8c2   :  { %v3184_v55 = vadd.f32 %v3600_v8, %v3464_v17  ;;  %v5141_v13 = vadd.f32 %v4935_v40, %v3181_v14  ;;  %v911_v14 = vmul.f32 0.03125, %v896_v39 }
 0x8c4   :  { %v3601_v22 = vpop.f32.mrb[108].mxu0  ;;  %v3221_v0 = vsel %vm881_vm3, %v5141_v13, 0.0  ;;  %v5146_v5 = vadd.f32 %v4944_v57, %v3184_v55 }
 0x8c5   :  { %v3602_v61 = vpop.f32.mrb[109].mxu0  ;;  %3222 = vadd.xlane.f32.xlu0 %v3221_v0 }
 0x8c6   :  { %v3603_v53 = vadd.f32 %v3602_v61, %v3601_v22  ;;  %v3604_v24 = vpop.f32.mrb[110].mxu0  ;;  %v3224_v29 = vsel %vm881_vm3, %v5146_v5, 0.0  ;;  %v5197_v61 = vsub.f32 %v4996_v1, %v911_v14 }
 0x8c7   :  { %v3605_v50 = vpop.f32.mrb[111].mxu0  ;;  %3225 = vadd.xlane.f32.xlu1 %v3224_v29 }
 0x8c8   :  { %v3189_v20 = vadd.f32 %v3603_v53, %v3464_v17  ;;  %v3606_v48 = vadd.f32 %v3605_v50, %v3604_v24 }
 0x8ca   :  { %v3192_v40 = vadd.f32 %v3606_v48, %v3464_v17  ;;  %v5151_v21 = vadd.f32 %v4955_v18, %v3189_v20 }
 0x8cc   :  { %v3607_v27 = vpop.f32.mrb[112].mxu0  ;;  %v3227_v57 = vsel %vm881_vm3, %v5151_v21, 0.0  ;;  %v5156_v43 = vadd.f32 %v4967_v63, %v3192_v40  ;;  %v893_v63 = vpop.xlane.xlu1 %892  ;;  %v927_v40 = vmul.f32 %v5197_v61, %v5197_v61 }
 0x8cd   :  { %v3608_v12 = vpop.f32.mrb[113].mxu0  ;;  %3228 = vadd.xlane.f32.xlu0 %v3227_v57  ;;  %v910_v9 = vmul.f32 0.03125, %v893_v63 }
 0x8ce   :  { %v3609_v7 = vadd.f32 %v3608_v12, %v3607_v27  ;;  %v3610_v46 = vpop.f32.mrb[114].mxu0  ;;  %v3230_v49 = vsel %vm881_vm3, %v5156_v43, 0.0  ;;  %v943_v57 = vsel %vm881_vm3, %v927_v40, 0.0 }
 0x8cf   :  { %v3611_v42 = vpop.f32.mrb[115].mxu0  ;;  %3231 = vadd.xlane.f32.xlu1 %v3230_v49 }
 0x8d0   :  { %v3197_v18 = vadd.f32 %v3609_v7, %v3464_v17  ;;  %v3612_v31 = vadd.f32 %v3611_v42, %v3610_v46  ;;  %v899_v36 = vpop.xlane.xlu1 %898 }
 0x8d2   :  { %v3200_v56 = vadd.f32 %v3612_v31, %v3464_v17  ;;  %v5161_v26 = vadd.f32 %v4979_v37, %v3197_v18  ;;  %v5171_v37 = vsub.f32 %v4950_v30, %v907_v59  ;;  %v5182_v30 = vsub.f32 %v4974_v4, %v909_v2 }
 0x8d4   :  { %v3613_v25 = vpop.f32.mrb[116].mxu0  ;;  %v3233_v35 = vsel %vm881_vm3, %v5161_v26, 0.0  ;;  %v5166_v28 = vadd.f32 %v4990_v44, %v3200_v56  ;;  %v5174_v44 = vsub.f32 %v4962_v38, %v908_v34  ;;  %v923_v11 = vmul.f32 %v5171_v37, %v5171_v37  ;;  %v902_v38 = vpop.xlane.xlu0 %901 }
 0x8d5   :  { %v3614_v41 = vpop.f32.mrb[117].mxu0  ;;  %3234 = vadd.xlane.f32.xlu0 %v3233_v35  ;;  %v905_v0 = vpop.xlane.xlu1 %904  ;;  %v913_v53 = vmul.f32 0.03125, %v902_v38  ;;  %v925_v24 = vmul.f32 %v5182_v30, %v5182_v30 }
 0x8d6   :  { %v3615_v19 = vadd.f32 %v3614_v41, %v3613_v25  ;;  %v3616_v52 = vpop.f32.mrb[118].mxu0  ;;  %v3236_v60 = vsel %vm881_vm3, %v5166_v28, 0.0  ;;  %v924_v4 = vmul.f32 %v5174_v44, %v5174_v44  ;;  %v914_v29 = vmul.f32 0.03125, %v905_v0 }
 0x8d7   :  { %v3617_v23 = vpop.f32.mrb[119].mxu0  ;;  %3237 = vadd.xlane.f32.xlu1 %v3236_v60  ;;  %v5209_v1 = vsub.f32 %v5017_v51, %v913_v53  ;;  %v937_v48 = vsel %vm881_vm3, %v925_v24, 0.0 }
 0x8d8   :  { %v3205_v47 = vadd.f32 %v3615_v19, %v3464_v17  ;;  %v3618_v58 = vadd.f32 %v3617_v23, %v3616_v52  ;;  %v934_v50 = vsel %vm881_vm3, %v924_v4, 0.0  ;;  %v5215_v33 = vsub.f32 %v5023_v16, %v914_v29 }
 0x8d9   :  { %v929_v51 = vmul.f32 %v5209_v1, %v5209_v1 }
 0x8da   :  { %v3208_v32 = vadd.f32 %v3618_v58, %v3464_v17  ;;  %v5177_v15 = vadd.f32 %v5001_v45, %v3205_v47  ;;  %v5190_v17 = vsub.f32 %v4985_v6, %v910_v9  ;;  %v912_v45 = vmul.f32 0.03125, %v899_v36 }
 0x8db   :  { %v930_v12 = vmul.f32 %v5215_v33, %v5215_v33  ;;  %v949_v16 = vsel %vm881_vm3, %v929_v51, 0.0 }
 0x8dc   :  { %v3239_v8 = vsel %vm881_vm3, %v5177_v15, 0.0  ;;  %v5187_v55 = vadd.f32 %v5009_v54, %v3208_v32  ;;  %v931_v54 = vsel %vm881_vm3, %v923_v11, 0.0  ;;  %v5203_v6 = vsub.f32 %v5015_v3, %v912_v45 }
 0x8dd   :  { %3240 = vadd.xlane.f32.xlu0 %v3239_v8  ;;  %v926_v20 = vmul.f32 %v5190_v17, %v5190_v17  ;;  %v952_v7 = vsel %vm881_vm3, %v930_v12, 0.0 }
 0x8de   :  { %v3242_v22 = vsel %vm881_vm3, %v5187_v55, 0.0  ;;  %v928_v27 = vmul.f32 %v5203_v6, %v5203_v6 }
 0x8df   :  { %3243 = vadd.xlane.f32.xlu1 %v3242_v22  ;;  %v940_v3 = vsel %vm881_vm3, %v926_v20, 0.0 }
 0x8e0   :  { %v946_v62 = vsel %vm881_vm3, %v928_v27, 0.0 }
 0x8e1   :  { %932 = vadd.xlane.f32.xlu0 %v931_v54 }
 0x8e3   :  { %935 = vadd.xlane.f32.xlu1 %v934_v50 }
 0x8e5   :  { %938 = vadd.xlane.f32.xlu0 %v937_v48 }
 0x8e7   :  { %941 = vadd.xlane.f32.xlu1 %v940_v3 }
 0x8e9   :  { %944 = vadd.xlane.f32.xlu0 %v943_v57 }
 0x8eb   :  { %947 = vadd.xlane.f32.xlu1 %v946_v62 }
 0x8ed   :  { %950 = vadd.xlane.f32.xlu0 %v949_v16 }
 0x8ef   :  { %953 = vadd.xlane.f32.xlu1 %v952_v7 }
 0x952   :  { %v3223_v46 = vpop.xlane.xlu0 %3222 }
 0x953   :  { %v3245_v49 = vmul.f32 0.03125, %v3223_v46 }
 0x954   :  { %v3226_v42 = vpop.xlane.xlu1 %3225 }
 0x955   :  { %v5229_v18 = vsub.f32 %v5141_v13, %v3245_v49  ;;  %v3246_v31 = vmul.f32 0.03125, %v3226_v42 }
 0x957   :  { %v5232_v10 = vsub.f32 %v5146_v5, %v3246_v31  ;;  %v3261_v56 = vmul.f32 %v5229_v18, %v5229_v18 }
 0x959   :  { %v3269_v59 = vsel %vm881_vm3, %v3261_v56, 0.0  ;;  %v3262_v63 = vmul.f32 %v5232_v10, %v5232_v10 }
 0x95a   :  { %3270 = vadd.xlane.f32.xlu0 %v3269_v59  ;;  %v3229_v25 = vpop.xlane.xlu0 %3228 }
 0x95b   :  { %v3247_v35 = vmul.f32 0.03125, %v3229_v25  ;;  %v3272_v41 = vsel %vm881_vm3, %v3262_v63, 0.0 }
 0x95c   :  { %3273 = vadd.xlane.f32.xlu1 %v3272_v41  ;;  %v3232_v13 = vpop.xlane.xlu1 %3231 }
 0x95d   :  { %v5241_v34 = vsub.f32 %v5151_v21, %v3247_v35  ;;  %v3248_v5 = vmul.f32 0.03125, %v3232_v13 }
 0x95f   :  { %v5244_v19 = vsub.f32 %v5156_v43, %v3248_v5  ;;  %v3263_v52 = vmul.f32 %v5241_v34, %v5241_v34 }
 0x961   :  { %v3275_v60 = vsel %vm881_vm3, %v3263_v52, 0.0  ;;  %v3264_v39 = vmul.f32 %v5244_v19, %v5244_v19 }
 0x962   :  { %3276 = vadd.xlane.f32.xlu0 %v3275_v60  ;;  %v3235_v23 = vpop.xlane.xlu0 %3234 }
 0x963   :  { %v3249_v2 = vmul.f32 0.03125, %v3235_v23  ;;  %v3278_v47 = vsel %vm881_vm3, %v3264_v39, 0.0 }
 0x964   :  { %3279 = vadd.xlane.f32.xlu1 %v3278_v47  ;;  %v3238_v21 = vpop.xlane.xlu1 %3237 }
 0x965   :  { %v5253_v58 = vsub.f32 %v5161_v26, %v3249_v2  ;;  %v3250_v43 = vmul.f32 0.03125, %v3238_v21  ;;  %v5277_v2 = vld [vmem:[#allocation8] ss:$0 sm:$0xff] }
 0x967   :  { %v5256_v36 = vsub.f32 %v5166_v28, %v3250_v43  ;;  %v3265_v9 = vmul.f32 %v5253_v58, %v5253_v58 }
 0x969   :  { %v3281_v32 = vsel %vm881_vm3, %v3265_v9, 0.0  ;;  %v3266_v11 = vmul.f32 %v5256_v36, %v5256_v36 }
 0x96a   :  { %3282 = vadd.xlane.f32.xlu0 %v3281_v32  ;;  %v3241_v14 = vpop.xlane.xlu0 %3240 }
 0x96b   :  { %v3251_v8 = vmul.f32 0.03125, %v3241_v14  ;;  %v3284_v38 = vsel %vm881_vm3, %v3266_v11, 0.0 }
 0x96c   :  { %3285 = vadd.xlane.f32.xlu1 %v3284_v38  ;;  %v3244_v26 = vpop.xlane.xlu1 %3243 }
 0x96d   :  { %v5265_v45 = vsub.f32 %v5177_v15, %v3251_v8  ;;  %v3252_v28 = vmul.f32 0.03125, %v3244_v26  ;;  %v5281_v26 = vld [vmem:[#allocation9] ss:$0 sm:$0xff] }
 0x96e   :  { %v933_v24 = vpop.xlane.xlu0 %932 }
 0x96f   :  { %v5268_v22 = vsub.f32 %v5187_v55, %v3252_v28  ;;  %v3267_v4 = vmul.f32 %v5265_v45, %v5265_v45  ;;  %v955_v20 = vmul.f32 0.03125, %v933_v24 }
 0x970   :  { %v936_v29 = vpop.xlane.xlu1 %935 }
 0x971   :  { %v3287_v0 = vsel %vm881_vm3, %v3267_v4, 0.0  ;;  %v3268_v53 = vmul.f32 %v5268_v22, %v5268_v22  ;;  %v956_v48 = vmul.f32 0.03125, %v936_v29  ;;  %v963_v3 = vadd.f32 1e-12, %v955_v20  ;;  %v5293_v29 = vld [vmem:[%s5370_s12] ss:$0 sm:$0xff] }
 0x972   :  { %3288 = vadd.xlane.f32.xlu0 %v3287_v0  ;;  %v939_v15 = vpop.xlane.xlu0 %938 }
 0x973   :  { %v3290_v54 = vsel %vm881_vm3, %v3268_v53, 0.0  ;;  %v964_v27 = vadd.f32 1e-12, %v956_v48  ;;  %v957_v57 = vmul.f32 0.03125, %v939_v15  ;;  %4016 = vrsqrt.f32 %v963_v3 }
 0x974   :  { %3291 = vadd.xlane.f32.xlu1 %v3290_v54  ;;  %v942_v50 = vpop.xlane.xlu1 %941 }
 0x975   :  { %4018 = vrsqrt.f32 %v964_v27  ;;  %v958_v62 = vmul.f32 0.03125, %v942_v50  ;;  %v965_v16 = vadd.f32 1e-12, %v957_v57 }
 0x976   :  { %v945_v55 = vpop.xlane.xlu0 %944 }
 0x977   :  { %v966_v49 = vadd.f32 1e-12, %v958_v62  ;;  %4020 = vrsqrt.f32 %v965_v16  ;;  %v959_v59 = vmul.f32 0.03125, %v945_v55 }
 0x978   :  { %v948_v40 = vpop.xlane.xlu1 %947 }
 0x979   :  { %v960_v25 = vmul.f32 0.03125, %v948_v40  ;;  %v967_v13 = vadd.f32 1e-12, %v959_v59 }
 0x97a   :  { %v951_v51 = vpop.xlane.xlu0 %950 }
 0x97b   :  { %v968_v39 = vadd.f32 1e-12, %v960_v25  ;;  %v961_v21 = vmul.f32 0.03125, %v951_v51 }
 0x97c   :  { %v954_v12 = vpop.xlane.xlu1 %953 }
 0x97d   :  { %v4017_v35 = vpop.eup %4016  ;;  %v962_v32 = vmul.f32 0.03125, %v954_v12  ;;  %v969_v28 = vadd.f32 1e-12, %v961_v21 }
 0x97e   :  { %v979_v60 = vmul.f32 %v4017_v35, %v5171_v37 }
 0x97f   :  { %v4019_v41 = vpop.eup %4018  ;;  %v970_v0 = vadd.f32 1e-12, %v962_v32 }
 0x980   :  { %v980_v47 = vmul.f32 %v4019_v41, %v5174_v44  ;;  %v993_v8 = vmul.f32 %v5277_v2, %v979_v60  ;;  %v5287_v44 = vld [vmem:[%s5369_s11] ss:$0 sm:$0xff]  ;;  %s4204_s11 = smov [#allocation12]  }
 0x981   :  { %v4021_v14 = vpop.eup %4020  ;;  %s3390_s12 = sshll.u32 %s4204_s11, 4  ;;  %s3391_s12 = int_to_ptr.vmem [resolvable:$true] %s3390_s12 }
 0x982   :  { %v994_v37 = vmul.f32 %v5277_v2, %v980_v47  ;;  %v1007_v50 = vadd.f32 %v5281_v26, %v993_v8  ;;  %v981_v20 = vmul.f32 %v4021_v14, %v5182_v30  ;;  %s4166_s19 = scalar_lea.vmem %s3391_s12, 1024  ;;  %p4171_p13 = scmp.lt.s32.totalorder %s3391_s12, %s3391_s12 }
 0x983   :  { %p4167_p12 = scmp.ne.s32.totalorder %s3391_s12, %s4166_s19  ;;  %p4172_p0 = scmp.lt.s32.totalorder %s4166_s19, %s4166_s19 }
 0x984   :  { %v1008_v3 = vadd.f32 %v5281_v26, %v994_v37  ;;  %v3353_v16 = vmul.f32 0.7, %v1007_v50 }
 0x985   :  { %p4173_p1 = por %p4172_p0, %p4171_p13 }
 0x987   :  { %p4174_p2 = pnand %p4173_p1, %p4167_p12 }
 0x9e7   :  { %v3271_v7 = vpop.xlane.xlu0 %3270 }
 0x9e8   :  { %v3293_v46 = vmul.f32 0.03125, %v3271_v7  ;;  %v995_v7 = vmul.f32 %v5277_v2, %v981_v20 }
 0x9e9   :  { %v3274_v42 = vpop.xlane.xlu1 %3273 }
 0x9ea   :  { %v3301_v31 = vadd.f32 1e-12, %v3293_v46  ;;  %v3294_v56 = vmul.f32 0.03125, %v3274_v42  ;;  %v3354_v42 = vmul.f32 0.7, %v1008_v3 }
 0x9ec   :  { %4022 = vrsqrt.f32 %v3301_v31  ;;  %v3302_v63 = vadd.f32 1e-12, %v3294_v56 }
 0x9ed   :  { %4024 = vrsqrt.f32 %v966_v49 }
 0x9ee   :  { %4026 = vrsqrt.f32 %v3302_v63 }
 0x9ef   :  { %v3277_v5 = vpop.xlane.xlu0 %3276  ;;  %4028 = vrsqrt.f32 %v967_v13 }
 0x9f0   :  { %v3295_v52 = vmul.f32 0.03125, %v3277_v5  ;;  %v1009_v5 = vadd.f32 %v5281_v26, %v995_v7 }
 0x9f1   :  { %v3280_v23 = vpop.xlane.xlu1 %3279 }
 0x9f2   :  { %v3303_v43 = vadd.f32 1e-12, %v3295_v52  ;;  %v3296_v9 = vmul.f32 0.03125, %v3280_v23 }
 0x9f4   :  { %4030 = vrsqrt.f32 %v3303_v43  ;;  %v3304_v11 = vadd.f32 1e-12, %v3296_v9 }
 0x9f5   :  { %4032 = vrsqrt.f32 %v968_v39 }
 0x9f6   :  { %v4023_v38 = vpop.eup %4022  ;;  %4034 = vrsqrt.f32 %v3304_v11 }
 0x9f7   :  { %v4025_v4 = vpop.eup %4024  ;;  %v3317_v53 = vmul.f32 %v4023_v38, %v5229_v18  ;;  %v3283_v54 = vpop.xlane.xlu0 %3282  ;;  %4036 = vrsqrt.f32 %v969_v28 }
 0x9f8   :  { %v4027_v24 = vpop.eup %4026  ;;  %v3297_v15 = vmul.f32 0.03125, %v3283_v54  ;;  %v982_v57 = vmul.f32 %v4025_v4, %v5190_v17  ;;  %4038 = vrsqrt.f32 %v970_v0 }
 0x9f9   :  { %v3331_v48 = vmul.f32 %v5287_v44, %v3317_v53  ;;  %v3318_v55 = vmul.f32 %v4027_v24, %v5232_v10  ;;  %v3286_v40 = vpop.xlane.xlu1 %3285  ;;  %v4029_v30 = vpop.eup %4028 }
 0x9fa   :  { %v3305_v18 = vadd.f32 1e-12, %v3297_v15  ;;  %v3298_v27 = vmul.f32 0.03125, %v3286_v40  ;;  %v996_v17 = vmul.f32 %v5277_v2, %v982_v57  ;;  %v983_v41 = vmul.f32 %v4029_v30, %v5197_v61 }
 0x9fb   :  { %v3345_v51 = vadd.f32 %v5293_v29, %v3331_v48  ;;  %v3332_v62 = vmul.f32 %v5287_v44, %v3318_v55 }
 0x9fc   :  { %4040 = vrsqrt.f32 %v3305_v18  ;;  %v3306_v12 = vadd.f32 1e-12, %v3298_v27  ;;  %v997_v11 = vmul.f32 %v5277_v2, %v983_v41 }
 0x9fd   :  { %v3361_v10 = vmul.f32 0.3, %v3345_v51  ;;  %v3346_v46 = vadd.f32 %v5293_v29, %v3332_v62 }
 0x9fe   :  { %v4031_v49 = vpop.eup %4030  ;;  %4042 = vrsqrt.f32 %v3306_v12  ;;  %v1011_v15 = vadd.f32 %v5281_v26, %v997_v11 }
 0x9ff   :  { %v4033_v31 = vpop.eup %4032  ;;  %v3369_v56 = vadd.f32 %v3361_v10, %v3353_v16  ;;  %v3362_v59 = vmul.f32 0.3, %v3346_v46  ;;  %v3319_v63 = vmul.f32 %v4031_v49, %v5241_v34  ;;  %v3289_v25 = vpop.xlane.xlu0 %3288  ;;  %v1010_v34 = vadd.f32 %v5281_v26, %v996_v17 }
 0xa00   :  { %v4035_v35 = vpop.eup %4034  ;;  %v3299_v13 = vmul.f32 0.03125, %v3289_v25  ;;  %v984_v47 = vmul.f32 %v4033_v31, %v5203_v6  ;;  %v3357_v27 = vmul.f32 0.7, %v1011_v15 }
 0xa01   :  { %3377 = vst.msk [vmem:[#allocation12] sm:$0xff] %vm881_vm3, %v3369_v56  ;;  %v3370_v52 = vadd.f32 %v3362_v59, %v3354_v42  ;;  %v3333_v60 = vmul.f32 %v5287_v44, %v3319_v63  ;;  %v3320_v39 = vmul.f32 %v4035_v35, %v5244_v19  ;;  %v3292_v23 = vpop.xlane.xlu1 %3291  ;;  %v4037_v32 = vpop.eup %4036  ;;  %v3355_v19 = vmul.f32 0.7, %v1009_v5 }
 0xa02   :  { %v3307_v21 = vadd.f32 1e-12, %v3299_v13  ;;  %v3300_v43 = vmul.f32 0.03125, %v3292_v23  ;;  %v4039_v8 = vpop.eup %4038  ;;  %v998_v28 = vmul.f32 %v5277_v2, %v984_v47  ;;  %v3356_v4 = vmul.f32 0.7, %v1010_v34 }
 0xa03   :  { %3378 = vst.msk [vmem:[#allocation12 + $0x8] sm:$0xff] %vm881_vm3, %v3370_v52  ;;  %v3347_v61 = vadd.f32 %v5293_v29, %v3333_v60  ;;  %v3334_v9 = vmul.f32 %v5287_v44, %v3320_v39  ;;  %v985_v50 = vmul.f32 %v4037_v32, %v5209_v1  ;;  %v986_v3 = vmul.f32 %v4039_v8, %v5215_v33 }
 0xa04   :  { %4044 = vrsqrt.f32 %v3307_v21  ;;  %v3308_v14 = vadd.f32 1e-12, %v3300_v43  ;;  %v1012_v40 = vadd.f32 %v5281_v26, %v998_v28 }
 0xa05   :  { %v3363_v38 = vmul.f32 0.3, %v3347_v61  ;;  %v3348_v6 = vadd.f32 %v5293_v29, %v3334_v9  ;;  %v999_v1 = vmul.f32 %v5277_v2, %v985_v50 }
 0xa06   :  { %v4041_v37 = vpop.eup %4040  ;;  %4046 = vrsqrt.f32 %v3308_v14  ;;  %v3358_v12 = vmul.f32 0.7, %v1012_v40 }
 0xa07   :  { %v3371_v0 = vadd.f32 %v3363_v38, %v3355_v19  ;;  %v3364_v53 = vmul.f32 0.3, %v3348_v6  ;;  %v3321_v54 = vmul.f32 %v4041_v37, %v5253_v58  ;;  %v1013_v10 = vadd.f32 %v5281_v26, %v999_v1 }
 0xa08   :  { %v4043_v24 = vpop.eup %4042 }
 0xa09   :  { %3379 = vst.msk [vmem:[#allocation12 + $0x10] sm:$0xff] %vm881_vm3, %v3371_v0  ;;  %v3372_v20 = vadd.f32 %v3364_v53, %v3356_v4  ;;  %v3335_v48 = vmul.f32 %v5287_v44, %v3321_v54  ;;  %v3322_v55 = vmul.f32 %v4043_v24, %v5256_v36  ;;  %v1000_v36 = vmul.f32 %v5277_v2, %v986_v3 }
 0xa0a   :  { %v3359_v56 = vmul.f32 0.7, %v1013_v10 }
 0xa0b   :  { %3380 = vst.msk [vmem:[#allocation12 + $0x18] sm:$0xff] %vm881_vm3, %v3372_v20  ;;  %v3349_v58 = vadd.f32 %v5293_v29, %v3335_v48  ;;  %v3336_v18 = vmul.f32 %v5287_v44, %v3322_v55  ;;  %v1014_v31 = vadd.f32 %v5281_v26, %v1000_v36 }
 0xa0d   :  { %v3365_v57 = vmul.f32 0.3, %v3349_v58  ;;  %v3350_v51 = vadd.f32 %v5293_v29, %v3336_v18  ;;  %v3360_v63 = vmul.f32 0.7, %v1014_v31 }
 0xa0e   :  { %v4045_v62 = vpop.eup %4044 }
 0xa0f   :  { %v3373_v30 = vadd.f32 %v3365_v57, %v3357_v27  ;;  %v3366_v16 = vmul.f32 0.3, %v3350_v51  ;;  %v3323_v33 = vmul.f32 %v4045_v62, %v5265_v45 }
 0xa10   :  { %v4047_v7 = vpop.eup %4046 }
 0xa11   :  { %3381 = vst.msk [vmem:[#allocation12 + $0x20] sm:$0xff] %vm881_vm3, %v3373_v30  ;;  %v3374_v46 = vadd.f32 %v3366_v16, %v3358_v12  ;;  %v3337_v49 = vmul.f32 %v5287_v44, %v3323_v33  ;;  %v3324_v42 = vmul.f32 %v4047_v7, %v5268_v22 }
 0xa13   :  { %3382 = vst.msk [vmem:[#allocation12 + $0x28] sm:$0xff] %vm881_vm3, %v3374_v46  ;;  %v3351_v2 = vadd.f32 %v5293_v29, %v3337_v49  ;;  %v3338_v17 = vmul.f32 %v5287_v44, %v3324_v42 }
 0xa15   :  { %v3367_v45 = vmul.f32 0.3, %v3351_v2  ;;  %v3352_v59 = vadd.f32 %v5293_v29, %v3338_v17 }
 0xa17   :  { %v3375_v25 = vadd.f32 %v3367_v45, %v3359_v56  ;;  %v3368_v35 = vmul.f32 0.3, %v3352_v59 }
 0xa19   :  { %3383 = vst.msk [vmem:[#allocation12 + $0x30] sm:$0xff] %vm881_vm3, %v3375_v25  ;;  %v3376_v22 = vadd.f32 %v3368_v35, %v3360_v63 }
 0xa1b   :  { %3384 = vst.msk [vmem:[#allocation12 + $0x38] sm:$0xff] %vm881_vm3, %v3376_v22 }
 0xa1c   :  { %4177 = shalt.err (!%p4174_p2)
}
 0xa1d   :  { %s4178_s15 = scalar_lea.hbm %s5371_s13, 1024 }
 0xa1e   :  { %p4179_p3 = scmp.ne.s32.totalorder %s5371_s13, %s4178_s15  ;;  %p4182_p4 = scmp.lt.u32.totalorder %s4178_s15, %s5371_s13 }
 0xa20   :  { %p4184_p5 = pnand %p4182_p4, %p4179_p3 }
 0xa22   :  { %4187 = shalt.err (!%p4184_p5)
}
 0xa23   :  { %s4205_s18 = smov 128   ;;  %s4206_s20 = smov 8  }
 0xa24   :  { %3396 = dma.vmem_to_hbm [thread:$0]  %s3391_s12, 1024, %s5371_s13, [#allocation5], %s4205_s18, %s4205_s18, %s4206_s20  }
 0xa25   :  { %4194 = dma.done.wait [#allocation5], 1024  }
 0xa26   :  { %4195 = vsyncadd [#allocation5], 4294966272 }
 0xa27   :  { %3400 = vsyncpa [#allocation4], 1 }
 0xa28   :  { %3401 = vsyncpa [#allocation7], 1 }
 0xa29   :  { %3402 = vsyncpa [#allocation10], 1 }
 0xa2a   :  { %3403 = vsyncpa [#allocation5], 1 }

</bundles_post_ra>
